<compile_context>
chip_gen: v7x
topology: tpu7x:2x2x1
jax: 0.10.0
libtpu: 0.0.40
codegen_flags: <defaults>
</compile_context>

<pallas_src>
import functools

import jax
import jax.numpy as jnp
from jax import lax
from jax.experimental import pallas as pl
from jax.experimental.pallas import tpu as pltpu

# ----- small, deterministic model configuration (shapes implied by the module) -----
VOCAB_SIZE = 50
VOCAB_PAD = 64            # embedding table padded to an aligned row count
SENTENCE_LEN = 8
EMBED_DEPTH = 32
HIDDEN_SIZE = 32
LSTM_LAYERS = 2
CLASSES = 3
ATTN_HEADS = 4
BATCH = 2
PADDING_IDX = VOCAB_SIZE - 1
LN_EPS = 1e-5

_VSPEC = pl.BlockSpec(memory_space=pltpu.MemorySpace.VMEM)


# --------------------------------------------------------------------------------
# Single fused kernel
# --------------------------------------------------------------------------------
def sentiment_fused_kernel(idata_ref, lstm_w_ref, attn_w_ref, bias_ref, wout_ref, o_ref):
    f32, bf16 = jnp.float32, jnp.bfloat16
    B, L, E, H, NH = BATCH, SENTENCE_LEN, EMBED_DEPTH, HIDDEN_SIZE, ATTN_HEADS
    V = VOCAB_PAD
    H3, H4, H8 = 3 * H, 4 * H, 8 * H

    ints = idata_ref[...]                       # (B*L + B, 1) int32
    tok = ints[0:B * L, :]                      # (16, 1), rows (b, t) batch-major
    lens = ints[B * L:B * L + B, :]             # (B, 1)

    bias_all = bias_ref[...]                    # (8, 256) f32
    b_lstm0 = bias_all[0:1, :]
    b_lstm1 = bias_all[1:2, :]
    bqkv = bias_all[2:3, 0:3 * E]
    bo = bias_all[3:4, 0:E]
    gamma = bias_all[4:5, 0:E]
    beta = bias_all[5:6, 0:E]
    bout = bias_all[6:7, 0:CLASSES]

    # ---- embedding lookup as a one-hot bf16 matmul (padding row of the table is zero) ----
    emb_w = attn_w_ref[0:V, :][:, 0:E]                                   # (64, 32) bf16
    vocab_iota = lax.broadcasted_iota(jnp.int32, (B * L, V), 1)
    one_hot = (vocab_iota == tok).astype(bf16)                           # (16, 64)
    x2 = jnp.dot(one_hot, emb_w, preferred_element_type=f32)             # (16, 32), rows (b, t)

    # ---- multi-head self-attention (seq axis = B, batch axis = L, as in the reference) ----
    wqkv = attn_w_ref[V:V + E, :][:, 0:3 * E]                            # (32, 96), q cols pre-scaled
    wo_w = attn_w_ref[V + E:V + 2 * E, :][:, 0:E]                        # (32, 32)
    r0 = V + 2 * E
    p_big = attn_w_ref[r0:r0 + B * B * E, :][:, 0:B * B * NH]            # (128, 16) head-sum selector
    pt_big = attn_w_ref[r0 + B * B * E:r0 + B * B * E + B * B * NH, :]   # (16, 128) head-broadcast

    qkv = jnp.dot(x2.astype(bf16), wqkv, preferred_element_type=f32) + bqkv   # (16, 96)
    q, k, v = qkv[:, 0:E], qkv[:, E:2 * E], qkv[:, 2 * E:3 * E]
    q0, q1 = q[0:L, :], q[L:2 * L, :]
    k0, k1 = k[0:L, :], k[L:2 * L, :]
    v0, v1 = v[0:L, :], v[L:2 * L, :]

    # one lane-dense MXU pass for all 4 (query,key) score blocks
    qk_big = jnp.concatenate([q0 * k0, q0 * k1, q1 * k0, q1 * k1], axis=1)    # (8, 128)
    s_all = jnp.dot(qk_big.astype(bf16), p_big, preferred_element_type=f32)   # (8, 16)
    # softmax over the 2 key positions == sigmoid of the score difference (exact)
    p00 = jax.nn.sigmoid(s_all[:, 0:NH] - s_all[:, NH:2 * NH])
    p10 = jax.nn.sigmoid(s_all[:, 2 * NH:3 * NH] - s_all[:, 3 * NH:4 * NH])
    probs = jnp.concatenate([p00, 1.0 - p00, p10, 1.0 - p10], axis=1)         # (8, 16)
    w_big = jnp.dot(probs.astype(bf16), pt_big, preferred_element_type=f32)   # (8, 128)
    prod = w_big * jnp.concatenate([v0, v1, v0, v1], axis=1)
    ctx = jnp.concatenate([prod[:, 0:E] + prod[:, E:2 * E],
                           prod[:, 2 * E:3 * E] + prod[:, 3 * E:4 * E]],
                          axis=0)                                             # (16, 32), rows (b, t)
    attn_out = jnp.dot(ctx.astype(bf16), wo_w, preferred_element_type=f32) + bo

    # ---- residual + LayerNorm (f32) ----
    y = x2 + attn_out
    mean = jnp.mean(y, axis=-1, keepdims=True)
    var = jnp.mean((y - mean) ** 2, axis=-1, keepdims=True)
    y_ln = (y - mean) * lax.rsqrt(var + LN_EPS) * gamma + beta                # (16, 32), rows (b, t)

    # ---- packed bidirectional LSTM, both directions fused into one recurrence ----
    # fused gate lanes: [i_f f_f o_f g_f | i_b f_b o_b g_b], H lanes each (8H total).
    def bilstm(x_in, wih, whh, b_row, rows_at_time):
        # x_in (B*L, din) f32, wih (din, 8H) bf16, whh (2H, 8H) bf16 block-structured.
        xg = jnp.dot(x_in.astype(bf16), wih, preferred_element_type=f32) + b_row   # (B*L, 8H)
        h_f = jnp.zeros((B, H), f32)
        c_f = jnp.zeros((B, H), f32)
        h_b = jnp.zeros((B, H), f32)
        c_b = jnp.zeros((B, H), f32)
        ys_f = [None] * L
        ys_b = [None] * L

        def cell(g, c, h, mask):
            sig = jax.nn.sigmoid(g[:, 0:H3])            # contiguous [i | f | o]
            gg = jnp.tanh(g[:, H3:H4])                  # g gate only
            c_new = sig[:, H:2 * H] * c + sig[:, 0:H] * gg
            h_new = sig[:, 2 * H:H3] * jnp.tanh(c_new)
            # packed-sequence semantics: frozen state, zero output past the length
            return (jnp.where(mask, c_new, c),
                    jnp.where(mask, h_new, h),
                    jnp.where(mask, h_new, 0.0))

        for s in range(L):                              # static, fully unrolled
            tb = L - 1 - s                              # bwd direction walks time in reverse
            a_f = rows_at_time(xg, s)[:, 0:H4]          # (B, 4H); independent of h (prefetchable)
            a_b = rows_at_time(xg, tb)[:, H4:H8]
            if s == 0:                                  # h == 0 -> recurrent term is exactly zero
                g_f, g_b = a_f, a_b
            else:
                hcat = jnp.concatenate([h_f, h_b], axis=1).astype(bf16)       # (B, 2H)
                r = jnp.dot(hcat, whh, preferred_element_type=f32)            # (B, 8H)
                g_f = a_f + r[:, 0:H4]
                g_b = a_b + r[:, H4:H8]
            c_f, h_f, y_f = cell(g_f, c_f, h_f, lens > s)
            c_b, h_b, y_b = cell(g_b, c_b, h_b, lens > tb)
            ys_f[s] = y_f
            ys_b[tb] = y_b
        return ys_f, ys_b

    def rows_bm(xg, t):        # batch-major input: rows {b*L + t}
        return jnp.concatenate([xg[b * L + t:b * L + t + 1, :] for b in range(B)], axis=0)

    def rows_tm(xg, t):        # time-major input: contiguous row block
        return xg[t * B:(t + 1) * B, :]

    # layer 1 (input = layernormed attention output, batch-major)
    wih0 = lstm_w_ref[0:E, :]
    whh0 = lstm_w_ref[E:E + 2 * H, :]
    y1f, y1b = bilstm(y_ln, wih0, whh0, b_lstm0, rows_bm)
    # layer-1 output assembled time-major so layer-2 per-step rows are contiguous
    x1_tm = jnp.concatenate(
        [jnp.concatenate([y1f[t], y1b[t]], axis=1) for t in range(L)], axis=0)   # (16, 2H), rows (t, b)
    # TODO(synk): inter-layer LSTM dropout (p=0.15) omitted — inference semantics.

    # layer 2
    wih1 = lstm_w_ref[E + 2 * H:E + 4 * H, :]
    whh1 = lstm_w_ref[E + 4 * H:E + 6 * H, :]
    y2f, y2b = bilstm(x1_tm, wih1, whh1, b_lstm1, rows_tm)

    # ---- flatten (B, L*2H) with per-t blocks [fwd|bwd] (matches PyTorch) -> ReLU -> Linear ----
    flat = jnp.concatenate([blk for t in range(L) for blk in (y2f[t], y2b[t])], axis=1)   # (2, 512)
    logits = jnp.dot(jnp.maximum(flat, 0.0).astype(bf16), wout_ref[...],
                     preferred_element_type=f32) + bout
    o_ref[...] = logits


# --------------------------------------------------------------------------------
# Wrapper
# --------------------------------------------------------------------------------
def sentiment_forward(tokens, lens, packed):
    B, L = tokens.shape
    idata = jnp.concatenate([tokens.reshape(B * L, 1).astype(jnp.int32),
                             lens.reshape(B, 1).astype(jnp.int32)], axis=0)   # (B*L+B, 1)
    args = (idata, packed['lstm_w'], packed['attn_w'], packed['biases'], packed['wout'])
    return pl.pallas_call(
        sentiment_fused_kernel,
        out_shape=jax.ShapeDtypeStruct((B, CLASSES), jnp.float32),
        in_specs=[_VSPEC] * len(args),
        out_specs=_VSPEC,
    )(*args)


def init_params(key):
    """Random params, already packed into the kernel's VMEM slabs.

    Mapping from PyTorch parameters (for porting trained weights):
      * LSTM gate column order within each direction block is (i, f, o, g) —
        PyTorch stores (i, f, g, o), so permute columns; wih = weight_ih.T per
        direction lane-concatenated, whh = weight_hh.T placed block-structured
        ([0:H]->fwd lanes, [H:2H]->bwd lanes, zeros elsewhere), b = b_ih + b_hh.
      * MHA: wqkv = in_proj_weight.T with the q columns (and q bias) pre-scaled
        by 1/sqrt(head_dim); wo = out_proj.weight.T.
      * wout rows must follow the flatten order (t-major, [fwd|bwd] per step).
    """
    keys = jax.random.split(key, 24)
    kit = iter(keys)

    def nrm(shape, scale=0.1):
        return jax.random.normal(next(kit), shape, dtype=jnp.float32) * scale

    E, H, NH = EMBED_DEPTH, HIDDEN_SIZE, ATTN_HEADS
    hd = E // NH
    bf = jnp.bfloat16

    emb = nrm((VOCAB_SIZE, E), 1.0).at[PADDING_IDX].set(0.0)     # padding_idx row is zero
    emb_pad = jnp.zeros((VOCAB_PAD, E), jnp.float32).at[:VOCAB_SIZE].set(emb)

    # attention weights (q projection + bias pre-scaled by 1/sqrt(head_dim))
    wqkv = nrm((E, 3 * E))
    bqkv = nrm((1, 3 * E))
    qscale = 1.0 / float(hd) ** 0.5
    wqkv = wqkv.at[:, 0:E].multiply(qscale)
    bqkv = bqkv.at[:, 0:E].multiply(qscale)
    wo = nrm((E, E))
    bo = nrm((1, E))
    gamma = jnp.ones((1, E), jnp.float32)
    beta = jnp.zeros((1, E), jnp.float32)

    # fused bidirectional LSTM weights per layer
    def lstm_layer(din):
        wih = jnp.concatenate([nrm((din, 4 * H)), nrm((din, 4 * H))], axis=1)      # (din, 8H)
        whh = jnp.zeros((2 * H, 8 * H), jnp.float32)
        whh = whh.at[0:H, 0:4 * H].set(nrm((H, 4 * H)))
        whh = whh.at[H:2 * H, 4 * H:8 * H].set(nrm((H, 4 * H)))
        b = jnp.concatenate([nrm((1, 4 * H)), nrm((1, 4 * H))], axis=1)            # b_ih + b_hh folded
        return wih, whh, b

    wih0, whh0, b0 = lstm_layer(E)
    wih1, whh1, b1 = lstm_layer(2 * H)

    wout = nrm((SENTENCE_LEN * 2 * H, CLASSES))
    bout = nrm((1, CLASSES))

    # ---- pack into VMEM slabs ----
    lstm_w = jnp.concatenate([wih0, whh0, wih1, whh1], axis=0).astype(bf)          # (224, 256)

    # block-diagonal attention selectors (head-sum / head-broadcast over B*B pairs)
    P = BATCH * BATCH
    r = jnp.arange(P * E)[:, None]
    c = jnp.arange(P * NH)[None, :]
    p_big = ((r // E == c // NH) & ((r % E) // hd == c % NH)).astype(bf)           # (128, 16)
    pt_big = p_big.T                                                               # (16, 128)

    attn_rows = VOCAB_PAD + 2 * E + P * E + P * NH                                 # 272
    attn_w = jnp.zeros((attn_rows, 128), bf)
    attn_w = attn_w.at[0:VOCAB_PAD, 0:E].set(emb_pad.astype(bf))
    attn_w = attn_w.at[VOCAB_PAD:VOCAB_PAD + E, 0:3 * E].set(wqkv.astype(bf))
    attn_w = attn_w.at[VOCAB_PAD + E:VOCAB_PAD + 2 * E, 0:E].set(wo.astype(bf))
    r0 = VOCAB_PAD + 2 * E
    attn_w = attn_w.at[r0:r0 + P * E, 0:P * NH].set(p_big)
    attn_w = attn_w.at[r0 + P * E:r0 + P * E + P * NH, 0:P * E].set(pt_big)

    biases = jnp.zeros((8, 8 * H), jnp.float32)                                    # (8, 256)
    biases = biases.at[0, :].set(b0[0])
    biases = biases.at[1, :].set(b1[0])
    biases = biases.at[2, 0:3 * E].set(bqkv[0])
    biases = biases.at[3, 0:E].set(bo[0])
    biases = biases.at[4, 0:E].set(gamma[0])
    biases = biases.at[5, 0:E].set(beta[0])
    biases = biases.at[6, 0:CLASSES].set(bout[0])

    return dict(lstm_w=lstm_w, attn_w=attn_w, biases=biases, wout=wout.astype(bf))


if __name__ == "__main__":
    key = jax.random.PRNGKey(0)
    pkey, dkey = jax.random.split(key)
    packed = init_params(pkey)

    lens = jnp.array([SENTENCE_LEN, 5], dtype=jnp.int32)
    tokens = jax.random.randint(dkey, (BATCH, SENTENCE_LEN), 0, VOCAB_SIZE - 1)
    pos = jnp.arange(SENTENCE_LEN)[None, :]
    tokens = jnp.where(pos < lens[:, None], tokens, PADDING_IDX).astype(jnp.int32)

    fwd = jax.jit(functools.partial(sentiment_forward, packed=packed))
    out = jax.block_until_ready(fwd(tokens, lens))
    assert out.shape == (BATCH, CLASSES)
    assert bool(jnp.all(jnp.isfinite(out)))
    print("KERNEL_OK")
</pallas_src>

<mosaic_0001>
module attributes {stable_mosaic.version = 11 : i64} {
  func.func @sentiment_fused_kernel(%arg0: memref<18x1xi32, #tpu.memory_space<vmem>>, %arg1: memref<224x256xbf16, #tpu.memory_space<vmem>>, %arg2: memref<272x128xbf16, #tpu.memory_space<vmem>>, %arg3: memref<8x256xf32, #tpu.memory_space<vmem>>, %arg4: memref<512x3xbf16, #tpu.memory_space<vmem>>, %arg5: memref<2x3xf32, #tpu.memory_space<vmem>>) attributes {dimension_semantics = [], scalar_prefetch = 0 : i64, scratch_operands = 0 : i64, tpu.core_type = #tpu.core_type<tc>} {
    %c0 = arith.constant 0 : index
    %c0_0 = arith.constant 0 : index
    %0 = vector.load %arg0[%c0, %c0_0] : memref<18x1xi32, #tpu.memory_space<vmem>>, vector<18x1xi32>
    %1 = vector.extract_strided_slice %0 {offsets = [0, 0], sizes = [16, 1], strides = [1, 1]} : vector<18x1xi32> to vector<16x1xi32>
    %2 = vector.extract_strided_slice %0 {offsets = [16, 0], sizes = [2, 1], strides = [1, 1]} : vector<18x1xi32> to vector<2x1xi32>
    %c0_1 = arith.constant 0 : index
    %c0_2 = arith.constant 0 : index
    %3 = vector.load %arg3[%c0_1, %c0_2] : memref<8x256xf32, #tpu.memory_space<vmem>>, vector<8x256xf32>
    %4 = vector.extract_strided_slice %3 {offsets = [0, 0], sizes = [1, 256], strides = [1, 1]} : vector<8x256xf32> to vector<1x256xf32>
    %5 = vector.extract_strided_slice %3 {offsets = [1, 0], sizes = [1, 256], strides = [1, 1]} : vector<8x256xf32> to vector<1x256xf32>
    %6 = vector.extract_strided_slice %3 {offsets = [2, 0], sizes = [1, 96], strides = [1, 1]} : vector<8x256xf32> to vector<1x96xf32>
    %7 = vector.extract_strided_slice %3 {offsets = [3, 0], sizes = [1, 32], strides = [1, 1]} : vector<8x256xf32> to vector<1x32xf32>
    %8 = vector.extract_strided_slice %3 {offsets = [4, 0], sizes = [1, 32], strides = [1, 1]} : vector<8x256xf32> to vector<1x32xf32>
    %9 = vector.extract_strided_slice %3 {offsets = [5, 0], sizes = [1, 32], strides = [1, 1]} : vector<8x256xf32> to vector<1x32xf32>
    %10 = vector.extract_strided_slice %3 {offsets = [6, 0], sizes = [1, 3], strides = [1, 1]} : vector<8x256xf32> to vector<1x3xf32>
    %c0_3 = arith.constant 0 : index
    %c0_4 = arith.constant 0 : index
    %11 = vector.load %arg2[%c0_3, %c0_4] : memref<272x128xbf16, #tpu.memory_space<vmem>>, vector<64x128xbf16>
    %12 = vector.extract_strided_slice %11 {offsets = [0, 0], sizes = [64, 32], strides = [1, 1]} : vector<64x128xbf16> to vector<64x32xbf16>
    %13 = tpu.iota {dimensions = array<i32: 1>} : vector<16x64xi32>
    %14 = vector.broadcast %1 : vector<16x1xi32> to vector<16x64xi32>
    %15 = arith.cmpi eq, %13, %14 : vector<16x64xi32>
    %16 = arith.extui %15 : vector<16x64xi1> to vector<16x64xi32>
    %17 = arith.sitofp %16 : vector<16x64xi32> to vector<16x64xf32>
    %18 = arith.truncf %17 : vector<16x64xf32> to vector<16x64xbf16>
    %cst = arith.constant dense<0.000000e+00> : vector<16x32xf32>
    %19 = tpu.matmul %18, %12, %cst {dimension_numbers = #tpu.dot_dimension_numbers<[1], [0], [0], [1], [0, 0, 1, 1], [], []>} : vector<16x64xbf16>, vector<64x32xbf16>, vector<16x32xf32> -> vector<16x32xf32>
    %c64 = arith.constant 64 : index
    %c0_5 = arith.constant 0 : index
    %20 = vector.load %arg2[%c64, %c0_5] : memref<272x128xbf16, #tpu.memory_space<vmem>>, vector<32x128xbf16>
    %21 = vector.extract_strided_slice %20 {offsets = [0, 0], sizes = [32, 96], strides = [1, 1]} : vector<32x128xbf16> to vector<32x96xbf16>
    %c96 = arith.constant 96 : index
    %c0_6 = arith.constant 0 : index
    %22 = vector.load %arg2[%c96, %c0_6] : memref<272x128xbf16, #tpu.memory_space<vmem>>, vector<32x128xbf16>
    %23 = vector.extract_strided_slice %22 {offsets = [0, 0], sizes = [32, 32], strides = [1, 1]} : vector<32x128xbf16> to vector<32x32xbf16>
    %c128 = arith.constant 128 : index
    %c0_7 = arith.constant 0 : index
    %24 = vector.load %arg2[%c128, %c0_7] : memref<272x128xbf16, #tpu.memory_space<vmem>>, vector<128x128xbf16>
    %25 = vector.extract_strided_slice %24 {offsets = [0, 0], sizes = [128, 16], strides = [1, 1]} : vector<128x128xbf16> to vector<128x16xbf16>
    %c256 = arith.constant 256 : index
    %c0_8 = arith.constant 0 : index
    %26 = vector.load %arg2[%c256, %c0_8] : memref<272x128xbf16, #tpu.memory_space<vmem>>, vector<16x128xbf16>
    %27 = arith.truncf %19 : vector<16x32xf32> to vector<16x32xbf16>
    %cst_9 = arith.constant dense<0.000000e+00> : vector<16x96xf32>
    %28 = tpu.matmul %27, %21, %cst_9 {dimension_numbers = #tpu.dot_dimension_numbers<[1], [0], [0], [1], [0, 0, 1, 1], [], []>} : vector<16x32xbf16>, vector<32x96xbf16>, vector<16x96xf32> -> vector<16x96xf32>
    %29 = vector.broadcast %6 : vector<1x96xf32> to vector<16x96xf32>
    %30 = arith.addf %28, %29 : vector<16x96xf32>
    %31 = vector.extract_strided_slice %30 {offsets = [0, 0], sizes = [16, 32], strides = [1, 1]} : vector<16x96xf32> to vector<16x32xf32>
    %32 = vector.extract_strided_slice %30 {offsets = [0, 32], sizes = [16, 32], strides = [1, 1]} : vector<16x96xf32> to vector<16x32xf32>
    %33 = vector.extract_strided_slice %30 {offsets = [0, 64], sizes = [16, 32], strides = [1, 1]} : vector<16x96xf32> to vector<16x32xf32>
    %34 = vector.extract_strided_slice %31 {offsets = [0, 0], sizes = [8, 32], strides = [1, 1]} : vector<16x32xf32> to vector<8x32xf32>
    %35 = vector.extract_strided_slice %31 {offsets = [8, 0], sizes = [8, 32], strides = [1, 1]} : vector<16x32xf32> to vector<8x32xf32>
    %36 = vector.extract_strided_slice %32 {offsets = [0, 0], sizes = [8, 32], strides = [1, 1]} : vector<16x32xf32> to vector<8x32xf32>
    %37 = vector.extract_strided_slice %32 {offsets = [8, 0], sizes = [8, 32], strides = [1, 1]} : vector<16x32xf32> to vector<8x32xf32>
    %38 = vector.extract_strided_slice %33 {offsets = [0, 0], sizes = [8, 32], strides = [1, 1]} : vector<16x32xf32> to vector<8x32xf32>
    %39 = vector.extract_strided_slice %33 {offsets = [8, 0], sizes = [8, 32], strides = [1, 1]} : vector<16x32xf32> to vector<8x32xf32>
    %40 = arith.mulf %34, %36 : vector<8x32xf32>
    %41 = arith.mulf %34, %37 : vector<8x32xf32>
    %42 = arith.mulf %35, %36 : vector<8x32xf32>
    %43 = arith.mulf %35, %37 : vector<8x32xf32>
    %44 = tpu.concatenate %40, %41, %42, %43 in 1 : vector<8x32xf32>, vector<8x32xf32>, vector<8x32xf32>, vector<8x32xf32> -> vector<8x128xf32>
    %45 = arith.truncf %44 : vector<8x128xf32> to vector<8x128xbf16>
    %cst_10 = arith.constant dense<0.000000e+00> : vector<8x16xf32>
    %46 = tpu.matmul %45, %25, %cst_10 {dimension_numbers = #tpu.dot_dimension_numbers<[1], [0], [0], [1], [0, 0, 1, 1], [], []>} : vector<8x128xbf16>, vector<128x16xbf16>, vector<8x16xf32> -> vector<8x16xf32>
    %47 = vector.extract_strided_slice %46 {offsets = [0, 0], sizes = [8, 4], strides = [1, 1]} : vector<8x16xf32> to vector<8x4xf32>
    %48 = vector.extract_strided_slice %46 {offsets = [0, 4], sizes = [8, 4], strides = [1, 1]} : vector<8x16xf32> to vector<8x4xf32>
    %49 = arith.subf %47, %48 : vector<8x4xf32>
    %50 = arith.negf %49 : vector<8x4xf32>
    %51 = math.exp %50 : vector<8x4xf32>
    %cst_11 = arith.constant 1.000000e+00 : f32
    %52 = vector.broadcast %cst_11 : f32 to vector<8x4xf32>
    %53 = arith.addf %52, %51 : vector<8x4xf32>
    %54 = arith.divf %52, %53 : vector<8x4xf32>
    %55 = vector.extract_strided_slice %46 {offsets = [0, 8], sizes = [8, 4], strides = [1, 1]} : vector<8x16xf32> to vector<8x4xf32>
    %56 = vector.extract_strided_slice %46 {offsets = [0, 12], sizes = [8, 4], strides = [1, 1]} : vector<8x16xf32> to vector<8x4xf32>
    %57 = arith.subf %55, %56 : vector<8x4xf32>
    %58 = arith.negf %57 : vector<8x4xf32>
    %59 = math.exp %58 : vector<8x4xf32>
    %cst_12 = arith.constant 1.000000e+00 : f32
    %60 = vector.broadcast %cst_12 : f32 to vector<8x4xf32>
    %61 = arith.addf %60, %59 : vector<8x4xf32>
    %62 = arith.divf %60, %61 : vector<8x4xf32>
    %cst_13 = arith.constant 1.000000e+00 : f32
    %63 = vector.broadcast %cst_13 : f32 to vector<8x4xf32>
    %64 = arith.subf %63, %54 : vector<8x4xf32>
    %cst_14 = arith.constant 1.000000e+00 : f32
    %65 = vector.broadcast %cst_14 : f32 to vector<8x4xf32>
    %66 = arith.subf %65, %62 : vector<8x4xf32>
    %67 = tpu.concatenate %54, %64, %62, %66 in 1 : vector<8x4xf32>, vector<8x4xf32>, vector<8x4xf32>, vector<8x4xf32> -> vector<8x16xf32>
    %68 = arith.truncf %67 : vector<8x16xf32> to vector<8x16xbf16>
    %cst_15 = arith.constant dense<0.000000e+00> : vector<8x128xf32>
    %69 = tpu.matmul %68, %26, %cst_15 {dimension_numbers = #tpu.dot_dimension_numbers<[1], [0], [0], [1], [0, 0, 1, 1], [], []>} : vector<8x16xbf16>, vector<16x128xbf16>, vector<8x128xf32> -> vector<8x128xf32>
    %70 = tpu.concatenate %38, %39, %38, %39 in 1 : vector<8x32xf32>, vector<8x32xf32>, vector<8x32xf32>, vector<8x32xf32> -> vector<8x128xf32>
    %71 = arith.mulf %69, %70 : vector<8x128xf32>
    %72 = vector.extract_strided_slice %71 {offsets = [0, 0], sizes = [8, 32], strides = [1, 1]} : vector<8x128xf32> to vector<8x32xf32>
    %73 = vector.extract_strided_slice %71 {offsets = [0, 32], sizes = [8, 32], strides = [1, 1]} : vector<8x128xf32> to vector<8x32xf32>
    %74 = arith.addf %72, %73 : vector<8x32xf32>
    %75 = vector.extract_strided_slice %71 {offsets = [0, 64], sizes = [8, 32], strides = [1, 1]} : vector<8x128xf32> to vector<8x32xf32>
    %76 = vector.extract_strided_slice %71 {offsets = [0, 96], sizes = [8, 32], strides = [1, 1]} : vector<8x128xf32> to vector<8x32xf32>
    %77 = arith.addf %75, %76 : vector<8x32xf32>
    %78 = tpu.concatenate %74, %77 in 0 : vector<8x32xf32>, vector<8x32xf32> -> vector<16x32xf32>
    %79 = arith.truncf %78 : vector<16x32xf32> to vector<16x32xbf16>
    %cst_16 = arith.constant dense<0.000000e+00> : vector<16x32xf32>
    %80 = tpu.matmul %79, %23, %cst_16 {dimension_numbers = #tpu.dot_dimension_numbers<[1], [0], [0], [1], [0, 0, 1, 1], [], []>} : vector<16x32xbf16>, vector<32x32xbf16>, vector<16x32xf32> -> vector<16x32xf32>
    %81 = vector.broadcast %7 : vector<1x32xf32> to vector<16x32xf32>
    %82 = arith.addf %80, %81 : vector<16x32xf32>
    %83 = arith.addf %19, %82 : vector<16x32xf32>
    %cst_17 = arith.constant dense<0.000000e+00> : vector<16xf32>
    %84 = vector.multi_reduction <add>, %83, %cst_17 [1] : vector<16x32xf32> to vector<16xf32>
    %85 = vector.shape_cast %84 : vector<16xf32> to vector<16x1xf32>
    %cst_18 = arith.constant 3.200000e+01 : f32
    %86 = vector.broadcast %cst_18 : f32 to vector<16x1xf32>
    %87 = arith.divf %85, %86 : vector<16x1xf32>
    %88 = vector.broadcast %87 : vector<16x1xf32> to vector<16x32xf32>
    %89 = arith.subf %83, %88 : vector<16x32xf32>
    %90 = arith.mulf %89, %89 : vector<16x32xf32>
    %cst_19 = arith.constant dense<0.000000e+00> : vector<16xf32>
    %91 = vector.multi_reduction <add>, %90, %cst_19 [1] : vector<16x32xf32> to vector<16xf32>
    %92 = vector.shape_cast %91 : vector<16xf32> to vector<16x1xf32>
    %cst_20 = arith.constant 3.200000e+01 : f32
    %93 = vector.broadcast %cst_20 : f32 to vector<16x1xf32>
    %94 = arith.divf %92, %93 : vector<16x1xf32>
    %95 = vector.broadcast %87 : vector<16x1xf32> to vector<16x32xf32>
    %96 = arith.subf %83, %95 : vector<16x32xf32>
    %cst_21 = arith.constant 9.99999974E-6 : f32
    %97 = vector.broadcast %cst_21 : f32 to vector<16x1xf32>
    %98 = arith.addf %94, %97 : vector<16x1xf32>
    %99 = math.rsqrt %98 : vector<16x1xf32>
    %100 = vector.broadcast %99 : vector<16x1xf32> to vector<16x32xf32>
    %101 = arith.mulf %96, %100 : vector<16x32xf32>
    %102 = vector.broadcast %8 : vector<1x32xf32> to vector<16x32xf32>
    %103 = arith.mulf %101, %102 : vector<16x32xf32>
    %104 = vector.broadcast %9 : vector<1x32xf32> to vector<16x32xf32>
    %105 = arith.addf %103, %104 : vector<16x32xf32>
    %c0_22 = arith.constant 0 : index
    %c0_23 = arith.constant 0 : index
    %106 = vector.load %arg1[%c0_22, %c0_23] : memref<224x256xbf16, #tpu.memory_space<vmem>>, vector<32x256xbf16>
    %c32 = arith.constant 32 : index
    %c0_24 = arith.constant 0 : index
    %107 = vector.load %arg1[%c32, %c0_24] : memref<224x256xbf16, #tpu.memory_space<vmem>>, vector<64x256xbf16>
    %108 = arith.truncf %105 : vector<16x32xf32> to vector<16x32xbf16>
    %cst_25 = arith.constant dense<0.000000e+00> : vector<16x256xf32>
    %109 = tpu.matmul %108, %106, %cst_25 {dimension_numbers = #tpu.dot_dimension_numbers<[1], [0], [0], [1], [0, 0, 1, 1], [], []>} : vector<16x32xbf16>, vector<32x256xbf16>, vector<16x256xf32> -> vector<16x256xf32>
    %110 = vector.broadcast %4 : vector<1x256xf32> to vector<16x256xf32>
    %111 = arith.addf %109, %110 : vector<16x256xf32>
    %cst_26 = arith.constant 0.000000e+00 : f32
    %112 = vector.broadcast %cst_26 : f32 to vector<2x32xf32>
    %cst_27 = arith.constant 0.000000e+00 : f32
    %113 = vector.broadcast %cst_27 : f32 to vector<2x32xf32>
    %cst_28 = arith.constant 0.000000e+00 : f32
    %114 = vector.broadcast %cst_28 : f32 to vector<2x32xf32>
    %cst_29 = arith.constant 0.000000e+00 : f32
    %115 = vector.broadcast %cst_29 : f32 to vector<2x32xf32>
    %116 = vector.extract_strided_slice %111 {offsets = [0, 0], sizes = [1, 256], strides = [1, 1]} : vector<16x256xf32> to vector<1x256xf32>
    %117 = vector.extract_strided_slice %111 {offsets = [8, 0], sizes = [1, 256], strides = [1, 1]} : vector<16x256xf32> to vector<1x256xf32>
    %118 = tpu.concatenate %116, %117 in 0 : vector<1x256xf32>, vector<1x256xf32> -> vector<2x256xf32>
    %119 = vector.extract_strided_slice %118 {offsets = [0, 0], sizes = [2, 128], strides = [1, 1]} : vector<2x256xf32> to vector<2x128xf32>
    %120 = vector.extract_strided_slice %111 {offsets = [7, 0], sizes = [1, 256], strides = [1, 1]} : vector<16x256xf32> to vector<1x256xf32>
    %121 = vector.extract_strided_slice %111 {offsets = [15, 0], sizes = [1, 256], strides = [1, 1]} : vector<16x256xf32> to vector<1x256xf32>
    %122 = tpu.concatenate %120, %121 in 0 : vector<1x256xf32>, vector<1x256xf32> -> vector<2x256xf32>
    %123 = vector.extract_strided_slice %122 {offsets = [0, 128], sizes = [2, 128], strides = [1, 1]} : vector<2x256xf32> to vector<2x128xf32>
    %c0_i32 = arith.constant 0 : i32
    %124 = vector.broadcast %c0_i32 : i32 to vector<2x1xi32>
    %125 = arith.cmpi sgt, %2, %124 : vector<2x1xi32>
    %126 = vector.extract_strided_slice %119 {offsets = [0, 0], sizes = [2, 96], strides = [1, 1]} : vector<2x128xf32> to vector<2x96xf32>
    %127 = arith.negf %126 : vector<2x96xf32>
    %128 = math.exp %127 : vector<2x96xf32>
    %cst_30 = arith.constant 1.000000e+00 : f32
    %129 = vector.broadcast %cst_30 : f32 to vector<2x96xf32>
    %130 = arith.addf %129, %128 : vector<2x96xf32>
    %131 = arith.divf %129, %130 : vector<2x96xf32>
    %132 = vector.extract_strided_slice %119 {offsets = [0, 96], sizes = [2, 32], strides = [1, 1]} : vector<2x128xf32> to vector<2x32xf32>
    %133 = math.tanh %132 : vector<2x32xf32>
    %134 = vector.extract_strided_slice %131 {offsets = [0, 32], sizes = [2, 32], strides = [1, 1]} : vector<2x96xf32> to vector<2x32xf32>
    %135 = arith.mulf %134, %113 : vector<2x32xf32>
    %136 = vector.extract_strided_slice %131 {offsets = [0, 0], sizes = [2, 32], strides = [1, 1]} : vector<2x96xf32> to vector<2x32xf32>
    %137 = arith.mulf %136, %133 : vector<2x32xf32>
    %138 = arith.addf %135, %137 : vector<2x32xf32>
    %139 = vector.extract_strided_slice %131 {offsets = [0, 64], sizes = [2, 32], strides = [1, 1]} : vector<2x96xf32> to vector<2x32xf32>
    %140 = math.tanh %138 : vector<2x32xf32>
    %141 = arith.mulf %139, %140 : vector<2x32xf32>
    %142 = vector.shape_cast %125 : vector<2x1xi1> to vector<2x1xi1>
    %143 = vector.broadcast %142 : vector<2x1xi1> to vector<2x32xi1>
    %144 = arith.select %143, %138, %113 : vector<2x32xi1>, vector<2x32xf32>
    %145 = vector.shape_cast %125 : vector<2x1xi1> to vector<2x1xi1>
    %146 = vector.broadcast %145 : vector<2x1xi1> to vector<2x32xi1>
    %147 = arith.select %146, %141, %112 : vector<2x32xi1>, vector<2x32xf32>
    %cst_31 = arith.constant 0.000000e+00 : f32
    %148 = vector.shape_cast %125 : vector<2x1xi1> to vector<2x1xi1>
    %149 = vector.broadcast %148 : vector<2x1xi1> to vector<2x32xi1>
    %150 = vector.broadcast %cst_31 : f32 to vector<2x32xf32>
    %151 = arith.select %149, %141, %150 : vector<2x32xi1>, vector<2x32xf32>
    %c7_i32 = arith.constant 7 : i32
    %152 = vector.broadcast %c7_i32 : i32 to vector<2x1xi32>
    %153 = arith.cmpi sgt, %2, %152 : vector<2x1xi32>
    %154 = vector.extract_strided_slice %123 {offsets = [0, 0], sizes = [2, 96], strides = [1, 1]} : vector<2x128xf32> to vector<2x96xf32>
    %155 = arith.negf %154 : vector<2x96xf32>
    %156 = math.exp %155 : vector<2x96xf32>
    %cst_32 = arith.constant 1.000000e+00 : f32
    %157 = vector.broadcast %cst_32 : f32 to vector<2x96xf32>
    %158 = arith.addf %157, %156 : vector<2x96xf32>
    %159 = arith.divf %157, %158 : vector<2x96xf32>
    %160 = vector.extract_strided_slice %123 {offsets = [0, 96], sizes = [2, 32], strides = [1, 1]} : vector<2x128xf32> to vector<2x32xf32>
    %161 = math.tanh %160 : vector<2x32xf32>
    %162 = vector.extract_strided_slice %159 {offsets = [0, 32], sizes = [2, 32], strides = [1, 1]} : vector<2x96xf32> to vector<2x32xf32>
    %163 = arith.mulf %162, %115 : vector<2x32xf32>
    %164 = vector.extract_strided_slice %159 {offsets = [0, 0], sizes = [2, 32], strides = [1, 1]} : vector<2x96xf32> to vector<2x32xf32>
    %165 = arith.mulf %164, %161 : vector<2x32xf32>
    %166 = arith.addf %163, %165 : vector<2x32xf32>
    %167 = vector.extract_strided_slice %159 {offsets = [0, 64], sizes = [2, 32], strides = [1, 1]} : vector<2x96xf32> to vector<2x32xf32>
    %168 = math.tanh %166 : vector<2x32xf32>
    %169 = arith.mulf %167, %168 : vector<2x32xf32>
    %170 = vector.shape_cast %153 : vector<2x1xi1> to vector<2x1xi1>
    %171 = vector.broadcast %170 : vector<2x1xi1> to vector<2x32xi1>
    %172 = arith.select %171, %166, %115 : vector<2x32xi1>, vector<2x32xf32>
    %173 = vector.shape_cast %153 : vector<2x1xi1> to vector<2x1xi1>
    %174 = vector.broadcast %173 : vector<2x1xi1> to vector<2x32xi1>
    %175 = arith.select %174, %169, %114 : vector<2x32xi1>, vector<2x32xf32>
    %cst_33 = arith.constant 0.000000e+00 : f32
    %176 = vector.shape_cast %153 : vector<2x1xi1> to vector<2x1xi1>
    %177 = vector.broadcast %176 : vector<2x1xi1> to vector<2x32xi1>
    %178 = vector.broadcast %cst_33 : f32 to vector<2x32xf32>
    %179 = arith.select %177, %169, %178 : vector<2x32xi1>, vector<2x32xf32>
    %180 = vector.extract_strided_slice %111 {offsets = [1, 0], sizes = [1, 256], strides = [1, 1]} : vector<16x256xf32> to vector<1x256xf32>
    %181 = vector.extract_strided_slice %111 {offsets = [9, 0], sizes = [1, 256], strides = [1, 1]} : vector<16x256xf32> to vector<1x256xf32>
    %182 = tpu.concatenate %180, %181 in 0 : vector<1x256xf32>, vector<1x256xf32> -> vector<2x256xf32>
    %183 = vector.extract_strided_slice %182 {offsets = [0, 0], sizes = [2, 128], strides = [1, 1]} : vector<2x256xf32> to vector<2x128xf32>
    %184 = vector.extract_strided_slice %111 {offsets = [6, 0], sizes = [1, 256], strides = [1, 1]} : vector<16x256xf32> to vector<1x256xf32>
    %185 = vector.extract_strided_slice %111 {offsets = [14, 0], sizes = [1, 256], strides = [1, 1]} : vector<16x256xf32> to vector<1x256xf32>
    %186 = tpu.concatenate %184, %185 in 0 : vector<1x256xf32>, vector<1x256xf32> -> vector<2x256xf32>
    %187 = vector.extract_strided_slice %186 {offsets = [0, 128], sizes = [2, 128], strides = [1, 1]} : vector<2x256xf32> to vector<2x128xf32>
    %188 = tpu.concatenate %147, %175 in 1 : vector<2x32xf32>, vector<2x32xf32> -> vector<2x64xf32>
    %189 = arith.truncf %188 : vector<2x64xf32> to vector<2x64xbf16>
    %cst_34 = arith.constant dense<0.000000e+00> : vector<2x256xf32>
    %190 = tpu.matmul %189, %107, %cst_34 {dimension_numbers = #tpu.dot_dimension_numbers<[1], [0], [0], [1], [0, 0, 1, 1], [], []>} : vector<2x64xbf16>, vector<64x256xbf16>, vector<2x256xf32> -> vector<2x256xf32>
    %191 = vector.extract_strided_slice %190 {offsets = [0, 0], sizes = [2, 128], strides = [1, 1]} : vector<2x256xf32> to vector<2x128xf32>
    %192 = arith.addf %183, %191 : vector<2x128xf32>
    %193 = vector.extract_strided_slice %190 {offsets = [0, 128], sizes = [2, 128], strides = [1, 1]} : vector<2x256xf32> to vector<2x128xf32>
    %194 = arith.addf %187, %193 : vector<2x128xf32>
    %c1_i32 = arith.constant 1 : i32
    %195 = vector.broadcast %c1_i32 : i32 to vector<2x1xi32>
    %196 = arith.cmpi sgt, %2, %195 : vector<2x1xi32>
    %197 = vector.extract_strided_slice %192 {offsets = [0, 0], sizes = [2, 96], strides = [1, 1]} : vector<2x128xf32> to vector<2x96xf32>
    %198 = arith.negf %197 : vector<2x96xf32>
    %199 = math.exp %198 : vector<2x96xf32>
    %cst_35 = arith.constant 1.000000e+00 : f32
    %200 = vector.broadcast %cst_35 : f32 to vector<2x96xf32>
    %201 = arith.addf %200, %199 : vector<2x96xf32>
    %202 = arith.divf %200, %201 : vector<2x96xf32>
    %203 = vector.extract_strided_slice %192 {offsets = [0, 96], sizes = [2, 32], strides = [1, 1]} : vector<2x128xf32> to vector<2x32xf32>
    %204 = math.tanh %203 : vector<2x32xf32>
    %205 = vector.extract_strided_slice %202 {offsets = [0, 32], sizes = [2, 32], strides = [1, 1]} : vector<2x96xf32> to vector<2x32xf32>
    %206 = arith.mulf %205, %144 : vector<2x32xf32>
    %207 = vector.extract_strided_slice %202 {offsets = [0, 0], sizes = [2, 32], strides = [1, 1]} : vector<2x96xf32> to vector<2x32xf32>
    %208 = arith.mulf %207, %204 : vector<2x32xf32>
    %209 = arith.addf %206, %208 : vector<2x32xf32>
    %210 = vector.extract_strided_slice %202 {offsets = [0, 64], sizes = [2, 32], strides = [1, 1]} : vector<2x96xf32> to vector<2x32xf32>
    %211 = math.tanh %209 : vector<2x32xf32>
    %212 = arith.mulf %210, %211 : vector<2x32xf32>
    %213 = vector.shape_cast %196 : vector<2x1xi1> to vector<2x1xi1>
    %214 = vector.broadcast %213 : vector<2x1xi1> to vector<2x32xi1>
    %215 = arith.select %214, %209, %144 : vector<2x32xi1>, vector<2x32xf32>
    %216 = vector.shape_cast %196 : vector<2x1xi1> to vector<2x1xi1>
    %217 = vector.broadcast %216 : vector<2x1xi1> to vector<2x32xi1>
    %218 = arith.select %217, %212, %147 : vector<2x32xi1>, vector<2x32xf32>
    %cst_36 = arith.constant 0.000000e+00 : f32
    %219 = vector.shape_cast %196 : vector<2x1xi1> to vector<2x1xi1>
    %220 = vector.broadcast %219 : vector<2x1xi1> to vector<2x32xi1>
    %221 = vector.broadcast %cst_36 : f32 to vector<2x32xf32>
    %222 = arith.select %220, %212, %221 : vector<2x32xi1>, vector<2x32xf32>
    %c6_i32 = arith.constant 6 : i32
    %223 = vector.broadcast %c6_i32 : i32 to vector<2x1xi32>
    %224 = arith.cmpi sgt, %2, %223 : vector<2x1xi32>
    %225 = vector.extract_strided_slice %194 {offsets = [0, 0], sizes = [2, 96], strides = [1, 1]} : vector<2x128xf32> to vector<2x96xf32>
    %226 = arith.negf %225 : vector<2x96xf32>
    %227 = math.exp %226 : vector<2x96xf32>
    %cst_37 = arith.constant 1.000000e+00 : f32
    %228 = vector.broadcast %cst_37 : f32 to vector<2x96xf32>
    %229 = arith.addf %228, %227 : vector<2x96xf32>
    %230 = arith.divf %228, %229 : vector<2x96xf32>
    %231 = vector.extract_strided_slice %194 {offsets = [0, 96], sizes = [2, 32], strides = [1, 1]} : vector<2x128xf32> to vector<2x32xf32>
    %232 = math.tanh %231 : vector<2x32xf32>
    %233 = vector.extract_strided_slice %230 {offsets = [0, 32], sizes = [2, 32], strides = [1, 1]} : vector<2x96xf32> to vector<2x32xf32>
    %234 = arith.mulf %233, %172 : vector<2x32xf32>
    %235 = vector.extract_strided_slice %230 {offsets = [0, 0], sizes = [2, 32], strides = [1, 1]} : vector<2x96xf32> to vector<2x32xf32>
    %236 = arith.mulf %235, %232 : vector<2x32xf32>
    %237 = arith.addf %234, %236 : vector<2x32xf32>
    %238 = vector.extract_strided_slice %230 {offsets = [0, 64], sizes = [2, 32], strides = [1, 1]} : vector<2x96xf32> to vector<2x32xf32>
    %239 = math.tanh %237 : vector<2x32xf32>
    %240 = arith.mulf %238, %239 : vector<2x32xf32>
    %241 = vector.shape_cast %224 : vector<2x1xi1> to vector<2x1xi1>
    %242 = vector.broadcast %241 : vector<2x1xi1> to vector<2x32xi1>
    %243 = arith.select %242, %237, %172 : vector<2x32xi1>, vector<2x32xf32>
    %244 = vector.shape_cast %224 : vector<2x1xi1> to vector<2x1xi1>
    %245 = vector.broadcast %244 : vector<2x1xi1> to vector<2x32xi1>
    %246 = arith.select %245, %240, %175 : vector<2x32xi1>, vector<2x32xf32>
    %cst_38 = arith.constant 0.000000e+00 : f32
    %247 = vector.shape_cast %224 : vector<2x1xi1> to vector<2x1xi1>
    %248 = vector.broadcast %247 : vector<2x1xi1> to vector<2x32xi1>
    %249 = vector.broadcast %cst_38 : f32 to vector<2x32xf32>
    %250 = arith.select %248, %240, %249 : vector<2x32xi1>, vector<2x32xf32>
    %251 = vector.extract_strided_slice %111 {offsets = [2, 0], sizes = [1, 256], strides = [1, 1]} : vector<16x256xf32> to vector<1x256xf32>
    %252 = vector.extract_strided_slice %111 {offsets = [10, 0], sizes = [1, 256], strides = [1, 1]} : vector<16x256xf32> to vector<1x256xf32>
    %253 = tpu.concatenate %251, %252 in 0 : vector<1x256xf32>, vector<1x256xf32> -> vector<2x256xf32>
    %254 = vector.extract_strided_slice %253 {offsets = [0, 0], sizes = [2, 128], strides = [1, 1]} : vector<2x256xf32> to vector<2x128xf32>
    %255 = vector.extract_strided_slice %111 {offsets = [5, 0], sizes = [1, 256], strides = [1, 1]} : vector<16x256xf32> to vector<1x256xf32>
    %256 = vector.extract_strided_slice %111 {offsets = [13, 0], sizes = [1, 256], strides = [1, 1]} : vector<16x256xf32> to vector<1x256xf32>
    %257 = tpu.concatenate %255, %256 in 0 : vector<1x256xf32>, vector<1x256xf32> -> vector<2x256xf32>
    %258 = vector.extract_strided_slice %257 {offsets = [0, 128], sizes = [2, 128], strides = [1, 1]} : vector<2x256xf32> to vector<2x128xf32>
    %259 = tpu.concatenate %218, %246 in 1 : vector<2x32xf32>, vector<2x32xf32> -> vector<2x64xf32>
    %260 = arith.truncf %259 : vector<2x64xf32> to vector<2x64xbf16>
    %cst_39 = arith.constant dense<0.000000e+00> : vector<2x256xf32>
    %261 = tpu.matmul %260, %107, %cst_39 {dimension_numbers = #tpu.dot_dimension_numbers<[1], [0], [0], [1], [0, 0, 1, 1], [], []>} : vector<2x64xbf16>, vector<64x256xbf16>, vector<2x256xf32> -> vector<2x256xf32>
    %262 = vector.extract_strided_slice %261 {offsets = [0, 0], sizes = [2, 128], strides = [1, 1]} : vector<2x256xf32> to vector<2x128xf32>
    %263 = arith.addf %254, %262 : vector<2x128xf32>
    %264 = vector.extract_strided_slice %261 {offsets = [0, 128], sizes = [2, 128], strides = [1, 1]} : vector<2x256xf32> to vector<2x128xf32>
    %265 = arith.addf %258, %264 : vector<2x128xf32>
    %c2_i32 = arith.constant 2 : i32
    %266 = vector.broadcast %c2_i32 : i32 to vector<2x1xi32>
    %267 = arith.cmpi sgt, %2, %266 : vector<2x1xi32>
    %268 = vector.extract_strided_slice %263 {offsets = [0, 0], sizes = [2, 96], strides = [1, 1]} : vector<2x128xf32> to vector<2x96xf32>
    %269 = arith.negf %268 : vector<2x96xf32>
    %270 = math.exp %269 : vector<2x96xf32>
    %cst_40 = arith.constant 1.000000e+00 : f32
    %271 = vector.broadcast %cst_40 : f32 to vector<2x96xf32>
    %272 = arith.addf %271, %270 : vector<2x96xf32>
    %273 = arith.divf %271, %272 : vector<2x96xf32>
    %274 = vector.extract_strided_slice %263 {offsets = [0, 96], sizes = [2, 32], strides = [1, 1]} : vector<2x128xf32> to vector<2x32xf32>
    %275 = math.tanh %274 : vector<2x32xf32>
    %276 = vector.extract_strided_slice %273 {offsets = [0, 32], sizes = [2, 32], strides = [1, 1]} : vector<2x96xf32> to vector<2x32xf32>
    %277 = arith.mulf %276, %215 : vector<2x32xf32>
    %278 = vector.extract_strided_slice %273 {offsets = [0, 0], sizes = [2, 32], strides = [1, 1]} : vector<2x96xf32> to vector<2x32xf32>
    %279 = arith.mulf %278, %275 : vector<2x32xf32>
    %280 = arith.addf %277, %279 : vector<2x32xf32>
    %281 = vector.extract_strided_slice %273 {offsets = [0, 64], sizes = [2, 32], strides = [1, 1]} : vector<2x96xf32> to vector<2x32xf32>
    %282 = math.tanh %280 : vector<2x32xf32>
    %283 = arith.mulf %281, %282 : vector<2x32xf32>
    %284 = vector.shape_cast %267 : vector<2x1xi1> to vector<2x1xi1>
    %285 = vector.broadcast %284 : vector<2x1xi1> to vector<2x32xi1>
    %286 = arith.select %285, %280, %215 : vector<2x32xi1>, vector<2x32xf32>
    %287 = vector.shape_cast %267 : vector<2x1xi1> to vector<2x1xi1>
    %288 = vector.broadcast %287 : vector<2x1xi1> to vector<2x32xi1>
    %289 = arith.select %288, %283, %218 : vector<2x32xi1>, vector<2x32xf32>
    %cst_41 = arith.constant 0.000000e+00 : f32
    %290 = vector.shape_cast %267 : vector<2x1xi1> to vector<2x1xi1>
    %291 = vector.broadcast %290 : vector<2x1xi1> to vector<2x32xi1>
    %292 = vector.broadcast %cst_41 : f32 to vector<2x32xf32>
    %293 = arith.select %291, %283, %292 : vector<2x32xi1>, vector<2x32xf32>
    %c5_i32 = arith.constant 5 : i32
    %294 = vector.broadcast %c5_i32 : i32 to vector<2x1xi32>
    %295 = arith.cmpi sgt, %2, %294 : vector<2x1xi32>
    %296 = vector.extract_strided_slice %265 {offsets = [0, 0], sizes = [2, 96], strides = [1, 1]} : vector<2x128xf32> to vector<2x96xf32>
    %297 = arith.negf %296 : vector<2x96xf32>
    %298 = math.exp %297 : vector<2x96xf32>
    %cst_42 = arith.constant 1.000000e+00 : f32
    %299 = vector.broadcast %cst_42 : f32 to vector<2x96xf32>
    %300 = arith.addf %299, %298 : vector<2x96xf32>
    %301 = arith.divf %299, %300 : vector<2x96xf32>
    %302 = vector.extract_strided_slice %265 {offsets = [0, 96], sizes = [2, 32], strides = [1, 1]} : vector<2x128xf32> to vector<2x32xf32>
    %303 = math.tanh %302 : vector<2x32xf32>
    %304 = vector.extract_strided_slice %301 {offsets = [0, 32], sizes = [2, 32], strides = [1, 1]} : vector<2x96xf32> to vector<2x32xf32>
    %305 = arith.mulf %304, %243 : vector<2x32xf32>
    %306 = vector.extract_strided_slice %301 {offsets = [0, 0], sizes = [2, 32], strides = [1, 1]} : vector<2x96xf32> to vector<2x32xf32>
    %307 = arith.mulf %306, %303 : vector<2x32xf32>
    %308 = arith.addf %305, %307 : vector<2x32xf32>
    %309 = vector.extract_strided_slice %301 {offsets = [0, 64], sizes = [2, 32], strides = [1, 1]} : vector<2x96xf32> to vector<2x32xf32>
    %310 = math.tanh %308 : vector<2x32xf32>
    %311 = arith.mulf %309, %310 : vector<2x32xf32>
    %312 = vector.shape_cast %295 : vector<2x1xi1> to vector<2x1xi1>
    %313 = vector.broadcast %312 : vector<2x1xi1> to vector<2x32xi1>
    %314 = arith.select %313, %308, %243 : vector<2x32xi1>, vector<2x32xf32>
    %315 = vector.shape_cast %295 : vector<2x1xi1> to vector<2x1xi1>
    %316 = vector.broadcast %315 : vector<2x1xi1> to vector<2x32xi1>
    %317 = arith.select %316, %311, %246 : vector<2x32xi1>, vector<2x32xf32>
    %cst_43 = arith.constant 0.000000e+00 : f32
    %318 = vector.shape_cast %295 : vector<2x1xi1> to vector<2x1xi1>
    %319 = vector.broadcast %318 : vector<2x1xi1> to vector<2x32xi1>
    %320 = vector.broadcast %cst_43 : f32 to vector<2x32xf32>
    %321 = arith.select %319, %311, %320 : vector<2x32xi1>, vector<2x32xf32>
    %322 = vector.extract_strided_slice %111 {offsets = [3, 0], sizes = [1, 256], strides = [1, 1]} : vector<16x256xf32> to vector<1x256xf32>
    %323 = vector.extract_strided_slice %111 {offsets = [11, 0], sizes = [1, 256], strides = [1, 1]} : vector<16x256xf32> to vector<1x256xf32>
    %324 = tpu.concatenate %322, %323 in 0 : vector<1x256xf32>, vector<1x256xf32> -> vector<2x256xf32>
    %325 = vector.extract_strided_slice %324 {offsets = [0, 0], sizes = [2, 128], strides = [1, 1]} : vector<2x256xf32> to vector<2x128xf32>
    %326 = vector.extract_strided_slice %111 {offsets = [4, 0], sizes = [1, 256], strides = [1, 1]} : vector<16x256xf32> to vector<1x256xf32>
    %327 = vector.extract_strided_slice %111 {offsets = [12, 0], sizes = [1, 256], strides = [1, 1]} : vector<16x256xf32> to vector<1x256xf32>
    %328 = tpu.concatenate %326, %327 in 0 : vector<1x256xf32>, vector<1x256xf32> -> vector<2x256xf32>
    %329 = vector.extract_strided_slice %328 {offsets = [0, 128], sizes = [2, 128], strides = [1, 1]} : vector<2x256xf32> to vector<2x128xf32>
    %330 = tpu.concatenate %289, %317 in 1 : vector<2x32xf32>, vector<2x32xf32> -> vector<2x64xf32>
    %331 = arith.truncf %330 : vector<2x64xf32> to vector<2x64xbf16>
    %cst_44 = arith.constant dense<0.000000e+00> : vector<2x256xf32>
    %332 = tpu.matmul %331, %107, %cst_44 {dimension_numbers = #tpu.dot_dimension_numbers<[1], [0], [0], [1], [0, 0, 1, 1], [], []>} : vector<2x64xbf16>, vector<64x256xbf16>, vector<2x256xf32> -> vector<2x256xf32>
    %333 = vector.extract_strided_slice %332 {offsets = [0, 0], sizes = [2, 128], strides = [1, 1]} : vector<2x256xf32> to vector<2x128xf32>
    %334 = arith.addf %325, %333 : vector<2x128xf32>
    %335 = vector.extract_strided_slice %332 {offsets = [0, 128], sizes = [2, 128], strides = [1, 1]} : vector<2x256xf32> to vector<2x128xf32>
    %336 = arith.addf %329, %335 : vector<2x128xf32>
    %c3_i32 = arith.constant 3 : i32
    %337 = vector.broadcast %c3_i32 : i32 to vector<2x1xi32>
    %338 = arith.cmpi sgt, %2, %337 : vector<2x1xi32>
    %339 = vector.extract_strided_slice %334 {offsets = [0, 0], sizes = [2, 96], strides = [1, 1]} : vector<2x128xf32> to vector<2x96xf32>
    %340 = arith.negf %339 : vector<2x96xf32>
    %341 = math.exp %340 : vector<2x96xf32>
    %cst_45 = arith.constant 1.000000e+00 : f32
    %342 = vector.broadcast %cst_45 : f32 to vector<2x96xf32>
    %343 = arith.addf %342, %341 : vector<2x96xf32>
    %344 = arith.divf %342, %343 : vector<2x96xf32>
    %345 = vector.extract_strided_slice %334 {offsets = [0, 96], sizes = [2, 32], strides = [1, 1]} : vector<2x128xf32> to vector<2x32xf32>
    %346 = math.tanh %345 : vector<2x32xf32>
    %347 = vector.extract_strided_slice %344 {offsets = [0, 32], sizes = [2, 32], strides = [1, 1]} : vector<2x96xf32> to vector<2x32xf32>
    %348 = arith.mulf %347, %286 : vector<2x32xf32>
    %349 = vector.extract_strided_slice %344 {offsets = [0, 0], sizes = [2, 32], strides = [1, 1]} : vector<2x96xf32> to vector<2x32xf32>
    %350 = arith.mulf %349, %346 : vector<2x32xf32>
    %351 = arith.addf %348, %350 : vector<2x32xf32>
    %352 = vector.extract_strided_slice %344 {offsets = [0, 64], sizes = [2, 32], strides = [1, 1]} : vector<2x96xf32> to vector<2x32xf32>
    %353 = math.tanh %351 : vector<2x32xf32>
    %354 = arith.mulf %352, %353 : vector<2x32xf32>
    %355 = vector.shape_cast %338 : vector<2x1xi1> to vector<2x1xi1>
    %356 = vector.broadcast %355 : vector<2x1xi1> to vector<2x32xi1>
    %357 = arith.select %356, %351, %286 : vector<2x32xi1>, vector<2x32xf32>
    %358 = vector.shape_cast %338 : vector<2x1xi1> to vector<2x1xi1>
    %359 = vector.broadcast %358 : vector<2x1xi1> to vector<2x32xi1>
    %360 = arith.select %359, %354, %289 : vector<2x32xi1>, vector<2x32xf32>
    %cst_46 = arith.constant 0.000000e+00 : f32
    %361 = vector.shape_cast %338 : vector<2x1xi1> to vector<2x1xi1>
    %362 = vector.broadcast %361 : vector<2x1xi1> to vector<2x32xi1>
    %363 = vector.broadcast %cst_46 : f32 to vector<2x32xf32>
    %364 = arith.select %362, %354, %363 : vector<2x32xi1>, vector<2x32xf32>
    %c4_i32 = arith.constant 4 : i32
    %365 = vector.broadcast %c4_i32 : i32 to vector<2x1xi32>
    %366 = arith.cmpi sgt, %2, %365 : vector<2x1xi32>
    %367 = vector.extract_strided_slice %336 {offsets = [0, 0], sizes = [2, 96], strides = [1, 1]} : vector<2x128xf32> to vector<2x96xf32>
    %368 = arith.negf %367 : vector<2x96xf32>
    %369 = math.exp %368 : vector<2x96xf32>
    %cst_47 = arith.constant 1.000000e+00 : f32
    %370 = vector.broadcast %cst_47 : f32 to vector<2x96xf32>
    %371 = arith.addf %370, %369 : vector<2x96xf32>
    %372 = arith.divf %370, %371 : vector<2x96xf32>
    %373 = vector.extract_strided_slice %336 {offsets = [0, 96], sizes = [2, 32], strides = [1, 1]} : vector<2x128xf32> to vector<2x32xf32>
    %374 = math.tanh %373 : vector<2x32xf32>
    %375 = vector.extract_strided_slice %372 {offsets = [0, 32], sizes = [2, 32], strides = [1, 1]} : vector<2x96xf32> to vector<2x32xf32>
    %376 = arith.mulf %375, %314 : vector<2x32xf32>
    %377 = vector.extract_strided_slice %372 {offsets = [0, 0], sizes = [2, 32], strides = [1, 1]} : vector<2x96xf32> to vector<2x32xf32>
    %378 = arith.mulf %377, %374 : vector<2x32xf32>
    %379 = arith.addf %376, %378 : vector<2x32xf32>
    %380 = vector.extract_strided_slice %372 {offsets = [0, 64], sizes = [2, 32], strides = [1, 1]} : vector<2x96xf32> to vector<2x32xf32>
    %381 = math.tanh %379 : vector<2x32xf32>
    %382 = arith.mulf %380, %381 : vector<2x32xf32>
    %383 = vector.shape_cast %366 : vector<2x1xi1> to vector<2x1xi1>
    %384 = vector.broadcast %383 : vector<2x1xi1> to vector<2x32xi1>
    %385 = arith.select %384, %379, %314 : vector<2x32xi1>, vector<2x32xf32>
    %386 = vector.shape_cast %366 : vector<2x1xi1> to vector<2x1xi1>
    %387 = vector.broadcast %386 : vector<2x1xi1> to vector<2x32xi1>
    %388 = arith.select %387, %382, %317 : vector<2x32xi1>, vector<2x32xf32>
    %cst_48 = arith.constant 0.000000e+00 : f32
    %389 = vector.shape_cast %366 : vector<2x1xi1> to vector<2x1xi1>
    %390 = vector.broadcast %389 : vector<2x1xi1> to vector<2x32xi1>
    %391 = vector.broadcast %cst_48 : f32 to vector<2x32xf32>
    %392 = arith.select %390, %382, %391 : vector<2x32xi1>, vector<2x32xf32>
    %393 = vector.extract_strided_slice %111 {offsets = [4, 0], sizes = [1, 256], strides = [1, 1]} : vector<16x256xf32> to vector<1x256xf32>
    %394 = vector.extract_strided_slice %111 {offsets = [12, 0], sizes = [1, 256], strides = [1, 1]} : vector<16x256xf32> to vector<1x256xf32>
    %395 = tpu.concatenate %393, %394 in 0 : vector<1x256xf32>, vector<1x256xf32> -> vector<2x256xf32>
    %396 = vector.extract_strided_slice %395 {offsets = [0, 0], sizes = [2, 128], strides = [1, 1]} : vector<2x256xf32> to vector<2x128xf32>
    %397 = vector.extract_strided_slice %111 {offsets = [3, 0], sizes = [1, 256], strides = [1, 1]} : vector<16x256xf32> to vector<1x256xf32>
    %398 = vector.extract_strided_slice %111 {offsets = [11, 0], sizes = [1, 256], strides = [1, 1]} : vector<16x256xf32> to vector<1x256xf32>
    %399 = tpu.concatenate %397, %398 in 0 : vector<1x256xf32>, vector<1x256xf32> -> vector<2x256xf32>
    %400 = vector.extract_strided_slice %399 {offsets = [0, 128], sizes = [2, 128], strides = [1, 1]} : vector<2x256xf32> to vector<2x128xf32>
    %401 = tpu.concatenate %360, %388 in 1 : vector<2x32xf32>, vector<2x32xf32> -> vector<2x64xf32>
    %402 = arith.truncf %401 : vector<2x64xf32> to vector<2x64xbf16>
    %cst_49 = arith.constant dense<0.000000e+00> : vector<2x256xf32>
    %403 = tpu.matmul %402, %107, %cst_49 {dimension_numbers = #tpu.dot_dimension_numbers<[1], [0], [0], [1], [0, 0, 1, 1], [], []>} : vector<2x64xbf16>, vector<64x256xbf16>, vector<2x256xf32> -> vector<2x256xf32>
    %404 = vector.extract_strided_slice %403 {offsets = [0, 0], sizes = [2, 128], strides = [1, 1]} : vector<2x256xf32> to vector<2x128xf32>
    %405 = arith.addf %396, %404 : vector<2x128xf32>
    %406 = vector.extract_strided_slice %403 {offsets = [0, 128], sizes = [2, 128], strides = [1, 1]} : vector<2x256xf32> to vector<2x128xf32>
    %407 = arith.addf %400, %406 : vector<2x128xf32>
    %c4_i32_50 = arith.constant 4 : i32
    %408 = vector.broadcast %c4_i32_50 : i32 to vector<2x1xi32>
    %409 = arith.cmpi sgt, %2, %408 : vector<2x1xi32>
    %410 = vector.extract_strided_slice %405 {offsets = [0, 0], sizes = [2, 96], strides = [1, 1]} : vector<2x128xf32> to vector<2x96xf32>
    %411 = arith.negf %410 : vector<2x96xf32>
    %412 = math.exp %411 : vector<2x96xf32>
    %cst_51 = arith.constant 1.000000e+00 : f32
    %413 = vector.broadcast %cst_51 : f32 to vector<2x96xf32>
    %414 = arith.addf %413, %412 : vector<2x96xf32>
    %415 = arith.divf %413, %414 : vector<2x96xf32>
    %416 = vector.extract_strided_slice %405 {offsets = [0, 96], sizes = [2, 32], strides = [1, 1]} : vector<2x128xf32> to vector<2x32xf32>
    %417 = math.tanh %416 : vector<2x32xf32>
    %418 = vector.extract_strided_slice %415 {offsets = [0, 32], sizes = [2, 32], strides = [1, 1]} : vector<2x96xf32> to vector<2x32xf32>
    %419 = arith.mulf %418, %357 : vector<2x32xf32>
    %420 = vector.extract_strided_slice %415 {offsets = [0, 0], sizes = [2, 32], strides = [1, 1]} : vector<2x96xf32> to vector<2x32xf32>
    %421 = arith.mulf %420, %417 : vector<2x32xf32>
    %422 = arith.addf %419, %421 : vector<2x32xf32>
    %423 = vector.extract_strided_slice %415 {offsets = [0, 64], sizes = [2, 32], strides = [1, 1]} : vector<2x96xf32> to vector<2x32xf32>
    %424 = math.tanh %422 : vector<2x32xf32>
    %425 = arith.mulf %423, %424 : vector<2x32xf32>
    %426 = vector.shape_cast %409 : vector<2x1xi1> to vector<2x1xi1>
    %427 = vector.broadcast %426 : vector<2x1xi1> to vector<2x32xi1>
    %428 = arith.select %427, %422, %357 : vector<2x32xi1>, vector<2x32xf32>
    %429 = vector.shape_cast %409 : vector<2x1xi1> to vector<2x1xi1>
    %430 = vector.broadcast %429 : vector<2x1xi1> to vector<2x32xi1>
    %431 = arith.select %430, %425, %360 : vector<2x32xi1>, vector<2x32xf32>
    %cst_52 = arith.constant 0.000000e+00 : f32
    %432 = vector.shape_cast %409 : vector<2x1xi1> to vector<2x1xi1>
    %433 = vector.broadcast %432 : vector<2x1xi1> to vector<2x32xi1>
    %434 = vector.broadcast %cst_52 : f32 to vector<2x32xf32>
    %435 = arith.select %433, %425, %434 : vector<2x32xi1>, vector<2x32xf32>
    %c3_i32_53 = arith.constant 3 : i32
    %436 = vector.broadcast %c3_i32_53 : i32 to vector<2x1xi32>
    %437 = arith.cmpi sgt, %2, %436 : vector<2x1xi32>
    %438 = vector.extract_strided_slice %407 {offsets = [0, 0], sizes = [2, 96], strides = [1, 1]} : vector<2x128xf32> to vector<2x96xf32>
    %439 = arith.negf %438 : vector<2x96xf32>
    %440 = math.exp %439 : vector<2x96xf32>
    %cst_54 = arith.constant 1.000000e+00 : f32
    %441 = vector.broadcast %cst_54 : f32 to vector<2x96xf32>
    %442 = arith.addf %441, %440 : vector<2x96xf32>
    %443 = arith.divf %441, %442 : vector<2x96xf32>
    %444 = vector.extract_strided_slice %407 {offsets = [0, 96], sizes = [2, 32], strides = [1, 1]} : vector<2x128xf32> to vector<2x32xf32>
    %445 = math.tanh %444 : vector<2x32xf32>
    %446 = vector.extract_strided_slice %443 {offsets = [0, 32], sizes = [2, 32], strides = [1, 1]} : vector<2x96xf32> to vector<2x32xf32>
    %447 = arith.mulf %446, %385 : vector<2x32xf32>
    %448 = vector.extract_strided_slice %443 {offsets = [0, 0], sizes = [2, 32], strides = [1, 1]} : vector<2x96xf32> to vector<2x32xf32>
    %449 = arith.mulf %448, %445 : vector<2x32xf32>
    %450 = arith.addf %447, %449 : vector<2x32xf32>
    %451 = vector.extract_strided_slice %443 {offsets = [0, 64], sizes = [2, 32], strides = [1, 1]} : vector<2x96xf32> to vector<2x32xf32>
    %452 = math.tanh %450 : vector<2x32xf32>
    %453 = arith.mulf %451, %452 : vector<2x32xf32>
    %454 = vector.shape_cast %437 : vector<2x1xi1> to vector<2x1xi1>
    %455 = vector.broadcast %454 : vector<2x1xi1> to vector<2x32xi1>
    %456 = arith.select %455, %450, %385 : vector<2x32xi1>, vector<2x32xf32>
    %457 = vector.shape_cast %437 : vector<2x1xi1> to vector<2x1xi1>
    %458 = vector.broadcast %457 : vector<2x1xi1> to vector<2x32xi1>
    %459 = arith.select %458, %453, %388 : vector<2x32xi1>, vector<2x32xf32>
    %cst_55 = arith.constant 0.000000e+00 : f32
    %460 = vector.shape_cast %437 : vector<2x1xi1> to vector<2x1xi1>
    %461 = vector.broadcast %460 : vector<2x1xi1> to vector<2x32xi1>
    %462 = vector.broadcast %cst_55 : f32 to vector<2x32xf32>
    %463 = arith.select %461, %453, %462 : vector<2x32xi1>, vector<2x32xf32>
    %464 = vector.extract_strided_slice %111 {offsets = [5, 0], sizes = [1, 256], strides = [1, 1]} : vector<16x256xf32> to vector<1x256xf32>
    %465 = vector.extract_strided_slice %111 {offsets = [13, 0], sizes = [1, 256], strides = [1, 1]} : vector<16x256xf32> to vector<1x256xf32>
    %466 = tpu.concatenate %464, %465 in 0 : vector<1x256xf32>, vector<1x256xf32> -> vector<2x256xf32>
    %467 = vector.extract_strided_slice %466 {offsets = [0, 0], sizes = [2, 128], strides = [1, 1]} : vector<2x256xf32> to vector<2x128xf32>
    %468 = vector.extract_strided_slice %111 {offsets = [2, 0], sizes = [1, 256], strides = [1, 1]} : vector<16x256xf32> to vector<1x256xf32>
    %469 = vector.extract_strided_slice %111 {offsets = [10, 0], sizes = [1, 256], strides = [1, 1]} : vector<16x256xf32> to vector<1x256xf32>
    %470 = tpu.concatenate %468, %469 in 0 : vector<1x256xf32>, vector<1x256xf32> -> vector<2x256xf32>
    %471 = vector.extract_strided_slice %470 {offsets = [0, 128], sizes = [2, 128], strides = [1, 1]} : vector<2x256xf32> to vector<2x128xf32>
    %472 = tpu.concatenate %431, %459 in 1 : vector<2x32xf32>, vector<2x32xf32> -> vector<2x64xf32>
    %473 = arith.truncf %472 : vector<2x64xf32> to vector<2x64xbf16>
    %cst_56 = arith.constant dense<0.000000e+00> : vector<2x256xf32>
    %474 = tpu.matmul %473, %107, %cst_56 {dimension_numbers = #tpu.dot_dimension_numbers<[1], [0], [0], [1], [0, 0, 1, 1], [], []>} : vector<2x64xbf16>, vector<64x256xbf16>, vector<2x256xf32> -> vector<2x256xf32>
    %475 = vector.extract_strided_slice %474 {offsets = [0, 0], sizes = [2, 128], strides = [1, 1]} : vector<2x256xf32> to vector<2x128xf32>
    %476 = arith.addf %467, %475 : vector<2x128xf32>
    %477 = vector.extract_strided_slice %474 {offsets = [0, 128], sizes = [2, 128], strides = [1, 1]} : vector<2x256xf32> to vector<2x128xf32>
    %478 = arith.addf %471, %477 : vector<2x128xf32>
    %c5_i32_57 = arith.constant 5 : i32
    %479 = vector.broadcast %c5_i32_57 : i32 to vector<2x1xi32>
    %480 = arith.cmpi sgt, %2, %479 : vector<2x1xi32>
    %481 = vector.extract_strided_slice %476 {offsets = [0, 0], sizes = [2, 96], strides = [1, 1]} : vector<2x128xf32> to vector<2x96xf32>
    %482 = arith.negf %481 : vector<2x96xf32>
    %483 = math.exp %482 : vector<2x96xf32>
    %cst_58 = arith.constant 1.000000e+00 : f32
    %484 = vector.broadcast %cst_58 : f32 to vector<2x96xf32>
    %485 = arith.addf %484, %483 : vector<2x96xf32>
    %486 = arith.divf %484, %485 : vector<2x96xf32>
    %487 = vector.extract_strided_slice %476 {offsets = [0, 96], sizes = [2, 32], strides = [1, 1]} : vector<2x128xf32> to vector<2x32xf32>
    %488 = math.tanh %487 : vector<2x32xf32>
    %489 = vector.extract_strided_slice %486 {offsets = [0, 32], sizes = [2, 32], strides = [1, 1]} : vector<2x96xf32> to vector<2x32xf32>
    %490 = arith.mulf %489, %428 : vector<2x32xf32>
    %491 = vector.extract_strided_slice %486 {offsets = [0, 0], sizes = [2, 32], strides = [1, 1]} : vector<2x96xf32> to vector<2x32xf32>
    %492 = arith.mulf %491, %488 : vector<2x32xf32>
    %493 = arith.addf %490, %492 : vector<2x32xf32>
    %494 = vector.extract_strided_slice %486 {offsets = [0, 64], sizes = [2, 32], strides = [1, 1]} : vector<2x96xf32> to vector<2x32xf32>
    %495 = math.tanh %493 : vector<2x32xf32>
    %496 = arith.mulf %494, %495 : vector<2x32xf32>
    %497 = vector.shape_cast %480 : vector<2x1xi1> to vector<2x1xi1>
    %498 = vector.broadcast %497 : vector<2x1xi1> to vector<2x32xi1>
    %499 = arith.select %498, %493, %428 : vector<2x32xi1>, vector<2x32xf32>
    %500 = vector.shape_cast %480 : vector<2x1xi1> to vector<2x1xi1>
    %501 = vector.broadcast %500 : vector<2x1xi1> to vector<2x32xi1>
    %502 = arith.select %501, %496, %431 : vector<2x32xi1>, vector<2x32xf32>
    %cst_59 = arith.constant 0.000000e+00 : f32
    %503 = vector.shape_cast %480 : vector<2x1xi1> to vector<2x1xi1>
    %504 = vector.broadcast %503 : vector<2x1xi1> to vector<2x32xi1>
    %505 = vector.broadcast %cst_59 : f32 to vector<2x32xf32>
    %506 = arith.select %504, %496, %505 : vector<2x32xi1>, vector<2x32xf32>
    %c2_i32_60 = arith.constant 2 : i32
    %507 = vector.broadcast %c2_i32_60 : i32 to vector<2x1xi32>
    %508 = arith.cmpi sgt, %2, %507 : vector<2x1xi32>
    %509 = vector.extract_strided_slice %478 {offsets = [0, 0], sizes = [2, 96], strides = [1, 1]} : vector<2x128xf32> to vector<2x96xf32>
    %510 = arith.negf %509 : vector<2x96xf32>
    %511 = math.exp %510 : vector<2x96xf32>
    %cst_61 = arith.constant 1.000000e+00 : f32
    %512 = vector.broadcast %cst_61 : f32 to vector<2x96xf32>
    %513 = arith.addf %512, %511 : vector<2x96xf32>
    %514 = arith.divf %512, %513 : vector<2x96xf32>
    %515 = vector.extract_strided_slice %478 {offsets = [0, 96], sizes = [2, 32], strides = [1, 1]} : vector<2x128xf32> to vector<2x32xf32>
    %516 = math.tanh %515 : vector<2x32xf32>
    %517 = vector.extract_strided_slice %514 {offsets = [0, 32], sizes = [2, 32], strides = [1, 1]} : vector<2x96xf32> to vector<2x32xf32>
    %518 = arith.mulf %517, %456 : vector<2x32xf32>
    %519 = vector.extract_strided_slice %514 {offsets = [0, 0], sizes = [2, 32], strides = [1, 1]} : vector<2x96xf32> to vector<2x32xf32>
    %520 = arith.mulf %519, %516 : vector<2x32xf32>
    %521 = arith.addf %518, %520 : vector<2x32xf32>
    %522 = vector.extract_strided_slice %514 {offsets = [0, 64], sizes = [2, 32], strides = [1, 1]} : vector<2x96xf32> to vector<2x32xf32>
    %523 = math.tanh %521 : vector<2x32xf32>
    %524 = arith.mulf %522, %523 : vector<2x32xf32>
    %525 = vector.shape_cast %508 : vector<2x1xi1> to vector<2x1xi1>
    %526 = vector.broadcast %525 : vector<2x1xi1> to vector<2x32xi1>
    %527 = arith.select %526, %521, %456 : vector<2x32xi1>, vector<2x32xf32>
    %528 = vector.shape_cast %508 : vector<2x1xi1> to vector<2x1xi1>
    %529 = vector.broadcast %528 : vector<2x1xi1> to vector<2x32xi1>
    %530 = arith.select %529, %524, %459 : vector<2x32xi1>, vector<2x32xf32>
    %cst_62 = arith.constant 0.000000e+00 : f32
    %531 = vector.shape_cast %508 : vector<2x1xi1> to vector<2x1xi1>
    %532 = vector.broadcast %531 : vector<2x1xi1> to vector<2x32xi1>
    %533 = vector.broadcast %cst_62 : f32 to vector<2x32xf32>
    %534 = arith.select %532, %524, %533 : vector<2x32xi1>, vector<2x32xf32>
    %535 = vector.extract_strided_slice %111 {offsets = [6, 0], sizes = [1, 256], strides = [1, 1]} : vector<16x256xf32> to vector<1x256xf32>
    %536 = vector.extract_strided_slice %111 {offsets = [14, 0], sizes = [1, 256], strides = [1, 1]} : vector<16x256xf32> to vector<1x256xf32>
    %537 = tpu.concatenate %535, %536 in 0 : vector<1x256xf32>, vector<1x256xf32> -> vector<2x256xf32>
    %538 = vector.extract_strided_slice %537 {offsets = [0, 0], sizes = [2, 128], strides = [1, 1]} : vector<2x256xf32> to vector<2x128xf32>
    %539 = vector.extract_strided_slice %111 {offsets = [1, 0], sizes = [1, 256], strides = [1, 1]} : vector<16x256xf32> to vector<1x256xf32>
    %540 = vector.extract_strided_slice %111 {offsets = [9, 0], sizes = [1, 256], strides = [1, 1]} : vector<16x256xf32> to vector<1x256xf32>
    %541 = tpu.concatenate %539, %540 in 0 : vector<1x256xf32>, vector<1x256xf32> -> vector<2x256xf32>
    %542 = vector.extract_strided_slice %541 {offsets = [0, 128], sizes = [2, 128], strides = [1, 1]} : vector<2x256xf32> to vector<2x128xf32>
    %543 = tpu.concatenate %502, %530 in 1 : vector<2x32xf32>, vector<2x32xf32> -> vector<2x64xf32>
    %544 = arith.truncf %543 : vector<2x64xf32> to vector<2x64xbf16>
    %cst_63 = arith.constant dense<0.000000e+00> : vector<2x256xf32>
    %545 = tpu.matmul %544, %107, %cst_63 {dimension_numbers = #tpu.dot_dimension_numbers<[1], [0], [0], [1], [0, 0, 1, 1], [], []>} : vector<2x64xbf16>, vector<64x256xbf16>, vector<2x256xf32> -> vector<2x256xf32>
    %546 = vector.extract_strided_slice %545 {offsets = [0, 0], sizes = [2, 128], strides = [1, 1]} : vector<2x256xf32> to vector<2x128xf32>
    %547 = arith.addf %538, %546 : vector<2x128xf32>
    %548 = vector.extract_strided_slice %545 {offsets = [0, 128], sizes = [2, 128], strides = [1, 1]} : vector<2x256xf32> to vector<2x128xf32>
    %549 = arith.addf %542, %548 : vector<2x128xf32>
    %c6_i32_64 = arith.constant 6 : i32
    %550 = vector.broadcast %c6_i32_64 : i32 to vector<2x1xi32>
    %551 = arith.cmpi sgt, %2, %550 : vector<2x1xi32>
    %552 = vector.extract_strided_slice %547 {offsets = [0, 0], sizes = [2, 96], strides = [1, 1]} : vector<2x128xf32> to vector<2x96xf32>
    %553 = arith.negf %552 : vector<2x96xf32>
    %554 = math.exp %553 : vector<2x96xf32>
    %cst_65 = arith.constant 1.000000e+00 : f32
    %555 = vector.broadcast %cst_65 : f32 to vector<2x96xf32>
    %556 = arith.addf %555, %554 : vector<2x96xf32>
    %557 = arith.divf %555, %556 : vector<2x96xf32>
    %558 = vector.extract_strided_slice %547 {offsets = [0, 96], sizes = [2, 32], strides = [1, 1]} : vector<2x128xf32> to vector<2x32xf32>
    %559 = math.tanh %558 : vector<2x32xf32>
    %560 = vector.extract_strided_slice %557 {offsets = [0, 32], sizes = [2, 32], strides = [1, 1]} : vector<2x96xf32> to vector<2x32xf32>
    %561 = arith.mulf %560, %499 : vector<2x32xf32>
    %562 = vector.extract_strided_slice %557 {offsets = [0, 0], sizes = [2, 32], strides = [1, 1]} : vector<2x96xf32> to vector<2x32xf32>
    %563 = arith.mulf %562, %559 : vector<2x32xf32>
    %564 = arith.addf %561, %563 : vector<2x32xf32>
    %565 = vector.extract_strided_slice %557 {offsets = [0, 64], sizes = [2, 32], strides = [1, 1]} : vector<2x96xf32> to vector<2x32xf32>
    %566 = math.tanh %564 : vector<2x32xf32>
    %567 = arith.mulf %565, %566 : vector<2x32xf32>
    %568 = vector.shape_cast %551 : vector<2x1xi1> to vector<2x1xi1>
    %569 = vector.broadcast %568 : vector<2x1xi1> to vector<2x32xi1>
    %570 = arith.select %569, %564, %499 : vector<2x32xi1>, vector<2x32xf32>
    %571 = vector.shape_cast %551 : vector<2x1xi1> to vector<2x1xi1>
    %572 = vector.broadcast %571 : vector<2x1xi1> to vector<2x32xi1>
    %573 = arith.select %572, %567, %502 : vector<2x32xi1>, vector<2x32xf32>
    %cst_66 = arith.constant 0.000000e+00 : f32
    %574 = vector.shape_cast %551 : vector<2x1xi1> to vector<2x1xi1>
    %575 = vector.broadcast %574 : vector<2x1xi1> to vector<2x32xi1>
    %576 = vector.broadcast %cst_66 : f32 to vector<2x32xf32>
    %577 = arith.select %575, %567, %576 : vector<2x32xi1>, vector<2x32xf32>
    %c1_i32_67 = arith.constant 1 : i32
    %578 = vector.broadcast %c1_i32_67 : i32 to vector<2x1xi32>
    %579 = arith.cmpi sgt, %2, %578 : vector<2x1xi32>
    %580 = vector.extract_strided_slice %549 {offsets = [0, 0], sizes = [2, 96], strides = [1, 1]} : vector<2x128xf32> to vector<2x96xf32>
    %581 = arith.negf %580 : vector<2x96xf32>
    %582 = math.exp %581 : vector<2x96xf32>
    %cst_68 = arith.constant 1.000000e+00 : f32
    %583 = vector.broadcast %cst_68 : f32 to vector<2x96xf32>
    %584 = arith.addf %583, %582 : vector<2x96xf32>
    %585 = arith.divf %583, %584 : vector<2x96xf32>
    %586 = vector.extract_strided_slice %549 {offsets = [0, 96], sizes = [2, 32], strides = [1, 1]} : vector<2x128xf32> to vector<2x32xf32>
    %587 = math.tanh %586 : vector<2x32xf32>
    %588 = vector.extract_strided_slice %585 {offsets = [0, 32], sizes = [2, 32], strides = [1, 1]} : vector<2x96xf32> to vector<2x32xf32>
    %589 = arith.mulf %588, %527 : vector<2x32xf32>
    %590 = vector.extract_strided_slice %585 {offsets = [0, 0], sizes = [2, 32], strides = [1, 1]} : vector<2x96xf32> to vector<2x32xf32>
    %591 = arith.mulf %590, %587 : vector<2x32xf32>
    %592 = arith.addf %589, %591 : vector<2x32xf32>
    %593 = vector.extract_strided_slice %585 {offsets = [0, 64], sizes = [2, 32], strides = [1, 1]} : vector<2x96xf32> to vector<2x32xf32>
    %594 = math.tanh %592 : vector<2x32xf32>
    %595 = arith.mulf %593, %594 : vector<2x32xf32>
    %596 = vector.shape_cast %579 : vector<2x1xi1> to vector<2x1xi1>
    %597 = vector.broadcast %596 : vector<2x1xi1> to vector<2x32xi1>
    %598 = arith.select %597, %592, %527 : vector<2x32xi1>, vector<2x32xf32>
    %599 = vector.shape_cast %579 : vector<2x1xi1> to vector<2x1xi1>
    %600 = vector.broadcast %599 : vector<2x1xi1> to vector<2x32xi1>
    %601 = arith.select %600, %595, %530 : vector<2x32xi1>, vector<2x32xf32>
    %cst_69 = arith.constant 0.000000e+00 : f32
    %602 = vector.shape_cast %579 : vector<2x1xi1> to vector<2x1xi1>
    %603 = vector.broadcast %602 : vector<2x1xi1> to vector<2x32xi1>
    %604 = vector.broadcast %cst_69 : f32 to vector<2x32xf32>
    %605 = arith.select %603, %595, %604 : vector<2x32xi1>, vector<2x32xf32>
    %606 = vector.extract_strided_slice %111 {offsets = [7, 0], sizes = [1, 256], strides = [1, 1]} : vector<16x256xf32> to vector<1x256xf32>
    %607 = vector.extract_strided_slice %111 {offsets = [15, 0], sizes = [1, 256], strides = [1, 1]} : vector<16x256xf32> to vector<1x256xf32>
    %608 = tpu.concatenate %606, %607 in 0 : vector<1x256xf32>, vector<1x256xf32> -> vector<2x256xf32>
    %609 = vector.extract_strided_slice %608 {offsets = [0, 0], sizes = [2, 128], strides = [1, 1]} : vector<2x256xf32> to vector<2x128xf32>
    %610 = vector.extract_strided_slice %111 {offsets = [0, 0], sizes = [1, 256], strides = [1, 1]} : vector<16x256xf32> to vector<1x256xf32>
    %611 = vector.extract_strided_slice %111 {offsets = [8, 0], sizes = [1, 256], strides = [1, 1]} : vector<16x256xf32> to vector<1x256xf32>
    %612 = tpu.concatenate %610, %611 in 0 : vector<1x256xf32>, vector<1x256xf32> -> vector<2x256xf32>
    %613 = vector.extract_strided_slice %612 {offsets = [0, 128], sizes = [2, 128], strides = [1, 1]} : vector<2x256xf32> to vector<2x128xf32>
    %614 = tpu.concatenate %573, %601 in 1 : vector<2x32xf32>, vector<2x32xf32> -> vector<2x64xf32>
    %615 = arith.truncf %614 : vector<2x64xf32> to vector<2x64xbf16>
    %cst_70 = arith.constant dense<0.000000e+00> : vector<2x256xf32>
    %616 = tpu.matmul %615, %107, %cst_70 {dimension_numbers = #tpu.dot_dimension_numbers<[1], [0], [0], [1], [0, 0, 1, 1], [], []>} : vector<2x64xbf16>, vector<64x256xbf16>, vector<2x256xf32> -> vector<2x256xf32>
    %617 = vector.extract_strided_slice %616 {offsets = [0, 0], sizes = [2, 128], strides = [1, 1]} : vector<2x256xf32> to vector<2x128xf32>
    %618 = arith.addf %609, %617 : vector<2x128xf32>
    %619 = vector.extract_strided_slice %616 {offsets = [0, 128], sizes = [2, 128], strides = [1, 1]} : vector<2x256xf32> to vector<2x128xf32>
    %620 = arith.addf %613, %619 : vector<2x128xf32>
    %c7_i32_71 = arith.constant 7 : i32
    %621 = vector.broadcast %c7_i32_71 : i32 to vector<2x1xi32>
    %622 = arith.cmpi sgt, %2, %621 : vector<2x1xi32>
    %623 = vector.extract_strided_slice %618 {offsets = [0, 0], sizes = [2, 96], strides = [1, 1]} : vector<2x128xf32> to vector<2x96xf32>
    %624 = arith.negf %623 : vector<2x96xf32>
    %625 = math.exp %624 : vector<2x96xf32>
    %cst_72 = arith.constant 1.000000e+00 : f32
    %626 = vector.broadcast %cst_72 : f32 to vector<2x96xf32>
    %627 = arith.addf %626, %625 : vector<2x96xf32>
    %628 = arith.divf %626, %627 : vector<2x96xf32>
    %629 = vector.extract_strided_slice %618 {offsets = [0, 96], sizes = [2, 32], strides = [1, 1]} : vector<2x128xf32> to vector<2x32xf32>
    %630 = math.tanh %629 : vector<2x32xf32>
    %631 = vector.extract_strided_slice %628 {offsets = [0, 32], sizes = [2, 32], strides = [1, 1]} : vector<2x96xf32> to vector<2x32xf32>
    %632 = arith.mulf %631, %570 : vector<2x32xf32>
    %633 = vector.extract_strided_slice %628 {offsets = [0, 0], sizes = [2, 32], strides = [1, 1]} : vector<2x96xf32> to vector<2x32xf32>
    %634 = arith.mulf %633, %630 : vector<2x32xf32>
    %635 = arith.addf %632, %634 : vector<2x32xf32>
    %636 = vector.extract_strided_slice %628 {offsets = [0, 64], sizes = [2, 32], strides = [1, 1]} : vector<2x96xf32> to vector<2x32xf32>
    %637 = math.tanh %635 : vector<2x32xf32>
    %638 = arith.mulf %636, %637 : vector<2x32xf32>
    %cst_73 = arith.constant 0.000000e+00 : f32
    %639 = vector.shape_cast %622 : vector<2x1xi1> to vector<2x1xi1>
    %640 = vector.broadcast %639 : vector<2x1xi1> to vector<2x32xi1>
    %641 = vector.broadcast %cst_73 : f32 to vector<2x32xf32>
    %642 = arith.select %640, %638, %641 : vector<2x32xi1>, vector<2x32xf32>
    %c0_i32_74 = arith.constant 0 : i32
    %643 = vector.broadcast %c0_i32_74 : i32 to vector<2x1xi32>
    %644 = arith.cmpi sgt, %2, %643 : vector<2x1xi32>
    %645 = vector.extract_strided_slice %620 {offsets = [0, 0], sizes = [2, 96], strides = [1, 1]} : vector<2x128xf32> to vector<2x96xf32>
    %646 = arith.negf %645 : vector<2x96xf32>
    %647 = math.exp %646 : vector<2x96xf32>
    %cst_75 = arith.constant 1.000000e+00 : f32
    %648 = vector.broadcast %cst_75 : f32 to vector<2x96xf32>
    %649 = arith.addf %648, %647 : vector<2x96xf32>
    %650 = arith.divf %648, %649 : vector<2x96xf32>
    %651 = vector.extract_strided_slice %620 {offsets = [0, 96], sizes = [2, 32], strides = [1, 1]} : vector<2x128xf32> to vector<2x32xf32>
    %652 = math.tanh %651 : vector<2x32xf32>
    %653 = vector.extract_strided_slice %650 {offsets = [0, 32], sizes = [2, 32], strides = [1, 1]} : vector<2x96xf32> to vector<2x32xf32>
    %654 = arith.mulf %653, %598 : vector<2x32xf32>
    %655 = vector.extract_strided_slice %650 {offsets = [0, 0], sizes = [2, 32], strides = [1, 1]} : vector<2x96xf32> to vector<2x32xf32>
    %656 = arith.mulf %655, %652 : vector<2x32xf32>
    %657 = arith.addf %654, %656 : vector<2x32xf32>
    %658 = vector.extract_strided_slice %650 {offsets = [0, 64], sizes = [2, 32], strides = [1, 1]} : vector<2x96xf32> to vector<2x32xf32>
    %659 = math.tanh %657 : vector<2x32xf32>
    %660 = arith.mulf %658, %659 : vector<2x32xf32>
    %cst_76 = arith.constant 0.000000e+00 : f32
    %661 = vector.shape_cast %644 : vector<2x1xi1> to vector<2x1xi1>
    %662 = vector.broadcast %661 : vector<2x1xi1> to vector<2x32xi1>
    %663 = vector.broadcast %cst_76 : f32 to vector<2x32xf32>
    %664 = arith.select %662, %660, %663 : vector<2x32xi1>, vector<2x32xf32>
    %665 = tpu.concatenate %151, %664 in 1 : vector<2x32xf32>, vector<2x32xf32> -> vector<2x64xf32>
    %666 = tpu.concatenate %222, %605 in 1 : vector<2x32xf32>, vector<2x32xf32> -> vector<2x64xf32>
    %667 = tpu.concatenate %293, %534 in 1 : vector<2x32xf32>, vector<2x32xf32> -> vector<2x64xf32>
    %668 = tpu.concatenate %364, %463 in 1 : vector<2x32xf32>, vector<2x32xf32> -> vector<2x64xf32>
    %669 = tpu.concatenate %435, %392 in 1 : vector<2x32xf32>, vector<2x32xf32> -> vector<2x64xf32>
    %670 = tpu.concatenate %506, %321 in 1 : vector<2x32xf32>, vector<2x32xf32> -> vector<2x64xf32>
    %671 = tpu.concatenate %577, %250 in 1 : vector<2x32xf32>, vector<2x32xf32> -> vector<2x64xf32>
    %672 = tpu.concatenate %642, %179 in 1 : vector<2x32xf32>, vector<2x32xf32> -> vector<2x64xf32>
    %673 = tpu.concatenate %665, %666, %667, %668, %669, %670, %671, %672 in 0 : vector<2x64xf32>, vector<2x64xf32>, vector<2x64xf32>, vector<2x64xf32>, vector<2x64xf32>, vector<2x64xf32>, vector<2x64xf32>, vector<2x64xf32> -> vector<16x64xf32>
    %c96_77 = arith.constant 96 : index
    %c0_78 = arith.constant 0 : index
    %674 = vector.load %arg1[%c96_77, %c0_78] : memref<224x256xbf16, #tpu.memory_space<vmem>>, vector<64x256xbf16>
    %c160 = arith.constant 160 : index
    %c0_79 = arith.constant 0 : index
    %675 = vector.load %arg1[%c160, %c0_79] : memref<224x256xbf16, #tpu.memory_space<vmem>>, vector<64x256xbf16>
    %676 = arith.truncf %673 : vector<16x64xf32> to vector<16x64xbf16>
    %cst_80 = arith.constant dense<0.000000e+00> : vector<16x256xf32>
    %677 = tpu.matmul %676, %674, %cst_80 {dimension_numbers = #tpu.dot_dimension_numbers<[1], [0], [0], [1], [0, 0, 1, 1], [], []>} : vector<16x64xbf16>, vector<64x256xbf16>, vector<16x256xf32> -> vector<16x256xf32>
    %678 = vector.broadcast %5 : vector<1x256xf32> to vector<16x256xf32>
    %679 = arith.addf %677, %678 : vector<16x256xf32>
    %cst_81 = arith.constant 0.000000e+00 : f32
    %680 = vector.broadcast %cst_81 : f32 to vector<2x32xf32>
    %cst_82 = arith.constant 0.000000e+00 : f32
    %681 = vector.broadcast %cst_82 : f32 to vector<2x32xf32>
    %cst_83 = arith.constant 0.000000e+00 : f32
    %682 = vector.broadcast %cst_83 : f32 to vector<2x32xf32>
    %cst_84 = arith.constant 0.000000e+00 : f32
    %683 = vector.broadcast %cst_84 : f32 to vector<2x32xf32>
    %684 = vector.extract_strided_slice %679 {offsets = [0, 0], sizes = [2, 256], strides = [1, 1]} : vector<16x256xf32> to vector<2x256xf32>
    %685 = vector.extract_strided_slice %684 {offsets = [0, 0], sizes = [2, 128], strides = [1, 1]} : vector<2x256xf32> to vector<2x128xf32>
    %686 = vector.extract_strided_slice %679 {offsets = [14, 0], sizes = [2, 256], strides = [1, 1]} : vector<16x256xf32> to vector<2x256xf32>
    %687 = vector.extract_strided_slice %686 {offsets = [0, 128], sizes = [2, 128], strides = [1, 1]} : vector<2x256xf32> to vector<2x128xf32>
    %c0_i32_85 = arith.constant 0 : i32
    %688 = vector.broadcast %c0_i32_85 : i32 to vector<2x1xi32>
    %689 = arith.cmpi sgt, %2, %688 : vector<2x1xi32>
    %690 = vector.extract_strided_slice %685 {offsets = [0, 0], sizes = [2, 96], strides = [1, 1]} : vector<2x128xf32> to vector<2x96xf32>
    %691 = arith.negf %690 : vector<2x96xf32>
    %692 = math.exp %691 : vector<2x96xf32>
    %cst_86 = arith.constant 1.000000e+00 : f32
    %693 = vector.broadcast %cst_86 : f32 to vector<2x96xf32>
    %694 = arith.addf %693, %692 : vector<2x96xf32>
    %695 = arith.divf %693, %694 : vector<2x96xf32>
    %696 = vector.extract_strided_slice %685 {offsets = [0, 96], sizes = [2, 32], strides = [1, 1]} : vector<2x128xf32> to vector<2x32xf32>
    %697 = math.tanh %696 : vector<2x32xf32>
    %698 = vector.extract_strided_slice %695 {offsets = [0, 32], sizes = [2, 32], strides = [1, 1]} : vector<2x96xf32> to vector<2x32xf32>
    %699 = arith.mulf %698, %681 : vector<2x32xf32>
    %700 = vector.extract_strided_slice %695 {offsets = [0, 0], sizes = [2, 32], strides = [1, 1]} : vector<2x96xf32> to vector<2x32xf32>
    %701 = arith.mulf %700, %697 : vector<2x32xf32>
    %702 = arith.addf %699, %701 : vector<2x32xf32>
    %703 = vector.extract_strided_slice %695 {offsets = [0, 64], sizes = [2, 32], strides = [1, 1]} : vector<2x96xf32> to vector<2x32xf32>
    %704 = math.tanh %702 : vector<2x32xf32>
    %705 = arith.mulf %703, %704 : vector<2x32xf32>
    %706 = vector.shape_cast %689 : vector<2x1xi1> to vector<2x1xi1>
    %707 = vector.broadcast %706 : vector<2x1xi1> to vector<2x32xi1>
    %708 = arith.select %707, %702, %681 : vector<2x32xi1>, vector<2x32xf32>
    %709 = vector.shape_cast %689 : vector<2x1xi1> to vector<2x1xi1>
    %710 = vector.broadcast %709 : vector<2x1xi1> to vector<2x32xi1>
    %711 = arith.select %710, %705, %680 : vector<2x32xi1>, vector<2x32xf32>
    %cst_87 = arith.constant 0.000000e+00 : f32
    %712 = vector.shape_cast %689 : vector<2x1xi1> to vector<2x1xi1>
    %713 = vector.broadcast %712 : vector<2x1xi1> to vector<2x32xi1>
    %714 = vector.broadcast %cst_87 : f32 to vector<2x32xf32>
    %715 = arith.select %713, %705, %714 : vector<2x32xi1>, vector<2x32xf32>
    %c7_i32_88 = arith.constant 7 : i32
    %716 = vector.broadcast %c7_i32_88 : i32 to vector<2x1xi32>
    %717 = arith.cmpi sgt, %2, %716 : vector<2x1xi32>
    %718 = vector.extract_strided_slice %687 {offsets = [0, 0], sizes = [2, 96], strides = [1, 1]} : vector<2x128xf32> to vector<2x96xf32>
    %719 = arith.negf %718 : vector<2x96xf32>
    %720 = math.exp %719 : vector<2x96xf32>
    %cst_89 = arith.constant 1.000000e+00 : f32
    %721 = vector.broadcast %cst_89 : f32 to vector<2x96xf32>
    %722 = arith.addf %721, %720 : vector<2x96xf32>
    %723 = arith.divf %721, %722 : vector<2x96xf32>
    %724 = vector.extract_strided_slice %687 {offsets = [0, 96], sizes = [2, 32], strides = [1, 1]} : vector<2x128xf32> to vector<2x32xf32>
    %725 = math.tanh %724 : vector<2x32xf32>
    %726 = vector.extract_strided_slice %723 {offsets = [0, 32], sizes = [2, 32], strides = [1, 1]} : vector<2x96xf32> to vector<2x32xf32>
    %727 = arith.mulf %726, %683 : vector<2x32xf32>
    %728 = vector.extract_strided_slice %723 {offsets = [0, 0], sizes = [2, 32], strides = [1, 1]} : vector<2x96xf32> to vector<2x32xf32>
    %729 = arith.mulf %728, %725 : vector<2x32xf32>
    %730 = arith.addf %727, %729 : vector<2x32xf32>
    %731 = vector.extract_strided_slice %723 {offsets = [0, 64], sizes = [2, 32], strides = [1, 1]} : vector<2x96xf32> to vector<2x32xf32>
    %732 = math.tanh %730 : vector<2x32xf32>
    %733 = arith.mulf %731, %732 : vector<2x32xf32>
    %734 = vector.shape_cast %717 : vector<2x1xi1> to vector<2x1xi1>
    %735 = vector.broadcast %734 : vector<2x1xi1> to vector<2x32xi1>
    %736 = arith.select %735, %730, %683 : vector<2x32xi1>, vector<2x32xf32>
    %737 = vector.shape_cast %717 : vector<2x1xi1> to vector<2x1xi1>
    %738 = vector.broadcast %737 : vector<2x1xi1> to vector<2x32xi1>
    %739 = arith.select %738, %733, %682 : vector<2x32xi1>, vector<2x32xf32>
    %cst_90 = arith.constant 0.000000e+00 : f32
    %740 = vector.shape_cast %717 : vector<2x1xi1> to vector<2x1xi1>
    %741 = vector.broadcast %740 : vector<2x1xi1> to vector<2x32xi1>
    %742 = vector.broadcast %cst_90 : f32 to vector<2x32xf32>
    %743 = arith.select %741, %733, %742 : vector<2x32xi1>, vector<2x32xf32>
    %744 = vector.extract_strided_slice %679 {offsets = [2, 0], sizes = [2, 256], strides = [1, 1]} : vector<16x256xf32> to vector<2x256xf32>
    %745 = vector.extract_strided_slice %744 {offsets = [0, 0], sizes = [2, 128], strides = [1, 1]} : vector<2x256xf32> to vector<2x128xf32>
    %746 = vector.extract_strided_slice %679 {offsets = [12, 0], sizes = [2, 256], strides = [1, 1]} : vector<16x256xf32> to vector<2x256xf32>
    %747 = vector.extract_strided_slice %746 {offsets = [0, 128], sizes = [2, 128], strides = [1, 1]} : vector<2x256xf32> to vector<2x128xf32>
    %748 = tpu.concatenate %711, %739 in 1 : vector<2x32xf32>, vector<2x32xf32> -> vector<2x64xf32>
    %749 = arith.truncf %748 : vector<2x64xf32> to vector<2x64xbf16>
    %cst_91 = arith.constant dense<0.000000e+00> : vector<2x256xf32>
    %750 = tpu.matmul %749, %675, %cst_91 {dimension_numbers = #tpu.dot_dimension_numbers<[1], [0], [0], [1], [0, 0, 1, 1], [], []>} : vector<2x64xbf16>, vector<64x256xbf16>, vector<2x256xf32> -> vector<2x256xf32>
    %751 = vector.extract_strided_slice %750 {offsets = [0, 0], sizes = [2, 128], strides = [1, 1]} : vector<2x256xf32> to vector<2x128xf32>
    %752 = arith.addf %745, %751 : vector<2x128xf32>
    %753 = vector.extract_strided_slice %750 {offsets = [0, 128], sizes = [2, 128], strides = [1, 1]} : vector<2x256xf32> to vector<2x128xf32>
    %754 = arith.addf %747, %753 : vector<2x128xf32>
    %c1_i32_92 = arith.constant 1 : i32
    %755 = vector.broadcast %c1_i32_92 : i32 to vector<2x1xi32>
    %756 = arith.cmpi sgt, %2, %755 : vector<2x1xi32>
    %757 = vector.extract_strided_slice %752 {offsets = [0, 0], sizes = [2, 96], strides = [1, 1]} : vector<2x128xf32> to vector<2x96xf32>
    %758 = arith.negf %757 : vector<2x96xf32>
    %759 = math.exp %758 : vector<2x96xf32>
    %cst_93 = arith.constant 1.000000e+00 : f32
    %760 = vector.broadcast %cst_93 : f32 to vector<2x96xf32>
    %761 = arith.addf %760, %759 : vector<2x96xf32>
    %762 = arith.divf %760, %761 : vector<2x96xf32>
    %763 = vector.extract_strided_slice %752 {offsets = [0, 96], sizes = [2, 32], strides = [1, 1]} : vector<2x128xf32> to vector<2x32xf32>
    %764 = math.tanh %763 : vector<2x32xf32>
    %765 = vector.extract_strided_slice %762 {offsets = [0, 32], sizes = [2, 32], strides = [1, 1]} : vector<2x96xf32> to vector<2x32xf32>
    %766 = arith.mulf %765, %708 : vector<2x32xf32>
    %767 = vector.extract_strided_slice %762 {offsets = [0, 0], sizes = [2, 32], strides = [1, 1]} : vector<2x96xf32> to vector<2x32xf32>
    %768 = arith.mulf %767, %764 : vector<2x32xf32>
    %769 = arith.addf %766, %768 : vector<2x32xf32>
    %770 = vector.extract_strided_slice %762 {offsets = [0, 64], sizes = [2, 32], strides = [1, 1]} : vector<2x96xf32> to vector<2x32xf32>
    %771 = math.tanh %769 : vector<2x32xf32>
    %772 = arith.mulf %770, %771 : vector<2x32xf32>
    %773 = vector.shape_cast %756 : vector<2x1xi1> to vector<2x1xi1>
    %774 = vector.broadcast %773 : vector<2x1xi1> to vector<2x32xi1>
    %775 = arith.select %774, %769, %708 : vector<2x32xi1>, vector<2x32xf32>
    %776 = vector.shape_cast %756 : vector<2x1xi1> to vector<2x1xi1>
    %777 = vector.broadcast %776 : vector<2x1xi1> to vector<2x32xi1>
    %778 = arith.select %777, %772, %711 : vector<2x32xi1>, vector<2x32xf32>
    %cst_94 = arith.constant 0.000000e+00 : f32
    %779 = vector.shape_cast %756 : vector<2x1xi1> to vector<2x1xi1>
    %780 = vector.broadcast %779 : vector<2x1xi1> to vector<2x32xi1>
    %781 = vector.broadcast %cst_94 : f32 to vector<2x32xf32>
    %782 = arith.select %780, %772, %781 : vector<2x32xi1>, vector<2x32xf32>
    %c6_i32_95 = arith.constant 6 : i32
    %783 = vector.broadcast %c6_i32_95 : i32 to vector<2x1xi32>
    %784 = arith.cmpi sgt, %2, %783 : vector<2x1xi32>
    %785 = vector.extract_strided_slice %754 {offsets = [0, 0], sizes = [2, 96], strides = [1, 1]} : vector<2x128xf32> to vector<2x96xf32>
    %786 = arith.negf %785 : vector<2x96xf32>
    %787 = math.exp %786 : vector<2x96xf32>
    %cst_96 = arith.constant 1.000000e+00 : f32
    %788 = vector.broadcast %cst_96 : f32 to vector<2x96xf32>
    %789 = arith.addf %788, %787 : vector<2x96xf32>
    %790 = arith.divf %788, %789 : vector<2x96xf32>
    %791 = vector.extract_strided_slice %754 {offsets = [0, 96], sizes = [2, 32], strides = [1, 1]} : vector<2x128xf32> to vector<2x32xf32>
    %792 = math.tanh %791 : vector<2x32xf32>
    %793 = vector.extract_strided_slice %790 {offsets = [0, 32], sizes = [2, 32], strides = [1, 1]} : vector<2x96xf32> to vector<2x32xf32>
    %794 = arith.mulf %793, %736 : vector<2x32xf32>
    %795 = vector.extract_strided_slice %790 {offsets = [0, 0], sizes = [2, 32], strides = [1, 1]} : vector<2x96xf32> to vector<2x32xf32>
    %796 = arith.mulf %795, %792 : vector<2x32xf32>
    %797 = arith.addf %794, %796 : vector<2x32xf32>
    %798 = vector.extract_strided_slice %790 {offsets = [0, 64], sizes = [2, 32], strides = [1, 1]} : vector<2x96xf32> to vector<2x32xf32>
    %799 = math.tanh %797 : vector<2x32xf32>
    %800 = arith.mulf %798, %799 : vector<2x32xf32>
    %801 = vector.shape_cast %784 : vector<2x1xi1> to vector<2x1xi1>
    %802 = vector.broadcast %801 : vector<2x1xi1> to vector<2x32xi1>
    %803 = arith.select %802, %797, %736 : vector<2x32xi1>, vector<2x32xf32>
    %804 = vector.shape_cast %784 : vector<2x1xi1> to vector<2x1xi1>
    %805 = vector.broadcast %804 : vector<2x1xi1> to vector<2x32xi1>
    %806 = arith.select %805, %800, %739 : vector<2x32xi1>, vector<2x32xf32>
    %cst_97 = arith.constant 0.000000e+00 : f32
    %807 = vector.shape_cast %784 : vector<2x1xi1> to vector<2x1xi1>
    %808 = vector.broadcast %807 : vector<2x1xi1> to vector<2x32xi1>
    %809 = vector.broadcast %cst_97 : f32 to vector<2x32xf32>
    %810 = arith.select %808, %800, %809 : vector<2x32xi1>, vector<2x32xf32>
    %811 = vector.extract_strided_slice %679 {offsets = [4, 0], sizes = [2, 256], strides = [1, 1]} : vector<16x256xf32> to vector<2x256xf32>
    %812 = vector.extract_strided_slice %811 {offsets = [0, 0], sizes = [2, 128], strides = [1, 1]} : vector<2x256xf32> to vector<2x128xf32>
    %813 = vector.extract_strided_slice %679 {offsets = [10, 0], sizes = [2, 256], strides = [1, 1]} : vector<16x256xf32> to vector<2x256xf32>
    %814 = vector.extract_strided_slice %813 {offsets = [0, 128], sizes = [2, 128], strides = [1, 1]} : vector<2x256xf32> to vector<2x128xf32>
    %815 = tpu.concatenate %778, %806 in 1 : vector<2x32xf32>, vector<2x32xf32> -> vector<2x64xf32>
    %816 = arith.truncf %815 : vector<2x64xf32> to vector<2x64xbf16>
    %cst_98 = arith.constant dense<0.000000e+00> : vector<2x256xf32>
    %817 = tpu.matmul %816, %675, %cst_98 {dimension_numbers = #tpu.dot_dimension_numbers<[1], [0], [0], [1], [0, 0, 1, 1], [], []>} : vector<2x64xbf16>, vector<64x256xbf16>, vector<2x256xf32> -> vector<2x256xf32>
    %818 = vector.extract_strided_slice %817 {offsets = [0, 0], sizes = [2, 128], strides = [1, 1]} : vector<2x256xf32> to vector<2x128xf32>
    %819 = arith.addf %812, %818 : vector<2x128xf32>
    %820 = vector.extract_strided_slice %817 {offsets = [0, 128], sizes = [2, 128], strides = [1, 1]} : vector<2x256xf32> to vector<2x128xf32>
    %821 = arith.addf %814, %820 : vector<2x128xf32>
    %c2_i32_99 = arith.constant 2 : i32
    %822 = vector.broadcast %c2_i32_99 : i32 to vector<2x1xi32>
    %823 = arith.cmpi sgt, %2, %822 : vector<2x1xi32>
    %824 = vector.extract_strided_slice %819 {offsets = [0, 0], sizes = [2, 96], strides = [1, 1]} : vector<2x128xf32> to vector<2x96xf32>
    %825 = arith.negf %824 : vector<2x96xf32>
    %826 = math.exp %825 : vector<2x96xf32>
    %cst_100 = arith.constant 1.000000e+00 : f32
    %827 = vector.broadcast %cst_100 : f32 to vector<2x96xf32>
    %828 = arith.addf %827, %826 : vector<2x96xf32>
    %829 = arith.divf %827, %828 : vector<2x96xf32>
    %830 = vector.extract_strided_slice %819 {offsets = [0, 96], sizes = [2, 32], strides = [1, 1]} : vector<2x128xf32> to vector<2x32xf32>
    %831 = math.tanh %830 : vector<2x32xf32>
    %832 = vector.extract_strided_slice %829 {offsets = [0, 32], sizes = [2, 32], strides = [1, 1]} : vector<2x96xf32> to vector<2x32xf32>
    %833 = arith.mulf %832, %775 : vector<2x32xf32>
    %834 = vector.extract_strided_slice %829 {offsets = [0, 0], sizes = [2, 32], strides = [1, 1]} : vector<2x96xf32> to vector<2x32xf32>
    %835 = arith.mulf %834, %831 : vector<2x32xf32>
    %836 = arith.addf %833, %835 : vector<2x32xf32>
    %837 = vector.extract_strided_slice %829 {offsets = [0, 64], sizes = [2, 32], strides = [1, 1]} : vector<2x96xf32> to vector<2x32xf32>
    %838 = math.tanh %836 : vector<2x32xf32>
    %839 = arith.mulf %837, %838 : vector<2x32xf32>
    %840 = vector.shape_cast %823 : vector<2x1xi1> to vector<2x1xi1>
    %841 = vector.broadcast %840 : vector<2x1xi1> to vector<2x32xi1>
    %842 = arith.select %841, %836, %775 : vector<2x32xi1>, vector<2x32xf32>
    %843 = vector.shape_cast %823 : vector<2x1xi1> to vector<2x1xi1>
    %844 = vector.broadcast %843 : vector<2x1xi1> to vector<2x32xi1>
    %845 = arith.select %844, %839, %778 : vector<2x32xi1>, vector<2x32xf32>
    %cst_101 = arith.constant 0.000000e+00 : f32
    %846 = vector.shape_cast %823 : vector<2x1xi1> to vector<2x1xi1>
    %847 = vector.broadcast %846 : vector<2x1xi1> to vector<2x32xi1>
    %848 = vector.broadcast %cst_101 : f32 to vector<2x32xf32>
    %849 = arith.select %847, %839, %848 : vector<2x32xi1>, vector<2x32xf32>
    %c5_i32_102 = arith.constant 5 : i32
    %850 = vector.broadcast %c5_i32_102 : i32 to vector<2x1xi32>
    %851 = arith.cmpi sgt, %2, %850 : vector<2x1xi32>
    %852 = vector.extract_strided_slice %821 {offsets = [0, 0], sizes = [2, 96], strides = [1, 1]} : vector<2x128xf32> to vector<2x96xf32>
    %853 = arith.negf %852 : vector<2x96xf32>
    %854 = math.exp %853 : vector<2x96xf32>
    %cst_103 = arith.constant 1.000000e+00 : f32
    %855 = vector.broadcast %cst_103 : f32 to vector<2x96xf32>
    %856 = arith.addf %855, %854 : vector<2x96xf32>
    %857 = arith.divf %855, %856 : vector<2x96xf32>
    %858 = vector.extract_strided_slice %821 {offsets = [0, 96], sizes = [2, 32], strides = [1, 1]} : vector<2x128xf32> to vector<2x32xf32>
    %859 = math.tanh %858 : vector<2x32xf32>
    %860 = vector.extract_strided_slice %857 {offsets = [0, 32], sizes = [2, 32], strides = [1, 1]} : vector<2x96xf32> to vector<2x32xf32>
    %861 = arith.mulf %860, %803 : vector<2x32xf32>
    %862 = vector.extract_strided_slice %857 {offsets = [0, 0], sizes = [2, 32], strides = [1, 1]} : vector<2x96xf32> to vector<2x32xf32>
    %863 = arith.mulf %862, %859 : vector<2x32xf32>
    %864 = arith.addf %861, %863 : vector<2x32xf32>
    %865 = vector.extract_strided_slice %857 {offsets = [0, 64], sizes = [2, 32], strides = [1, 1]} : vector<2x96xf32> to vector<2x32xf32>
    %866 = math.tanh %864 : vector<2x32xf32>
    %867 = arith.mulf %865, %866 : vector<2x32xf32>
    %868 = vector.shape_cast %851 : vector<2x1xi1> to vector<2x1xi1>
    %869 = vector.broadcast %868 : vector<2x1xi1> to vector<2x32xi1>
    %870 = arith.select %869, %864, %803 : vector<2x32xi1>, vector<2x32xf32>
    %871 = vector.shape_cast %851 : vector<2x1xi1> to vector<2x1xi1>
    %872 = vector.broadcast %871 : vector<2x1xi1> to vector<2x32xi1>
    %873 = arith.select %872, %867, %806 : vector<2x32xi1>, vector<2x32xf32>
    %cst_104 = arith.constant 0.000000e+00 : f32
    %874 = vector.shape_cast %851 : vector<2x1xi1> to vector<2x1xi1>
    %875 = vector.broadcast %874 : vector<2x1xi1> to vector<2x32xi1>
    %876 = vector.broadcast %cst_104 : f32 to vector<2x32xf32>
    %877 = arith.select %875, %867, %876 : vector<2x32xi1>, vector<2x32xf32>
    %878 = vector.extract_strided_slice %679 {offsets = [6, 0], sizes = [2, 256], strides = [1, 1]} : vector<16x256xf32> to vector<2x256xf32>
    %879 = vector.extract_strided_slice %878 {offsets = [0, 0], sizes = [2, 128], strides = [1, 1]} : vector<2x256xf32> to vector<2x128xf32>
    %880 = vector.extract_strided_slice %679 {offsets = [8, 0], sizes = [2, 256], strides = [1, 1]} : vector<16x256xf32> to vector<2x256xf32>
    %881 = vector.extract_strided_slice %880 {offsets = [0, 128], sizes = [2, 128], strides = [1, 1]} : vector<2x256xf32> to vector<2x128xf32>
    %882 = tpu.concatenate %845, %873 in 1 : vector<2x32xf32>, vector<2x32xf32> -> vector<2x64xf32>
    %883 = arith.truncf %882 : vector<2x64xf32> to vector<2x64xbf16>
    %cst_105 = arith.constant dense<0.000000e+00> : vector<2x256xf32>
    %884 = tpu.matmul %883, %675, %cst_105 {dimension_numbers = #tpu.dot_dimension_numbers<[1], [0], [0], [1], [0, 0, 1, 1], [], []>} : vector<2x64xbf16>, vector<64x256xbf16>, vector<2x256xf32> -> vector<2x256xf32>
    %885 = vector.extract_strided_slice %884 {offsets = [0, 0], sizes = [2, 128], strides = [1, 1]} : vector<2x256xf32> to vector<2x128xf32>
    %886 = arith.addf %879, %885 : vector<2x128xf32>
    %887 = vector.extract_strided_slice %884 {offsets = [0, 128], sizes = [2, 128], strides = [1, 1]} : vector<2x256xf32> to vector<2x128xf32>
    %888 = arith.addf %881, %887 : vector<2x128xf32>
    %c3_i32_106 = arith.constant 3 : i32
    %889 = vector.broadcast %c3_i32_106 : i32 to vector<2x1xi32>
    %890 = arith.cmpi sgt, %2, %889 : vector<2x1xi32>
    %891 = vector.extract_strided_slice %886 {offsets = [0, 0], sizes = [2, 96], strides = [1, 1]} : vector<2x128xf32> to vector<2x96xf32>
    %892 = arith.negf %891 : vector<2x96xf32>
    %893 = math.exp %892 : vector<2x96xf32>
    %cst_107 = arith.constant 1.000000e+00 : f32
    %894 = vector.broadcast %cst_107 : f32 to vector<2x96xf32>
    %895 = arith.addf %894, %893 : vector<2x96xf32>
    %896 = arith.divf %894, %895 : vector<2x96xf32>
    %897 = vector.extract_strided_slice %886 {offsets = [0, 96], sizes = [2, 32], strides = [1, 1]} : vector<2x128xf32> to vector<2x32xf32>
    %898 = math.tanh %897 : vector<2x32xf32>
    %899 = vector.extract_strided_slice %896 {offsets = [0, 32], sizes = [2, 32], strides = [1, 1]} : vector<2x96xf32> to vector<2x32xf32>
    %900 = arith.mulf %899, %842 : vector<2x32xf32>
    %901 = vector.extract_strided_slice %896 {offsets = [0, 0], sizes = [2, 32], strides = [1, 1]} : vector<2x96xf32> to vector<2x32xf32>
    %902 = arith.mulf %901, %898 : vector<2x32xf32>
    %903 = arith.addf %900, %902 : vector<2x32xf32>
    %904 = vector.extract_strided_slice %896 {offsets = [0, 64], sizes = [2, 32], strides = [1, 1]} : vector<2x96xf32> to vector<2x32xf32>
    %905 = math.tanh %903 : vector<2x32xf32>
    %906 = arith.mulf %904, %905 : vector<2x32xf32>
    %907 = vector.shape_cast %890 : vector<2x1xi1> to vector<2x1xi1>
    %908 = vector.broadcast %907 : vector<2x1xi1> to vector<2x32xi1>
    %909 = arith.select %908, %903, %842 : vector<2x32xi1>, vector<2x32xf32>
    %910 = vector.shape_cast %890 : vector<2x1xi1> to vector<2x1xi1>
    %911 = vector.broadcast %910 : vector<2x1xi1> to vector<2x32xi1>
    %912 = arith.select %911, %906, %845 : vector<2x32xi1>, vector<2x32xf32>
    %cst_108 = arith.constant 0.000000e+00 : f32
    %913 = vector.shape_cast %890 : vector<2x1xi1> to vector<2x1xi1>
    %914 = vector.broadcast %913 : vector<2x1xi1> to vector<2x32xi1>
    %915 = vector.broadcast %cst_108 : f32 to vector<2x32xf32>
    %916 = arith.select %914, %906, %915 : vector<2x32xi1>, vector<2x32xf32>
    %c4_i32_109 = arith.constant 4 : i32
    %917 = vector.broadcast %c4_i32_109 : i32 to vector<2x1xi32>
    %918 = arith.cmpi sgt, %2, %917 : vector<2x1xi32>
    %919 = vector.extract_strided_slice %888 {offsets = [0, 0], sizes = [2, 96], strides = [1, 1]} : vector<2x128xf32> to vector<2x96xf32>
    %920 = arith.negf %919 : vector<2x96xf32>
    %921 = math.exp %920 : vector<2x96xf32>
    %cst_110 = arith.constant 1.000000e+00 : f32
    %922 = vector.broadcast %cst_110 : f32 to vector<2x96xf32>
    %923 = arith.addf %922, %921 : vector<2x96xf32>
    %924 = arith.divf %922, %923 : vector<2x96xf32>
    %925 = vector.extract_strided_slice %888 {offsets = [0, 96], sizes = [2, 32], strides = [1, 1]} : vector<2x128xf32> to vector<2x32xf32>
    %926 = math.tanh %925 : vector<2x32xf32>
    %927 = vector.extract_strided_slice %924 {offsets = [0, 32], sizes = [2, 32], strides = [1, 1]} : vector<2x96xf32> to vector<2x32xf32>
    %928 = arith.mulf %927, %870 : vector<2x32xf32>
    %929 = vector.extract_strided_slice %924 {offsets = [0, 0], sizes = [2, 32], strides = [1, 1]} : vector<2x96xf32> to vector<2x32xf32>
    %930 = arith.mulf %929, %926 : vector<2x32xf32>
    %931 = arith.addf %928, %930 : vector<2x32xf32>
    %932 = vector.extract_strided_slice %924 {offsets = [0, 64], sizes = [2, 32], strides = [1, 1]} : vector<2x96xf32> to vector<2x32xf32>
    %933 = math.tanh %931 : vector<2x32xf32>
    %934 = arith.mulf %932, %933 : vector<2x32xf32>
    %935 = vector.shape_cast %918 : vector<2x1xi1> to vector<2x1xi1>
    %936 = vector.broadcast %935 : vector<2x1xi1> to vector<2x32xi1>
    %937 = arith.select %936, %931, %870 : vector<2x32xi1>, vector<2x32xf32>
    %938 = vector.shape_cast %918 : vector<2x1xi1> to vector<2x1xi1>
    %939 = vector.broadcast %938 : vector<2x1xi1> to vector<2x32xi1>
    %940 = arith.select %939, %934, %873 : vector<2x32xi1>, vector<2x32xf32>
    %cst_111 = arith.constant 0.000000e+00 : f32
    %941 = vector.shape_cast %918 : vector<2x1xi1> to vector<2x1xi1>
    %942 = vector.broadcast %941 : vector<2x1xi1> to vector<2x32xi1>
    %943 = vector.broadcast %cst_111 : f32 to vector<2x32xf32>
    %944 = arith.select %942, %934, %943 : vector<2x32xi1>, vector<2x32xf32>
    %945 = vector.extract_strided_slice %679 {offsets = [8, 0], sizes = [2, 256], strides = [1, 1]} : vector<16x256xf32> to vector<2x256xf32>
    %946 = vector.extract_strided_slice %945 {offsets = [0, 0], sizes = [2, 128], strides = [1, 1]} : vector<2x256xf32> to vector<2x128xf32>
    %947 = vector.extract_strided_slice %679 {offsets = [6, 0], sizes = [2, 256], strides = [1, 1]} : vector<16x256xf32> to vector<2x256xf32>
    %948 = vector.extract_strided_slice %947 {offsets = [0, 128], sizes = [2, 128], strides = [1, 1]} : vector<2x256xf32> to vector<2x128xf32>
    %949 = tpu.concatenate %912, %940 in 1 : vector<2x32xf32>, vector<2x32xf32> -> vector<2x64xf32>
    %950 = arith.truncf %949 : vector<2x64xf32> to vector<2x64xbf16>
    %cst_112 = arith.constant dense<0.000000e+00> : vector<2x256xf32>
    %951 = tpu.matmul %950, %675, %cst_112 {dimension_numbers = #tpu.dot_dimension_numbers<[1], [0], [0], [1], [0, 0, 1, 1], [], []>} : vector<2x64xbf16>, vector<64x256xbf16>, vector<2x256xf32> -> vector<2x256xf32>
    %952 = vector.extract_strided_slice %951 {offsets = [0, 0], sizes = [2, 128], strides = [1, 1]} : vector<2x256xf32> to vector<2x128xf32>
    %953 = arith.addf %946, %952 : vector<2x128xf32>
    %954 = vector.extract_strided_slice %951 {offsets = [0, 128], sizes = [2, 128], strides = [1, 1]} : vector<2x256xf32> to vector<2x128xf32>
    %955 = arith.addf %948, %954 : vector<2x128xf32>
    %c4_i32_113 = arith.constant 4 : i32
    %956 = vector.broadcast %c4_i32_113 : i32 to vector<2x1xi32>
    %957 = arith.cmpi sgt, %2, %956 : vector<2x1xi32>
    %958 = vector.extract_strided_slice %953 {offsets = [0, 0], sizes = [2, 96], strides = [1, 1]} : vector<2x128xf32> to vector<2x96xf32>
    %959 = arith.negf %958 : vector<2x96xf32>
    %960 = math.exp %959 : vector<2x96xf32>
    %cst_114 = arith.constant 1.000000e+00 : f32
    %961 = vector.broadcast %cst_114 : f32 to vector<2x96xf32>
    %962 = arith.addf %961, %960 : vector<2x96xf32>
    %963 = arith.divf %961, %962 : vector<2x96xf32>
    %964 = vector.extract_strided_slice %953 {offsets = [0, 96], sizes = [2, 32], strides = [1, 1]} : vector<2x128xf32> to vector<2x32xf32>
    %965 = math.tanh %964 : vector<2x32xf32>
    %966 = vector.extract_strided_slice %963 {offsets = [0, 32], sizes = [2, 32], strides = [1, 1]} : vector<2x96xf32> to vector<2x32xf32>
    %967 = arith.mulf %966, %909 : vector<2x32xf32>
    %968 = vector.extract_strided_slice %963 {offsets = [0, 0], sizes = [2, 32], strides = [1, 1]} : vector<2x96xf32> to vector<2x32xf32>
    %969 = arith.mulf %968, %965 : vector<2x32xf32>
    %970 = arith.addf %967, %969 : vector<2x32xf32>
    %971 = vector.extract_strided_slice %963 {offsets = [0, 64], sizes = [2, 32], strides = [1, 1]} : vector<2x96xf32> to vector<2x32xf32>
    %972 = math.tanh %970 : vector<2x32xf32>
    %973 = arith.mulf %971, %972 : vector<2x32xf32>
    %974 = vector.shape_cast %957 : vector<2x1xi1> to vector<2x1xi1>
    %975 = vector.broadcast %974 : vector<2x1xi1> to vector<2x32xi1>
    %976 = arith.select %975, %970, %909 : vector<2x32xi1>, vector<2x32xf32>
    %977 = vector.shape_cast %957 : vector<2x1xi1> to vector<2x1xi1>
    %978 = vector.broadcast %977 : vector<2x1xi1> to vector<2x32xi1>
    %979 = arith.select %978, %973, %912 : vector<2x32xi1>, vector<2x32xf32>
    %cst_115 = arith.constant 0.000000e+00 : f32
    %980 = vector.shape_cast %957 : vector<2x1xi1> to vector<2x1xi1>
    %981 = vector.broadcast %980 : vector<2x1xi1> to vector<2x32xi1>
    %982 = vector.broadcast %cst_115 : f32 to vector<2x32xf32>
    %983 = arith.select %981, %973, %982 : vector<2x32xi1>, vector<2x32xf32>
    %c3_i32_116 = arith.constant 3 : i32
    %984 = vector.broadcast %c3_i32_116 : i32 to vector<2x1xi32>
    %985 = arith.cmpi sgt, %2, %984 : vector<2x1xi32>
    %986 = vector.extract_strided_slice %955 {offsets = [0, 0], sizes = [2, 96], strides = [1, 1]} : vector<2x128xf32> to vector<2x96xf32>
    %987 = arith.negf %986 : vector<2x96xf32>
    %988 = math.exp %987 : vector<2x96xf32>
    %cst_117 = arith.constant 1.000000e+00 : f32
    %989 = vector.broadcast %cst_117 : f32 to vector<2x96xf32>
    %990 = arith.addf %989, %988 : vector<2x96xf32>
    %991 = arith.divf %989, %990 : vector<2x96xf32>
    %992 = vector.extract_strided_slice %955 {offsets = [0, 96], sizes = [2, 32], strides = [1, 1]} : vector<2x128xf32> to vector<2x32xf32>
    %993 = math.tanh %992 : vector<2x32xf32>
    %994 = vector.extract_strided_slice %991 {offsets = [0, 32], sizes = [2, 32], strides = [1, 1]} : vector<2x96xf32> to vector<2x32xf32>
    %995 = arith.mulf %994, %937 : vector<2x32xf32>
    %996 = vector.extract_strided_slice %991 {offsets = [0, 0], sizes = [2, 32], strides = [1, 1]} : vector<2x96xf32> to vector<2x32xf32>
    %997 = arith.mulf %996, %993 : vector<2x32xf32>
    %998 = arith.addf %995, %997 : vector<2x32xf32>
    %999 = vector.extract_strided_slice %991 {offsets = [0, 64], sizes = [2, 32], strides = [1, 1]} : vector<2x96xf32> to vector<2x32xf32>
    %1000 = math.tanh %998 : vector<2x32xf32>
    %1001 = arith.mulf %999, %1000 : vector<2x32xf32>
    %1002 = vector.shape_cast %985 : vector<2x1xi1> to vector<2x1xi1>
    %1003 = vector.broadcast %1002 : vector<2x1xi1> to vector<2x32xi1>
    %1004 = arith.select %1003, %998, %937 : vector<2x32xi1>, vector<2x32xf32>
    %1005 = vector.shape_cast %985 : vector<2x1xi1> to vector<2x1xi1>
    %1006 = vector.broadcast %1005 : vector<2x1xi1> to vector<2x32xi1>
    %1007 = arith.select %1006, %1001, %940 : vector<2x32xi1>, vector<2x32xf32>
    %cst_118 = arith.constant 0.000000e+00 : f32
    %1008 = vector.shape_cast %985 : vector<2x1xi1> to vector<2x1xi1>
    %1009 = vector.broadcast %1008 : vector<2x1xi1> to vector<2x32xi1>
    %1010 = vector.broadcast %cst_118 : f32 to vector<2x32xf32>
    %1011 = arith.select %1009, %1001, %1010 : vector<2x32xi1>, vector<2x32xf32>
    %1012 = vector.extract_strided_slice %679 {offsets = [10, 0], sizes = [2, 256], strides = [1, 1]} : vector<16x256xf32> to vector<2x256xf32>
    %1013 = vector.extract_strided_slice %1012 {offsets = [0, 0], sizes = [2, 128], strides = [1, 1]} : vector<2x256xf32> to vector<2x128xf32>
    %1014 = vector.extract_strided_slice %679 {offsets = [4, 0], sizes = [2, 256], strides = [1, 1]} : vector<16x256xf32> to vector<2x256xf32>
    %1015 = vector.extract_strided_slice %1014 {offsets = [0, 128], sizes = [2, 128], strides = [1, 1]} : vector<2x256xf32> to vector<2x128xf32>
    %1016 = tpu.concatenate %979, %1007 in 1 : vector<2x32xf32>, vector<2x32xf32> -> vector<2x64xf32>
    %1017 = arith.truncf %1016 : vector<2x64xf32> to vector<2x64xbf16>
    %cst_119 = arith.constant dense<0.000000e+00> : vector<2x256xf32>
    %1018 = tpu.matmul %1017, %675, %cst_119 {dimension_numbers = #tpu.dot_dimension_numbers<[1], [0], [0], [1], [0, 0, 1, 1], [], []>} : vector<2x64xbf16>, vector<64x256xbf16>, vector<2x256xf32> -> vector<2x256xf32>
    %1019 = vector.extract_strided_slice %1018 {offsets = [0, 0], sizes = [2, 128], strides = [1, 1]} : vector<2x256xf32> to vector<2x128xf32>
    %1020 = arith.addf %1013, %1019 : vector<2x128xf32>
    %1021 = vector.extract_strided_slice %1018 {offsets = [0, 128], sizes = [2, 128], strides = [1, 1]} : vector<2x256xf32> to vector<2x128xf32>
    %1022 = arith.addf %1015, %1021 : vector<2x128xf32>
    %c5_i32_120 = arith.constant 5 : i32
    %1023 = vector.broadcast %c5_i32_120 : i32 to vector<2x1xi32>
    %1024 = arith.cmpi sgt, %2, %1023 : vector<2x1xi32>
    %1025 = vector.extract_strided_slice %1020 {offsets = [0, 0], sizes = [2, 96], strides = [1, 1]} : vector<2x128xf32> to vector<2x96xf32>
    %1026 = arith.negf %1025 : vector<2x96xf32>
    %1027 = math.exp %1026 : vector<2x96xf32>
    %cst_121 = arith.constant 1.000000e+00 : f32
    %1028 = vector.broadcast %cst_121 : f32 to vector<2x96xf32>
    %1029 = arith.addf %1028, %1027 : vector<2x96xf32>
    %1030 = arith.divf %1028, %1029 : vector<2x96xf32>
    %1031 = vector.extract_strided_slice %1020 {offsets = [0, 96], sizes = [2, 32], strides = [1, 1]} : vector<2x128xf32> to vector<2x32xf32>
    %1032 = math.tanh %1031 : vector<2x32xf32>
    %1033 = vector.extract_strided_slice %1030 {offsets = [0, 32], sizes = [2, 32], strides = [1, 1]} : vector<2x96xf32> to vector<2x32xf32>
    %1034 = arith.mulf %1033, %976 : vector<2x32xf32>
    %1035 = vector.extract_strided_slice %1030 {offsets = [0, 0], sizes = [2, 32], strides = [1, 1]} : vector<2x96xf32> to vector<2x32xf32>
    %1036 = arith.mulf %1035, %1032 : vector<2x32xf32>
    %1037 = arith.addf %1034, %1036 : vector<2x32xf32>
    %1038 = vector.extract_strided_slice %1030 {offsets = [0, 64], sizes = [2, 32], strides = [1, 1]} : vector<2x96xf32> to vector<2x32xf32>
    %1039 = math.tanh %1037 : vector<2x32xf32>
    %1040 = arith.mulf %1038, %1039 : vector<2x32xf32>
    %1041 = vector.shape_cast %1024 : vector<2x1xi1> to vector<2x1xi1>
    %1042 = vector.broadcast %1041 : vector<2x1xi1> to vector<2x32xi1>
    %1043 = arith.select %1042, %1037, %976 : vector<2x32xi1>, vector<2x32xf32>
    %1044 = vector.shape_cast %1024 : vector<2x1xi1> to vector<2x1xi1>
    %1045 = vector.broadcast %1044 : vector<2x1xi1> to vector<2x32xi1>
    %1046 = arith.select %1045, %1040, %979 : vector<2x32xi1>, vector<2x32xf32>
    %cst_122 = arith.constant 0.000000e+00 : f32
    %1047 = vector.shape_cast %1024 : vector<2x1xi1> to vector<2x1xi1>
    %1048 = vector.broadcast %1047 : vector<2x1xi1> to vector<2x32xi1>
    %1049 = vector.broadcast %cst_122 : f32 to vector<2x32xf32>
    %1050 = arith.select %1048, %1040, %1049 : vector<2x32xi1>, vector<2x32xf32>
    %c2_i32_123 = arith.constant 2 : i32
    %1051 = vector.broadcast %c2_i32_123 : i32 to vector<2x1xi32>
    %1052 = arith.cmpi sgt, %2, %1051 : vector<2x1xi32>
    %1053 = vector.extract_strided_slice %1022 {offsets = [0, 0], sizes = [2, 96], strides = [1, 1]} : vector<2x128xf32> to vector<2x96xf32>
    %1054 = arith.negf %1053 : vector<2x96xf32>
    %1055 = math.exp %1054 : vector<2x96xf32>
    %cst_124 = arith.constant 1.000000e+00 : f32
    %1056 = vector.broadcast %cst_124 : f32 to vector<2x96xf32>
    %1057 = arith.addf %1056, %1055 : vector<2x96xf32>
    %1058 = arith.divf %1056, %1057 : vector<2x96xf32>
    %1059 = vector.extract_strided_slice %1022 {offsets = [0, 96], sizes = [2, 32], strides = [1, 1]} : vector<2x128xf32> to vector<2x32xf32>
    %1060 = math.tanh %1059 : vector<2x32xf32>
    %1061 = vector.extract_strided_slice %1058 {offsets = [0, 32], sizes = [2, 32], strides = [1, 1]} : vector<2x96xf32> to vector<2x32xf32>
    %1062 = arith.mulf %1061, %1004 : vector<2x32xf32>
    %1063 = vector.extract_strided_slice %1058 {offsets = [0, 0], sizes = [2, 32], strides = [1, 1]} : vector<2x96xf32> to vector<2x32xf32>
    %1064 = arith.mulf %1063, %1060 : vector<2x32xf32>
    %1065 = arith.addf %1062, %1064 : vector<2x32xf32>
    %1066 = vector.extract_strided_slice %1058 {offsets = [0, 64], sizes = [2, 32], strides = [1, 1]} : vector<2x96xf32> to vector<2x32xf32>
    %1067 = math.tanh %1065 : vector<2x32xf32>
    %1068 = arith.mulf %1066, %1067 : vector<2x32xf32>
    %1069 = vector.shape_cast %1052 : vector<2x1xi1> to vector<2x1xi1>
    %1070 = vector.broadcast %1069 : vector<2x1xi1> to vector<2x32xi1>
    %1071 = arith.select %1070, %1065, %1004 : vector<2x32xi1>, vector<2x32xf32>
    %1072 = vector.shape_cast %1052 : vector<2x1xi1> to vector<2x1xi1>
    %1073 = vector.broadcast %1072 : vector<2x1xi1> to vector<2x32xi1>
    %1074 = arith.select %1073, %1068, %1007 : vector<2x32xi1>, vector<2x32xf32>
    %cst_125 = arith.constant 0.000000e+00 : f32
    %1075 = vector.shape_cast %1052 : vector<2x1xi1> to vector<2x1xi1>
    %1076 = vector.broadcast %1075 : vector<2x1xi1> to vector<2x32xi1>
    %1077 = vector.broadcast %cst_125 : f32 to vector<2x32xf32>
    %1078 = arith.select %1076, %1068, %1077 : vector<2x32xi1>, vector<2x32xf32>
    %1079 = vector.extract_strided_slice %679 {offsets = [12, 0], sizes = [2, 256], strides = [1, 1]} : vector<16x256xf32> to vector<2x256xf32>
    %1080 = vector.extract_strided_slice %1079 {offsets = [0, 0], sizes = [2, 128], strides = [1, 1]} : vector<2x256xf32> to vector<2x128xf32>
    %1081 = vector.extract_strided_slice %679 {offsets = [2, 0], sizes = [2, 256], strides = [1, 1]} : vector<16x256xf32> to vector<2x256xf32>
    %1082 = vector.extract_strided_slice %1081 {offsets = [0, 128], sizes = [2, 128], strides = [1, 1]} : vector<2x256xf32> to vector<2x128xf32>
    %1083 = tpu.concatenate %1046, %1074 in 1 : vector<2x32xf32>, vector<2x32xf32> -> vector<2x64xf32>
    %1084 = arith.truncf %1083 : vector<2x64xf32> to vector<2x64xbf16>
    %cst_126 = arith.constant dense<0.000000e+00> : vector<2x256xf32>
    %1085 = tpu.matmul %1084, %675, %cst_126 {dimension_numbers = #tpu.dot_dimension_numbers<[1], [0], [0], [1], [0, 0, 1, 1], [], []>} : vector<2x64xbf16>, vector<64x256xbf16>, vector<2x256xf32> -> vector<2x256xf32>
    %1086 = vector.extract_strided_slice %1085 {offsets = [0, 0], sizes = [2, 128], strides = [1, 1]} : vector<2x256xf32> to vector<2x128xf32>
    %1087 = arith.addf %1080, %1086 : vector<2x128xf32>
    %1088 = vector.extract_strided_slice %1085 {offsets = [0, 128], sizes = [2, 128], strides = [1, 1]} : vector<2x256xf32> to vector<2x128xf32>
    %1089 = arith.addf %1082, %1088 : vector<2x128xf32>
    %c6_i32_127 = arith.constant 6 : i32
    %1090 = vector.broadcast %c6_i32_127 : i32 to vector<2x1xi32>
    %1091 = arith.cmpi sgt, %2, %1090 : vector<2x1xi32>
    %1092 = vector.extract_strided_slice %1087 {offsets = [0, 0], sizes = [2, 96], strides = [1, 1]} : vector<2x128xf32> to vector<2x96xf32>
    %1093 = arith.negf %1092 : vector<2x96xf32>
    %1094 = math.exp %1093 : vector<2x96xf32>
    %cst_128 = arith.constant 1.000000e+00 : f32
    %1095 = vector.broadcast %cst_128 : f32 to vector<2x96xf32>
    %1096 = arith.addf %1095, %1094 : vector<2x96xf32>
    %1097 = arith.divf %1095, %1096 : vector<2x96xf32>
    %1098 = vector.extract_strided_slice %1087 {offsets = [0, 96], sizes = [2, 32], strides = [1, 1]} : vector<2x128xf32> to vector<2x32xf32>
    %1099 = math.tanh %1098 : vector<2x32xf32>
    %1100 = vector.extract_strided_slice %1097 {offsets = [0, 32], sizes = [2, 32], strides = [1, 1]} : vector<2x96xf32> to vector<2x32xf32>
    %1101 = arith.mulf %1100, %1043 : vector<2x32xf32>
    %1102 = vector.extract_strided_slice %1097 {offsets = [0, 0], sizes = [2, 32], strides = [1, 1]} : vector<2x96xf32> to vector<2x32xf32>
    %1103 = arith.mulf %1102, %1099 : vector<2x32xf32>
    %1104 = arith.addf %1101, %1103 : vector<2x32xf32>
    %1105 = vector.extract_strided_slice %1097 {offsets = [0, 64], sizes = [2, 32], strides = [1, 1]} : vector<2x96xf32> to vector<2x32xf32>
    %1106 = math.tanh %1104 : vector<2x32xf32>
    %1107 = arith.mulf %1105, %1106 : vector<2x32xf32>
    %1108 = vector.shape_cast %1091 : vector<2x1xi1> to vector<2x1xi1>
    %1109 = vector.broadcast %1108 : vector<2x1xi1> to vector<2x32xi1>
    %1110 = arith.select %1109, %1104, %1043 : vector<2x32xi1>, vector<2x32xf32>
    %1111 = vector.shape_cast %1091 : vector<2x1xi1> to vector<2x1xi1>
    %1112 = vector.broadcast %1111 : vector<2x1xi1> to vector<2x32xi1>
    %1113 = arith.select %1112, %1107, %1046 : vector<2x32xi1>, vector<2x32xf32>
    %cst_129 = arith.constant 0.000000e+00 : f32
    %1114 = vector.shape_cast %1091 : vector<2x1xi1> to vector<2x1xi1>
    %1115 = vector.broadcast %1114 : vector<2x1xi1> to vector<2x32xi1>
    %1116 = vector.broadcast %cst_129 : f32 to vector<2x32xf32>
    %1117 = arith.select %1115, %1107, %1116 : vector<2x32xi1>, vector<2x32xf32>
    %c1_i32_130 = arith.constant 1 : i32
    %1118 = vector.broadcast %c1_i32_130 : i32 to vector<2x1xi32>
    %1119 = arith.cmpi sgt, %2, %1118 : vector<2x1xi32>
    %1120 = vector.extract_strided_slice %1089 {offsets = [0, 0], sizes = [2, 96], strides = [1, 1]} : vector<2x128xf32> to vector<2x96xf32>
    %1121 = arith.negf %1120 : vector<2x96xf32>
    %1122 = math.exp %1121 : vector<2x96xf32>
    %cst_131 = arith.constant 1.000000e+00 : f32
    %1123 = vector.broadcast %cst_131 : f32 to vector<2x96xf32>
    %1124 = arith.addf %1123, %1122 : vector<2x96xf32>
    %1125 = arith.divf %1123, %1124 : vector<2x96xf32>
    %1126 = vector.extract_strided_slice %1089 {offsets = [0, 96], sizes = [2, 32], strides = [1, 1]} : vector<2x128xf32> to vector<2x32xf32>
    %1127 = math.tanh %1126 : vector<2x32xf32>
    %1128 = vector.extract_strided_slice %1125 {offsets = [0, 32], sizes = [2, 32], strides = [1, 1]} : vector<2x96xf32> to vector<2x32xf32>
    %1129 = arith.mulf %1128, %1071 : vector<2x32xf32>
    %1130 = vector.extract_strided_slice %1125 {offsets = [0, 0], sizes = [2, 32], strides = [1, 1]} : vector<2x96xf32> to vector<2x32xf32>
    %1131 = arith.mulf %1130, %1127 : vector<2x32xf32>
    %1132 = arith.addf %1129, %1131 : vector<2x32xf32>
    %1133 = vector.extract_strided_slice %1125 {offsets = [0, 64], sizes = [2, 32], strides = [1, 1]} : vector<2x96xf32> to vector<2x32xf32>
    %1134 = math.tanh %1132 : vector<2x32xf32>
    %1135 = arith.mulf %1133, %1134 : vector<2x32xf32>
    %1136 = vector.shape_cast %1119 : vector<2x1xi1> to vector<2x1xi1>
    %1137 = vector.broadcast %1136 : vector<2x1xi1> to vector<2x32xi1>
    %1138 = arith.select %1137, %1132, %1071 : vector<2x32xi1>, vector<2x32xf32>
    %1139 = vector.shape_cast %1119 : vector<2x1xi1> to vector<2x1xi1>
    %1140 = vector.broadcast %1139 : vector<2x1xi1> to vector<2x32xi1>
    %1141 = arith.select %1140, %1135, %1074 : vector<2x32xi1>, vector<2x32xf32>
    %cst_132 = arith.constant 0.000000e+00 : f32
    %1142 = vector.shape_cast %1119 : vector<2x1xi1> to vector<2x1xi1>
    %1143 = vector.broadcast %1142 : vector<2x1xi1> to vector<2x32xi1>
    %1144 = vector.broadcast %cst_132 : f32 to vector<2x32xf32>
    %1145 = arith.select %1143, %1135, %1144 : vector<2x32xi1>, vector<2x32xf32>
    %1146 = vector.extract_strided_slice %679 {offsets = [14, 0], sizes = [2, 256], strides = [1, 1]} : vector<16x256xf32> to vector<2x256xf32>
    %1147 = vector.extract_strided_slice %1146 {offsets = [0, 0], sizes = [2, 128], strides = [1, 1]} : vector<2x256xf32> to vector<2x128xf32>
    %1148 = vector.extract_strided_slice %679 {offsets = [0, 0], sizes = [2, 256], strides = [1, 1]} : vector<16x256xf32> to vector<2x256xf32>
    %1149 = vector.extract_strided_slice %1148 {offsets = [0, 128], sizes = [2, 128], strides = [1, 1]} : vector<2x256xf32> to vector<2x128xf32>
    %1150 = tpu.concatenate %1113, %1141 in 1 : vector<2x32xf32>, vector<2x32xf32> -> vector<2x64xf32>
    %1151 = arith.truncf %1150 : vector<2x64xf32> to vector<2x64xbf16>
    %cst_133 = arith.constant dense<0.000000e+00> : vector<2x256xf32>
    %1152 = tpu.matmul %1151, %675, %cst_133 {dimension_numbers = #tpu.dot_dimension_numbers<[1], [0], [0], [1], [0, 0, 1, 1], [], []>} : vector<2x64xbf16>, vector<64x256xbf16>, vector<2x256xf32> -> vector<2x256xf32>
    %1153 = vector.extract_strided_slice %1152 {offsets = [0, 0], sizes = [2, 128], strides = [1, 1]} : vector<2x256xf32> to vector<2x128xf32>
    %1154 = arith.addf %1147, %1153 : vector<2x128xf32>
    %1155 = vector.extract_strided_slice %1152 {offsets = [0, 128], sizes = [2, 128], strides = [1, 1]} : vector<2x256xf32> to vector<2x128xf32>
    %1156 = arith.addf %1149, %1155 : vector<2x128xf32>
    %c7_i32_134 = arith.constant 7 : i32
    %1157 = vector.broadcast %c7_i32_134 : i32 to vector<2x1xi32>
    %1158 = arith.cmpi sgt, %2, %1157 : vector<2x1xi32>
    %1159 = vector.extract_strided_slice %1154 {offsets = [0, 0], sizes = [2, 96], strides = [1, 1]} : vector<2x128xf32> to vector<2x96xf32>
    %1160 = arith.negf %1159 : vector<2x96xf32>
    %1161 = math.exp %1160 : vector<2x96xf32>
    %cst_135 = arith.constant 1.000000e+00 : f32
    %1162 = vector.broadcast %cst_135 : f32 to vector<2x96xf32>
    %1163 = arith.addf %1162, %1161 : vector<2x96xf32>
    %1164 = arith.divf %1162, %1163 : vector<2x96xf32>
    %1165 = vector.extract_strided_slice %1154 {offsets = [0, 96], sizes = [2, 32], strides = [1, 1]} : vector<2x128xf32> to vector<2x32xf32>
    %1166 = math.tanh %1165 : vector<2x32xf32>
    %1167 = vector.extract_strided_slice %1164 {offsets = [0, 32], sizes = [2, 32], strides = [1, 1]} : vector<2x96xf32> to vector<2x32xf32>
    %1168 = arith.mulf %1167, %1110 : vector<2x32xf32>
    %1169 = vector.extract_strided_slice %1164 {offsets = [0, 0], sizes = [2, 32], strides = [1, 1]} : vector<2x96xf32> to vector<2x32xf32>
    %1170 = arith.mulf %1169, %1166 : vector<2x32xf32>
    %1171 = arith.addf %1168, %1170 : vector<2x32xf32>
    %1172 = vector.extract_strided_slice %1164 {offsets = [0, 64], sizes = [2, 32], strides = [1, 1]} : vector<2x96xf32> to vector<2x32xf32>
    %1173 = math.tanh %1171 : vector<2x32xf32>
    %1174 = arith.mulf %1172, %1173 : vector<2x32xf32>
    %cst_136 = arith.constant 0.000000e+00 : f32
    %1175 = vector.shape_cast %1158 : vector<2x1xi1> to vector<2x1xi1>
    %1176 = vector.broadcast %1175 : vector<2x1xi1> to vector<2x32xi1>
    %1177 = vector.broadcast %cst_136 : f32 to vector<2x32xf32>
    %1178 = arith.select %1176, %1174, %1177 : vector<2x32xi1>, vector<2x32xf32>
    %c0_i32_137 = arith.constant 0 : i32
    %1179 = vector.broadcast %c0_i32_137 : i32 to vector<2x1xi32>
    %1180 = arith.cmpi sgt, %2, %1179 : vector<2x1xi32>
    %1181 = vector.extract_strided_slice %1156 {offsets = [0, 0], sizes = [2, 96], strides = [1, 1]} : vector<2x128xf32> to vector<2x96xf32>
    %1182 = arith.negf %1181 : vector<2x96xf32>
    %1183 = math.exp %1182 : vector<2x96xf32>
    %cst_138 = arith.constant 1.000000e+00 : f32
    %1184 = vector.broadcast %cst_138 : f32 to vector<2x96xf32>
    %1185 = arith.addf %1184, %1183 : vector<2x96xf32>
    %1186 = arith.divf %1184, %1185 : vector<2x96xf32>
    %1187 = vector.extract_strided_slice %1156 {offsets = [0, 96], sizes = [2, 32], strides = [1, 1]} : vector<2x128xf32> to vector<2x32xf32>
    %1188 = math.tanh %1187 : vector<2x32xf32>
    %1189 = vector.extract_strided_slice %1186 {offsets = [0, 32], sizes = [2, 32], strides = [1, 1]} : vector<2x96xf32> to vector<2x32xf32>
    %1190 = arith.mulf %1189, %1138 : vector<2x32xf32>
    %1191 = vector.extract_strided_slice %1186 {offsets = [0, 0], sizes = [2, 32], strides = [1, 1]} : vector<2x96xf32> to vector<2x32xf32>
    %1192 = arith.mulf %1191, %1188 : vector<2x32xf32>
    %1193 = arith.addf %1190, %1192 : vector<2x32xf32>
    %1194 = vector.extract_strided_slice %1186 {offsets = [0, 64], sizes = [2, 32], strides = [1, 1]} : vector<2x96xf32> to vector<2x32xf32>
    %1195 = math.tanh %1193 : vector<2x32xf32>
    %1196 = arith.mulf %1194, %1195 : vector<2x32xf32>
    %cst_139 = arith.constant 0.000000e+00 : f32
    %1197 = vector.shape_cast %1180 : vector<2x1xi1> to vector<2x1xi1>
    %1198 = vector.broadcast %1197 : vector<2x1xi1> to vector<2x32xi1>
    %1199 = vector.broadcast %cst_139 : f32 to vector<2x32xf32>
    %1200 = arith.select %1198, %1196, %1199 : vector<2x32xi1>, vector<2x32xf32>
    %1201 = tpu.concatenate %715, %1200, %782, %1145, %849, %1078, %916, %1011, %983, %944, %1050, %877, %1117, %810, %1178, %743 in 1 : vector<2x32xf32>, vector<2x32xf32>, vector<2x32xf32>, vector<2x32xf32>, vector<2x32xf32>, vector<2x32xf32>, vector<2x32xf32>, vector<2x32xf32>, vector<2x32xf32>, vector<2x32xf32>, vector<2x32xf32>, vector<2x32xf32>, vector<2x32xf32>, vector<2x32xf32>, vector<2x32xf32>, vector<2x32xf32> -> vector<2x512xf32>
    %cst_140 = arith.constant 0.000000e+00 : f32
    %1202 = vector.broadcast %cst_140 : f32 to vector<2x512xf32>
    %1203 = arith.maximumf %1201, %1202 : vector<2x512xf32>
    %1204 = arith.truncf %1203 : vector<2x512xf32> to vector<2x512xbf16>
    %c0_141 = arith.constant 0 : index
    %c0_142 = arith.constant 0 : index
    %1205 = vector.load %arg4[%c0_141, %c0_142] : memref<512x3xbf16, #tpu.memory_space<vmem>>, vector<512x3xbf16>
    %cst_143 = arith.constant dense<0.000000e+00> : vector<2x3xf32>
    %1206 = tpu.matmul %1204, %1205, %cst_143 {dimension_numbers = #tpu.dot_dimension_numbers<[1], [0], [0], [1], [0, 0, 1, 1], [], []>} : vector<2x512xbf16>, vector<512x3xbf16>, vector<2x3xf32> -> vector<2x3xf32>
    %1207 = vector.broadcast %10 : vector<1x3xf32> to vector<2x3xf32>
    %1208 = arith.addf %1206, %1207 : vector<2x3xf32>
    %c0_144 = arith.constant 0 : index
    %c0_145 = arith.constant 0 : index
    %1209 = vector.load %arg5[%c0_144, %c0_145] : memref<2x3xf32, #tpu.memory_space<vmem>>, vector<2x3xf32>
    tpu.vector_store %arg5[%c0_144, %c0_145], %1208 {strides = array<i32>} : memref<2x3xf32, #tpu.memory_space<vmem>>, vector<2x3xf32>,
    return
  }
}

</mosaic_0001>

<bundles_post_ra>
// kernel: sentiment_forward.1
= control target key start
LH: loop header
LB: loop body
LE: loop exit
PB: predicated region body
PF: predicated region fallthrough
CT: control target
= control target key end

     0   :  { %v3993_v1 = vmov 0   ;;  %v3994_v2 = vmov 0.0   ;;  %vm3995_vm0 = vmmov 0   ;;  %s5418_s0 = inlined_call_operand.vmem [shape: s32[18,1], index: 0, kind: input, shape index: {}]   ;;  %s5419_s1 = inlined_call_operand.vmem [shape: bf16[224,256], index: 1, kind: input, shape index: {}]   ;;  %s5420_s2 = inlined_call_operand.vmem [shape: bf16[272,128], index: 2, kind: input, shape index: {}]   ;;  %s5421_s3 = inlined_call_operand.vmem [shape: f32[8,256], index: 3, kind: input, shape index: {}]   ;;  %s5422_s4 = inlined_call_operand.vmem [shape: bf16[512,3], index: 4, kind: input, shape index: {}]   ;;  %s5423_s5 = inlined_call_operand.hbm [shape: f32[2,3], index: 5, kind: output, shape index: {}]  }
   0x1   :  { %v22_v0 = vld [vmem:[%s5418_s0] sm:$0xff]  ;;  %3544 = vset.pattern.permute.xlu0 %v3993_v1  ;;  %3481 = vmatprep.subr.bf16.mxu0 %v3994_v2  ;;  %v23_v4 = vld [vmem:[%s5418_s0 + $0x8] sm:$0xff]  ;;  %v3613_v6 = vld [vmem:[%s5420_s2 + $0x10] sm:$0xff]  }
   0x2   :  { %v3611_v3 = vld [vmem:[%s5420_s2] sm:$0xff]   ;;  %38 = vperm.xlu0 %3544, %v22_v0   ;;  %v3612_v5 = vld [vmem:[%s5420_s2 + $0x8] sm:$0xff]   ;;  %3493 = vmatprep.subr.bf16.mxu1 %v3994_v2  ;;  %v3614_v7 = vld [vmem:[%s5420_s2 + $0x18] sm:$0xff]  }
   0x3   :  { %3482 = vmatpush3.bf16.msra.mxu0 %v3611_v3  ;;  %3545 = vset.pattern.permute.xlu1 %v3993_v1  ;;  %v3615_v8 = vld [vmem:[%s5420_s2 + $0x20] sm:$0xff]  }
   0x4   :  { %3483 = vmatprep.subr.bf16.mxu0 %v3994_v2  ;;  %3489 = vmatprep.mubr.msk.bf16.mxu0 %vm3995_vm0, %v3994_v2 }
   0x5   :  { %3497 = vmatprep.mubr.msk.bf16.mxu1 %vm3995_vm0, %v3994_v2  ;;  %3494 = vmatpush3.bf16.msra.mxu1 %v3615_v8 }
   0x6   :  { %41 = vperm.xlu0 %3544, %v23_v4   ;;  %3495 = vmatprep.subr.bf16.mxu1 %v3994_v2 }
   0x7   :  { %3484 = vmatpush3.bf16.msra.mxu0 %v3612_v5 }
   0x8   :  { %3485 = vmatprep.subr.bf16.mxu0 %v3994_v2 }
   0xb   :  { %3486 = vmatpush3.bf16.msra.mxu0 %v3613_v6 }
   0xc   :  { %3487 = vmatprep.subr.bf16.mxu0 %v3994_v2 }
   0xf   :  { %3488 = vmatpush3.bf16.msra.mxu0 %v3614_v7 }
  0x10   :  { %3527 = vmatprep.subr.bf16.mxu0 %v3994_v2 }
  0x11   :  { %10 = vsyncpa [#allocation3], 0  ;;  %v35_v9 = vlaneseq  ;;  %vm74_vm3 = vcmask 523264   ;;  %v3616_v16 = vld [vmem:[%s5420_s2 + $0x28] sm:$0xff]   ;;  %vm162_vm4 = vcmask 261120   ;;  %v4090_v24 = vld [vmem:[%s5421_s3] sm:$0xff] }
  0x12   :  { %3496 = vmatpush3.bf16.msra.mxu1 %v3616_v16  ;;  %v3617_v25 = vld [vmem:[%s5420_s2 + $0x40] sm:$0xff]   ;;  %v3618_v27 = vld [vmem:[%s5420_s2 + $0x48] sm:$0xff]   ;;  %v3619_v33 = vld [vmem:[%s5420_s2 + $0x50] sm:$0xff]   ;;  %s3996_s17 = smov 96   ;;  %s3997_s28 = smov 32   ;;  %vm233_vm5 = vcmask 785408  }
  0x13   :  { %v36_v10 = vand.u32 127, %v35_v9  ;;  %3501 = vmatprep.subr.bf16.mxu1 %v3994_v2  ;;  %v4084_v22 = vshrl.u32 %v35_v9, 7  ;;  %v3620_v35 = vld [vmem:[%s5420_s2 + $0x58] sm:$0xff]   ;;  %v3621_v36 = vld [vmem:[%s5420_s2 + $0x60] sm:$0xff]   ;;  %v3622_v37 = vld [vmem:[%s5420_s2 + $0x68] sm:$0xff]   ;;  %s3998_s29 = smov 64  }
  0x14   :  { %v3623_v38 = vld [vmem:[%s5420_s2 + $0x70] sm:$0xff]   ;;  %v3624_v39 = vld [vmem:[%s5420_s2 + $0x78] sm:$0xff]   ;;  %s3999_s30 = smov 124   ;;  %v3625_v57 = vld [vmem:[%s5420_s2 + $0x80] sm:$0xff]   ;;  %s4000_s8 = smov 4   ;;  %vm340_vm6 = vcmask 31744  }
  0x15   :  { %v148_v23 = vsub.s32 2, %v4084_v22  ;;  %vm342_vm7 = vcmask 64512   ;;  %vm344_vm8 = vcmask 97280   ;;  %vm353_vm9 = vcmask 130048   ;;  %v3626_v8 = vld [vmem:[%s5420_s2 + $0x30] sm:$0xff]  }
  0x16   :  { %vm611_vm10 = vcmask 1040384  }
  0x17   :  { %v149_v28 = vrot.slane %v4090_v24, %v148_v23 }
  0x81   :  { %v39_v11 = vpop.permute.xlu0 %38 }
  0x82   :  { %vm43_vm1 = vcmp.eq.s32.totalorder %v36_v10, %v39_v11 }
  0x83   :  { %v3283_v13 = vsel %vm43_vm1, 1.0, %v3994_v2 }
  0x85   :  { %v42_v12 = vpop.permute.xlu0 %41 }
  0x86   :  { %vm44_vm2 = vcmp.eq.s32.totalorder %v36_v10, %v42_v12  ;;  %v3627_v10 = vld [vmem:[%s5420_s2 + $0x38] sm:$0xff]  }
  0x87   :  { %v3284_v14 = vsel %vm44_vm2, 1.0, %v3994_v2 }
  0x88   :  { %v49_v15 = vpack.c.bf16 %v3284_v14, %v3283_v13 }
  0x8a   :  { %3490 = vmatmul.mubr.msk.bf16.vlgmr.msra.gmra.mrb[0].mxu0 %vm74_vm3, %v49_v15 }
  0x8b   :  { %3531 = vmatprep.mubr.msk.bf16.mxu0 %vm3995_vm0, %v3994_v2  ;;  %3528 = vmatpush3.bf16.msra.mxu0 %v3626_v8  ;;  %v533_v8 = vsub.s32 0, %v4084_v22 }
  0x8c   :  { %3529 = vmatprep.subr.bf16.mxu0 %v3994_v2 }
  0x8f   :  { %3530 = vmatpush3.bf16.msra.mxu0 %v3627_v10  ;;  %v534_v10 = vrot.slane %v4090_v24, %v533_v8 }
 0x15d   :  { %v4075_v17 = vpop.f32.mrb[0].mxu0 }
 0x15e   :  { %v3491_v18 = vpop.f32.mrb[1].mxu0 }
 0x15f   :  { %v4077_v19 = vpop.f32.mrb[2].mxu0 }
 0x160   :  { %v145_v20 = vpack.c.bf16 %v4077_v19, %v4075_v17  ;;  %v3492_v21 = vpop.f32.mrb[3].mxu0 }
 0x162   :  { %3498 = vmatmul.mubr.msk.bf16.vlgmr.msra.gmra.mrb[0].mxu1 %vm162_vm4, %v145_v20 }
 0x163   :  { %3517 = vmatprep.mubr.msk.bf16.mxu1 %vm3995_vm0, %v3994_v2  ;;  %3502 = vmatpush3.bf16.msra.mxu1 %v3617_v25 }
 0x164   :  { %3503 = vmatprep.subr.bf16.mxu1 %v3994_v2 }
 0x167   :  { %3504 = vmatpush3.bf16.msra.mxu1 %v3618_v27  ;;  %v419_v27 = vsub.s32 3, %v4084_v22 }
 0x168   :  { %3505 = vmatprep.subr.bf16.mxu1 %v3994_v2 }
 0x16b   :  { %3506 = vmatpush3.bf16.msra.mxu1 %v3619_v33 }
 0x16c   :  { %3507 = vmatprep.subr.bf16.mxu1 %v3994_v2 }
 0x16f   :  { %3508 = vmatpush3.bf16.msra.mxu1 %v3620_v35 }
 0x170   :  { %3509 = vmatprep.subr.bf16.mxu1 %v3994_v2 }
 0x173   :  { %3510 = vmatpush3.bf16.msra.mxu1 %v3621_v36 }
 0x174   :  { %3511 = vmatprep.subr.bf16.mxu1 %v3994_v2 }
 0x177   :  { %3512 = vmatpush3.bf16.msra.mxu1 %v3622_v37 }
 0x178   :  { %3513 = vmatprep.subr.bf16.mxu1 %v3994_v2 }
 0x17b   :  { %3514 = vmatpush3.bf16.msra.mxu1 %v3623_v38 }
 0x17c   :  { %3515 = vmatprep.subr.bf16.mxu1 %v3994_v2 }
 0x17f   :  { %3516 = vmatpush3.bf16.msra.mxu1 %v3624_v39 }
 0x180   :  { %3521 = vmatprep.subr.bf16.mxu1 %v3994_v2 }
 0x235   :  { %v200_v26 = vpop.f32.mrb[0].mxu1 }
 0x236   :  { %v3499_v29 = vpop.f32.mrb[1].mxu1  ;;  %v4108_v34 = vadd.f32 %v200_v26, %v149_v28 }
 0x237   :  { %v203_v30 = vpop.f32.mrb[2].mxu1 }
 0x238   :  { %v4100_v31 = vadd.f32 %v203_v30, %v149_v28  ;;  %v3500_v32 = vpop.f32.mrb[3].mxu1  ;;  %v420_v28 = vrot.slane %v4090_v24, %v419_v27 }
 0x23a   :  { %213 = vrot.lane.b32.xlu1 %v4100_v31, %s3996_s17 }
 0x23e   :  { %208 = vrot.lane.b32.xlu1 %v4108_v34, %s3996_s17 }
 0x2ac   :  { %v214_v40 = vpop.permute.xlu1 %213 }
 0x2ad   :  { %v216_v41 = vmul.f32 %v214_v40, %v4108_v34  ;;  %v218_v44 = vmul.f32 %v214_v40, %v4100_v31 }
 0x2af   :  { %220 = vrot.lane.b32.xlu0 %v216_v41, %s3997_s28 }
 0x2b0   :  { %v209_v42 = vpop.permute.xlu1 %208 }
 0x2b1   :  { %v217_v43 = vmul.f32 %v209_v42, %v4100_v31  ;;  %v211_v46 = vmul.f32 %v209_v42, %v4108_v34 }
 0x2b3   :  { %228 = vrot.lane.b32.xlu0 %v218_v44, %s3996_s17  ;;  %224 = vrot.lane.b32.xlu1 %v217_v43, %s3998_s29 }
 0x321   :  { %v221_v45 = vpop.permute.xlu0 %220 }
 0x322   :  { %v231_v47 = vsel %vm162_vm4, %v211_v46, %v221_v45 }
 0x325   :  { %v229_v48 = vpop.permute.xlu0 %228  ;;  %v225_v49 = vpop.permute.xlu1 %224 }
 0x326   :  { %v232_v50 = vsel %vm74_vm3, %v231_v47, %v225_v49  ;;  %v3631_v49 = vld [vmem:[%s5419_s1 + $0x10] ss:$8 sps:$4 sm:$0xff]  }
 0x327   :  { %v234_v51 = vsel %vm233_vm5, %v232_v50, %v229_v48  ;;  %v3628_v48 = vld [vmem:[%s5419_s1] ss:$8 sps:$4 sm:$0xff]   ;;  %v3633_v50 = vld [vmem:[%s5419_s1 + $0x14] ss:$8 sps:$4 sm:$0xff]  }
 0x328   :  { %v235_v52 = vpack.c.bf16 %v234_v51, %v234_v51 }
 0x32a   :  { %3518 = vmatmul.mubr.bf16.vlgmr.msra.gmra.mrb[4].mxu1 %v235_v52 }
 0x32b   :  { %3523 = vmatprep.mubr.msk.bf16.mxu1 %vm3995_vm0, %v3994_v2  ;;  %3522 = vmatpush3.bf16.msra.mxu1 %v3625_v57  ;;  %v508_v57 = vsub.s32 4, %v4084_v22 }
 0x3fd   :  { %v318_v53 = vpop.f32.mrb[4].mxu1 }
 0x3fe   :  { %325 = vrot.lane.b32.xlu1 %v318_v53, %s3999_s30  ;;  %v3519_v54 = vpop.f32.mrb[5].mxu1 }
 0x3ff   :  { %v321_v55 = vpop.f32.mrb[6].mxu1 }
 0x400   :  { %v3520_v56 = vpop.f32.mrb[7].mxu1 }
 0x402   :  { %397 = vrot.lane.b32.xlu1 %v4108_v34, %s3998_s29 }
 0x470   :  { %v326_v58 = vpop.permute.xlu1 %325 }
 0x471   :  { %v328_v59 = vsub.f32 %v318_v53, %v326_v58  ;;  %v509_v58 = vrot.slane %v4090_v24, %v508_v57 }
 0x473   :  { %v3301_v60 = vmul.f32 -1.442695, %v328_v59  ;;  %v514_v59 = vsub.s32 5, %v4084_v22 }
 0x474   :  { %v398_v9 = vpop.permute.xlu1 %397 }
 0x475   :  { %3702 = vpow2.f32 %v3301_v60  ;;  %v403_v11 = vsel %vm162_vm4, %v398_v9, %v214_v40  ;;  %v26_v9 = vld [vmem:[%s5421_s3 + $0x8] sm:$0xff] }
 0x476   :  { %v404_v13 = vsel %vm74_vm3, %v403_v11, %v4108_v34  ;;  %v538_v11 = vrot.slane %v26_v9, %v533_v8 }
 0x47f   :  { %v3703_v61 = vpop.eup %3702 }
 0x480   :  { %v332_v62 = vadd.f32 1.0, %v3703_v61 }
 0x482   :  { %3704 = vrcp.f32 %v332_v62 }
 0x48c   :  { %v3705_v63 = vpop.eup %3704 }
 0x48d   :  { %v335_v0 = vsub.f32 1.0, %v3705_v63 }
 0x48f   :  { %337 = vrot.lane.b32.xlu0 %v335_v0, %s4000_s8 }
 0x493   :  { %400 = vrot.lane.b32.xlu0 %v4100_v31, %s3997_s28 }
 0x501   :  { %v338_v3 = vpop.permute.xlu0 %337 }
 0x502   :  { %v341_v4 = vsel %vm340_vm6, %v3705_v63, %v338_v3 }
 0x503   :  { %v343_v5 = vsel %vm342_vm7, %v341_v4, %v3705_v63 }
 0x504   :  { %v345_v6 = vsel %vm344_vm8, %v343_v5, %v338_v3  ;;  %v515_v3 = vrot.slane %v4090_v24, %v514_v59 }
 0x505   :  { %v346_v7 = vpack.c.bf16 %v345_v6, %v345_v6  ;;  %v401_v12 = vpop.permute.xlu0 %400 }
 0x506   :  { %v405_v15 = vsel %vm233_vm5, %v404_v13, %v401_v12 }
 0x507   :  { %3524 = vmatmul.mubr.msk.bf16.vlgmr.msra.gmra.mrb[8].mxu1 %vm353_vm9, %v346_v7 }
 0x508   :  { %933 = vmatprep.mubr.bf16.mxu1 %v3993_v1 }
 0x5da   :  { %v391_v14 = vpop.f32.mrb[8].mxu1 }
 0x5db   :  { %v406_v16 = vmul.f32 %v405_v15, %v391_v14  ;;  %v3525_v18 = vpop.f32.mrb[9].mxu1 }
 0x5dc   :  { %v394_v20 = vpop.f32.mrb[10].mxu1 }
 0x5dd   :  { %408 = vrot.lane.b32.xlu1 %v406_v16, %s3996_s17  ;;  %v3526_v21 = vpop.f32.mrb[11].mxu1 }
 0x64f   :  { %v409_v23 = vpop.permute.xlu1 %408 }
 0x650   :  { %v411_v25 = vadd.f32 %v409_v23, %v406_v16 }
 0x652   :  { %413 = vrot.lane.b32.xlu0 %v411_v25, %s3998_s29 }
 0x6c4   :  { %v414_v2 = vpop.permute.xlu0 %413 }
 0x6c5   :  { %v416_v26 = vpack.c.bf16 %v414_v2, %v411_v25 }
 0x6c7   :  { %3532 = vmatmul.mubr.msk.bf16.vlgmr.msra.gmra.mrb[4].mxu0 %vm162_vm4, %v416_v26 }
 0x6c8   :  { %594 = vmatprep.mubr.bf16.mxu0 %v3993_v1 }
 0x79a   :  { %v470_v29 = vpop.f32.mrb[4].mxu0 }
 0x79b   :  { %v471_v30 = vadd.f32 %v470_v29, %v420_v28  ;;  %v3533_v31 = vpop.f32.mrb[5].mxu0 }
 0x79c   :  { %v473_v32 = vpop.f32.mrb[6].mxu0 }
 0x79d   :  { %v474_v33 = vadd.f32 %v473_v32, %v420_v28  ;;  %v3534_v34 = vpop.f32.mrb[7].mxu0  ;;  %v477_v35 = vadd.f32 %v471_v30, %v4075_v17 }
 0x79f   :  { %v479_v36 = vsel %vm162_vm4, %v477_v35, 0.0  ;;  %v478_v37 = vadd.f32 %v474_v33, %v4077_v19  ;;  %v3630_v19 = vld [vmem:[%s5419_s1 + $0x4] ss:$8 sps:$4 sm:$0xff]  }
 0x7a0   :  { %480 = vadd.xlane.f32.xlu1 %v479_v36  ;;  %562 = vmatprep.subr.bf16.mxu0 %v3630_v19 }
 0x7a1   :  { %v482_v38 = vsel %vm162_vm4, %v478_v37, 0.0  ;;  %563 = vmatpush1.bf16.msra.mxu0 %v3628_v48 }
 0x7a2   :  { %483 = vadd.xlane.f32.xlu0 %v482_v38  ;;  %564 = vmatprep.subr.bf16.mxu0 %v3633_v50 }
 0x7a5   :  { %565 = vmatpush1.bf16.msra.mxu0 %v3631_v49 }
 0x82d   :  { %v481_v39 = vpop.xlane.xlu1 %480 }
 0x82e   :  { %v486_v40 = vmul.f32 0.03125, %v481_v39 }
 0x82f   :  { %v484_v41 = vpop.xlane.xlu0 %483 }
 0x830   :  { %v488_v42 = vsub.f32 %v477_v35, %v486_v40  ;;  %v487_v43 = vmul.f32 0.03125, %v484_v41 }
 0x832   :  { %v489_v44 = vsub.f32 %v478_v37, %v487_v43  ;;  %v490_v45 = vmul.f32 %v488_v42, %v488_v42 }
 0x834   :  { %v492_v46 = vsel %vm162_vm4, %v490_v45, 0.0  ;;  %v491_v47 = vmul.f32 %v489_v44, %v489_v44 }
 0x835   :  { %493 = vadd.xlane.f32.xlu0 %v492_v46 }
 0x836   :  { %v495_v17 = vsel %vm162_vm4, %v491_v47, 0.0 }
 0x837   :  { %496 = vadd.xlane.f32.xlu1 %v495_v17 }
 0x8c2   :  { %v494_v51 = vpop.xlane.xlu0 %493 }
 0x8c3   :  { %v498_v52 = vmul.f32 0.03125, %v494_v51 }
 0x8c4   :  { %v497_v53 = vpop.xlane.xlu1 %496 }
 0x8c5   :  { %v500_v54 = vadd.f32 1e-05, %v498_v52  ;;  %v499_v55 = vmul.f32 0.03125, %v497_v53 }
 0x8c7   :  { %3706 = vrsqrt.f32 %v500_v54  ;;  %v501_v56 = vadd.f32 1e-05, %v499_v55 }
 0x8c9   :  { %3708 = vrsqrt.f32 %v501_v56 }
 0x8d1   :  { %v3707_v60 = vpop.eup %3706 }
 0x8d2   :  { %v504_v61 = vmul.f32 %v3707_v60, %v488_v42 }
 0x8d3   :  { %v3709_v62 = vpop.eup %3708 }
 0x8d4   :  { %v510_v63 = vmul.f32 %v509_v58, %v504_v61  ;;  %v505_v0 = vmul.f32 %v3709_v62, %v489_v44 }
 0x8d6   :  { %v511_v4 = vmul.f32 %v509_v58, %v505_v0  ;;  %v516_v5 = vadd.f32 %v515_v3, %v510_v63 }
 0x8d8   :  { %v517_v6 = vadd.f32 %v515_v3, %v511_v4 }
 0x8da   :  { %v530_v7 = vpack.c.bf16 %v517_v6, %v516_v5 }
 0x8dc   :  { %3311 = vmatmul.mubr.msk.bf16.vlgmr.msra.gmra.mrb[8].mxu0 %vm162_vm4, %v530_v7 }
 0x8dd   :  { %791 = vmatprep.mubr.bf16.mxu0 %v3993_v1 }
 0x9af   :  { %v596_v12 = vpop.f32.mrb[8].mxu0 }
 0x9b0   :  { %v597_v13 = vadd.f32 %v596_v12, %v534_v10  ;;  %v598_v14 = vpop.f32.mrb[9].mxu0 }
 0x9b1   :  { %v599_v15 = vadd.f32 %v598_v14, %v538_v11  ;;  %v600_v16 = vpop.f32.mrb[10].mxu0 }
 0x9b2   :  { %v601_v18 = vadd.f32 %v600_v16, %v534_v10  ;;  %v602_v20 = vpop.f32.mrb[11].mxu0  ;;  %v690_v21 = vrot.slane %v597_v13, 1  ;;  %v868_v23 = vrot.slane %v597_v13, 2  ;;  %v1010_v25 = vrot.slane %v597_v13, 3  ;;  %v4248_v10 = vld [vmem:[%s5418_s0 + $0x10] sm:$0x3] }
 0x9b3   :  { %v603_v2 = vadd.f32 %v602_v20, %v538_v11  ;;  %v617_v26 = vrot.slane %v599_v15, 7  ;;  %v697_v27 = vrot.slane %v599_v15, 6  ;;  %v879_v28 = vrot.slane %v599_v15, 5 }
 0x9b4   :  { %v607_v29 = vrot.slane %v601_v18, 7  ;;  %v4200_v30 = vsel %vm611_vm10, %v690_v21, %v601_v18  ;;  %v872_v24 = vrot.slane %v601_v18, 1  ;;  %v1014_v31 = vrot.slane %v601_v18, 2 }
 0x9b5   :  { %v621_v32 = vrot.slane %v603_v2, 6  ;;  %v701_v33 = vrot.slane %v603_v2, 5  ;;  %v883_v34 = vrot.slane %v603_v2, 4  ;;  %v1021_v35 = vrot.slane %v599_v15, 4 }
 0x9b6   :  { %v612_v36 = vsel %vm611_vm10, %v597_v13, %v607_v29  ;;  %v4204_v37 = vsel %vm611_vm10, %v868_v23, %v872_v24  ;;  %v4207_v38 = vsel %vm611_vm10, %v1010_v25, %v1014_v31  ;;  %v1025_v39 = vrot.slane %v603_v2, 3  ;;  %v4270_v29 = vld [vmem:[%s5419_s1 + $0x20] ss:$8 sps:$4 sm:$0xff]   ;;  %v4275_v24 = vld [vmem:[%s5419_s1 + $0x34] ss:$8 sps:$4 sm:$0xff]  }
 0x9b7   :  { %3710 = vtanh.f32 %v612_v36  ;;  %v625_v40 = vsel %vm611_vm10, %v617_v26, %v621_v32  ;;  %v4211_v41 = vsel %vm611_vm10, %v697_v27, %v701_v33  ;;  %v4214_v42 = vsel %vm611_vm10, %v879_v28, %v883_v34  ;;  %v4265_v28 = vld [vmem:[%s5419_s1 + $0x24] ss:$8 sps:$4 sm:$0xff]   ;;  %v4283_v31 = vld [vmem:[%s5419_s1 + $0x30] ss:$8 sps:$4 sm:$0xff]   ;;  %v4297_v33 = vld [vmem:[%s5419_s1 + $0x40] ss:$8 sps:$4 sm:$0xff]  }
 0x9b8   :  { %3712 = vtanh.f32 %v625_v40  ;;  %v4217_v43 = vsel %vm611_vm10, %v1021_v35, %v1025_v39  ;;  %v1020_v44 = vrot.slane %v597_v13, 4  ;;  %v1024_v45 = vrot.slane %v601_v18, 3  ;;  %759 = vmatprep.subr.bf16.mxu0 %v4265_v28  ;;  %901 = vmatprep.subr.bf16.mxu1 %v4265_v28  ;;  %v4290_v32 = vld [vmem:[%s5419_s1 + $0x44] ss:$8 sps:$4 sm:$0xff]   ;;  %v4314_v39 = vld [vmem:[%s5419_s1 + $0x50] ss:$8 sps:$4 sm:$0xff]  }
 0x9b9   :  { %v1011_v47 = vrot.slane %v599_v15, 3  ;;  %v1015_v17 = vrot.slane %v603_v2, 2  ;;  %v878_v19 = vrot.slane %v597_v13, 5  ;;  %v882_v48 = vrot.slane %v601_v18, 4  ;;  %760 = vmatpush1.bf16.msra.mxu0 %v4270_v29  ;;  %902 = vmatpush1.bf16.msra.mxu1 %v4270_v29 }
 0x9ba   :  { %v4220_v46 = vsel %vm611_vm10, %v1020_v44, %v1024_v45  ;;  %v869_v49 = vrot.slane %v599_v15, 2  ;;  %v873_v50 = vrot.slane %v603_v2, 1  ;;  %v696_v51 = vrot.slane %v597_v13, 6  ;;  %761 = vmatprep.subr.bf16.mxu0 %v4275_v24  ;;  %903 = vmatprep.subr.bf16.mxu1 %v4275_v24 }
 0x9bb   :  { %v4223_v52 = vsel %vm611_vm10, %v1011_v47, %v1015_v17  ;;  %v700_v53 = vrot.slane %v601_v18, 5  ;;  %v691_v54 = vrot.slane %v599_v15, 1  ;;  %v616_v55 = vrot.slane %v597_v13, 7 }
 0x9bc   :  { %v4226_v56 = vsel %vm611_vm10, %v878_v19, %v882_v48  ;;  %v4229_v57 = vsel %vm611_vm10, %v869_v49, %v873_v50  ;;  %v620_v58 = vrot.slane %v601_v18, 6  ;;  %v608_v59 = vrot.slane %v603_v2, 7 }
 0x9bd   :  { %v4232_v60 = vsel %vm611_vm10, %v696_v51, %v700_v53  ;;  %v4235_v61 = vsel %vm611_vm10, %v691_v54, %v603_v2  ;;  %v3312_v4 = vmul.f32 -1.442695, %v612_v36  ;;  %v3313_v5 = vmul.f32 -1.442695, %v625_v40  ;;  %762 = vmatpush1.bf16.msra.mxu0 %v4283_v31  ;;  %904 = vmatpush1.bf16.msra.mxu1 %v4283_v31  ;;  %v4309_v36 = vld [vmem:[%s5419_s1 + $0x54] ss:$8 sps:$4 sm:$0xff]  }
 0x9be   :  { %v4238_v62 = vsel %vm611_vm10, %v616_v55, %v620_v58  ;;  %v4241_v63 = vsel %vm611_vm10, %v599_v15, %v608_v59  ;;  %vm626_vm11 = vcmp.gt.s32.totalorder %v4248_v10, 0  ;;  %vm658_vm12 = vcmp.gt.s32.totalorder %v4248_v10, 7  ;;  %763 = vmatprep.subr.bf16.mxu0 %v4290_v32  ;;  %905 = vmatprep.subr.bf16.mxu1 %v4290_v32 }
 0x9bf   :  { %3714 = vpow2.f32 %v3312_v4  ;;  %v651_v18 = vsel %vm626_vm11, 1, %v3993_v1  ;;  %v683_v20 = vsel %vm658_vm12, 1, %v3993_v1  ;;  %vm802_vm15 = vcmp.gt.s32.totalorder %v4248_v10, 1 }
 0x9c0   :  { %3716 = vpow2.f32 %v3313_v5  ;;  %vm835_vm0 = vcmp.gt.s32.totalorder %v4248_v10, 6  ;;  %vm944_vm6 = vcmp.gt.s32.totalorder %v4248_v10, 2  ;;  %vm977_vm7 = vcmp.gt.s32.totalorder %v4248_v10, 5 }
 0x9c1   :  { %v3711_v0 = vpop.eup %3710  ;;  %764 = vmatpush1.bf16.msra.mxu0 %v4297_v33  ;;  %906 = vmatpush1.bf16.msra.mxu1 %v4297_v33  ;;  %vm1086_vm10 = vcmp.gt.s32.totalorder %v4248_v10, 3  ;;  %vm1119_vm11 = vcmp.gt.s32.totalorder %v4248_v10, 4 }
 0x9c2   :  { %v3713_v3 = vpop.eup %3712  ;;  %636 = vrot.lane.b32.xlu0 %v3711_v0, %s3997_s28  ;;  %765 = vmatprep.subr.bf16.mxu0 %v4309_v36 }
 0x9c3   :  { %668 = vrot.lane.b32.xlu1 %v3713_v3, %s3997_s28  ;;  %907 = vmatprep.subr.bf16.mxu1 %v4309_v36 }
 0x9c5   :  { %766 = vmatpush1.bf16.msra.mxu0 %v4314_v39  ;;  %908 = vmatpush1.bf16.msra.mxu1 %v4314_v39 }
 0x9c6   :  { %1043 = vmatprep.subr.bf16.mxu0 %v4265_v28  ;;  %1165 = vmatprep.subr.bf16.mxu1 %v4265_v28 }
 0x9c9   :  { %v3715_v6 = vpop.eup %3714 }
 0x9ca   :  { %v3717_v7 = vpop.eup %3716  ;;  %v630_v8 = vadd.f32 1.0, %v3715_v6 }
 0x9cb   :  { %v662_v9 = vadd.f32 1.0, %v3717_v7 }
 0x9cc   :  { %3718 = vrcp.f32 %v630_v8 }
 0x9cd   :  { %3720 = vrcp.f32 %v662_v9 }
 0x9d6   :  { %v3719_v11 = vpop.eup %3718 }
 0x9d7   :  { %v3721_v13 = vpop.eup %3720  ;;  %v634_v21 = vmul.f32 0.0, %v3719_v11 }
 0x9d8   :  { %v666_v25 = vmul.f32 0.0, %v3721_v13 }
 0xa34   :  { %v637_v12 = vpop.permute.xlu0 %636 }
 0xa35   :  { %v639_v14 = vmul.f32 %v3719_v11, %v637_v12  ;;  %v669_v15 = vpop.permute.xlu1 %668 }
 0xa36   :  { %v671_v16 = vmul.f32 %v3721_v13, %v669_v15 }
 0xa37   :  { %641 = vrot.lane.b32.xlu1 %v639_v14, %s3997_s28 }
 0xa38   :  { %673 = vrot.lane.b32.xlu0 %v671_v16, %s3997_s28 }
 0xa3b   :  { %653 = vperm.xlu1 %3545, %v651_v18  }
 0xa3c   :  { %685 = vperm.xlu0 %3544, %v683_v20   ;;  %v827_v20 = vsel %vm802_vm15, 1, %v3993_v1 }
 0xaa9   :  { %v642_v23 = vpop.permute.xlu1 %641 }
 0xaaa   :  { %v4256_v2 = vadd.f32 %v642_v23, %v634_v21  ;;  %v674_v26 = vpop.permute.xlu0 %673  ;;  %v860_v21 = vsel %vm835_vm0, 1, %v3993_v1  ;;  %vm1670_vm0 = vcmask 1041408  }
 0xaab   :  { %v4258_v27 = vadd.f32 %v674_v26, %v666_v25 }
 0xaac   :  { %3722 = vtanh.f32 %v4256_v2 }
 0xaad   :  { %3724 = vtanh.f32 %v4258_v27 }
 0xab6   :  { %v3723_v34 = vpop.eup %3722 }
 0xab7   :  { %v3725_v35 = vpop.eup %3724  ;;  %647 = vrot.lane.b32.xlu1 %v3723_v34, %s3997_s28 }
 0xab8   :  { %679 = vrot.lane.b32.xlu0 %v3725_v35, %s3997_s28 }
 0xaba   :  { %v4322_v40 = vpop.permute.xlu1 %653 }
 0xabb   :  { %v4324_v44 = vpop.permute.xlu0 %685  ;;  %vm655_vm13 = vcmp.eq.s32.totalorder %v4322_v40, 1  ;;  %v3688_v40 = vld [vmem:[%s5422_s4 + $0xc8] sm:$0xff]  }
 0xabc   :  { %vm687_vm14 = vcmp.eq.s32.totalorder %v4324_v44, 1  ;;  %v4370_v23 = vsel %vm655_vm13, %v4256_v2, 0.0 }
 0xabd   :  { %v4376_v26 = vsel %vm687_vm14, %v4258_v27, 0.0 }
 0xb29   :  { %v648_v45 = vpop.permute.xlu1 %647 }
 0xb2a   :  { %v650_v47 = vmul.f32 %v3719_v11, %v648_v45  ;;  %v680_v17 = vpop.permute.xlu0 %679 }
 0xb2b   :  { %v682_v19 = vmul.f32 %v3721_v13, %v680_v17 }
 0xb2c   :  { %v4330_v48 = vsel %vm655_vm13, %v650_v47, 0.0 }
 0xb2d   :  { %707 = vrot.lane.b32.xlu1 %v4330_v48, %s3998_s29  ;;  %v4336_v49 = vsel %vm687_vm14, %v682_v19, 0.0 }
 0xb2e   :  { %711 = vrot.lane.b32.xlu0 %v4336_v49, %s3996_s17 }
 0xb9f   :  { %v4340_v50 = vpop.permute.xlu1 %707 }
 0xba0   :  { %v4342_v51 = vpop.permute.xlu0 %711 }
 0xba1   :  { %v714_v53 = vsel %vm162_vm4, %v4340_v50, %v4342_v51 }
 0xba2   :  { %v715_v54 = vpack.c.bf16 %v714_v53, %v714_v53 }
 0xba4   :  { %3322 = vmatmul.mubr.msk.bf16.vlgmr.msra.gmra.mrb[12].mxu0 %vm74_vm3, %v715_v54 }
 0xba5   :  { %1044 = vmatpush1.bf16.msra.mxu0 %v4270_v29  ;;  %1075 = vmatprep.mubr.bf16.mxu0 %v3993_v1 }
 0xba6   :  { %1045 = vmatprep.subr.bf16.mxu0 %v4275_v24 }
 0xba9   :  { %1046 = vmatpush1.bf16.msra.mxu0 %v4283_v31 }
 0xbaa   :  { %1047 = vmatprep.subr.bf16.mxu0 %v4290_v32 }
 0xbad   :  { %1048 = vmatpush1.bf16.msra.mxu0 %v4297_v33 }
 0xbae   :  { %1049 = vmatprep.subr.bf16.mxu0 %v4309_v36 }
 0xbb1   :  { %1050 = vmatpush1.bf16.msra.mxu0 %v4314_v39 }
 0xbb2   :  { %1275 = vmatprep.subr.bf16.mxu0 %v4265_v28 }
 0xc77   :  { %v793_v55 = vpop.f32.mrb[12].mxu0 }
 0xc78   :  { %v800_v58 = vadd.f32 %v793_v55, %v4200_v30  ;;  %v795_v59 = vpop.f32.mrb[13].mxu0 }
 0xc79   :  { %v801_v0 = vadd.f32 %v795_v59, %v4211_v41  ;;  %v797_v3 = vpop.f32.mrb[14].mxu0 }
 0xc7a   :  { %3726 = vtanh.f32 %v800_v58  ;;  %v798_v4 = vpop.f32.mrb[15].mxu0  ;;  %v3323_v7 = vmul.f32 -1.442695, %v800_v58 }
 0xc7b   :  { %3728 = vtanh.f32 %v801_v0  ;;  %v3324_v8 = vmul.f32 -1.442695, %v801_v0 }
 0xc7c   :  { %3730 = vpow2.f32 %v3323_v7 }
 0xc7d   :  { %3732 = vpow2.f32 %v3324_v8 }
 0xc84   :  { %v3727_v5 = vpop.eup %3726 }
 0xc85   :  { %v3729_v6 = vpop.eup %3728  ;;  %812 = vrot.lane.b32.xlu1 %v3727_v5, %s3997_s28 }
 0xc86   :  { %845 = vrot.lane.b32.xlu0 %v3729_v6, %s3997_s28  ;;  %v3731_v9 = vpop.eup %3730 }
 0xc87   :  { %v3733_v11 = vpop.eup %3732  ;;  %v806_v30 = vadd.f32 1.0, %v3731_v9 }
 0xc88   :  { %v839_v12 = vadd.f32 1.0, %v3733_v11 }
 0xc89   :  { %3734 = vrcp.f32 %v806_v30 }
 0xc8a   :  { %3736 = vrcp.f32 %v839_v12 }
 0xc93   :  { %v3735_v41 = vpop.eup %3734 }
 0xc94   :  { %v3737_v14 = vpop.eup %3736  ;;  %v810_v25 = vmul.f32 %v3735_v41, %v4370_v23 }
 0xc95   :  { %v843_v35 = vmul.f32 %v3737_v14, %v4376_v26 }
 0xcf7   :  { %v813_v13 = vpop.permute.xlu1 %812 }
 0xcf8   :  { %v815_v15 = vmul.f32 %v3735_v41, %v813_v13  ;;  %v846_v16 = vpop.permute.xlu0 %845 }
 0xcf9   :  { %v848_v18 = vmul.f32 %v3737_v14, %v846_v16 }
 0xcfa   :  { %817 = vrot.lane.b32.xlu1 %v815_v15, %s3997_s28 }
 0xcfb   :  { %850 = vrot.lane.b32.xlu0 %v848_v18, %s3997_s28 }
 0xcfe   :  { %829 = vperm.xlu1 %3545, %v827_v20  }
 0xcff   :  { %862 = vperm.xlu0 %3544, %v860_v21  }
 0xd6c   :  { %v818_v34 = vpop.permute.xlu1 %817 }
 0xd6d   :  { %v4379_v45 = vadd.f32 %v818_v34, %v810_v25  ;;  %v851_v47 = vpop.permute.xlu0 %850 }
 0xd6e   :  { %v4381_v17 = vadd.f32 %v851_v47, %v843_v35  ;;  %v969_v47 = vsel %vm944_vm6, 1, %v3993_v1  ;;  %vm1672_vm6 = vcmask 1043456  }
 0xd6f   :  { %3738 = vtanh.f32 %v4379_v45 }
 0xd70   :  { %3740 = vtanh.f32 %v4381_v17 }
 0xd79   :  { %v3739_v2 = vpop.eup %3738 }
 0xd7a   :  { %v3741_v19 = vpop.eup %3740  ;;  %823 = vrot.lane.b32.xlu1 %v3739_v2, %s3997_s28  ;;  %v1002_v2 = vsel %vm977_vm7, 1, %v3993_v1  ;;  %vm1674_vm7 = vcmask 1045504  }
 0xd7b   :  { %856 = vrot.lane.b32.xlu0 %v3741_v19, %s3997_s28 }
 0xd7d   :  { %v4387_v27 = vpop.permute.xlu1 %829 }
 0xd7e   :  { %v4389_v53 = vpop.permute.xlu0 %862  ;;  %vm831_vm1 = vcmp.eq.s32.totalorder %v4387_v27, 1  ;;  %v3689_v27 = vld [vmem:[%s5422_s4 + $0x88] sm:$0xff]  }
 0xd7f   :  { %vm864_vm2 = vcmp.eq.s32.totalorder %v4389_v53, 1  ;;  %v4438_v19 = vsel %vm831_vm1, %v4379_v45, %v4370_v23  ;;  %v3690_v53 = vld [vmem:[%s5422_s4 + $0xd0] sm:$0xff]  }
 0xdec   :  { %v824_v54 = vpop.permute.xlu1 %823 }
 0xded   :  { %v4391_v55 = vmul.f32 %v3735_v41, %v824_v54  ;;  %v857_v58 = vpop.permute.xlu0 %856 }
 0xdee   :  { %v4394_v59 = vmul.f32 %v3737_v14, %v857_v58  ;;  %v4445_v58 = vsel %vm864_vm2, %v4381_v17, %v4376_v26 }
 0xdef   :  { %v4401_v0 = vsel %vm831_vm1, %v4391_v55, %v4330_v48 }
 0xdf0   :  { %889 = vrot.lane.b32.xlu1 %v4401_v0, %s3998_s29  ;;  %v4409_v3 = vsel %vm864_vm2, %v4394_v59, %v4336_v49 }
 0xdf1   :  { %893 = vrot.lane.b32.xlu0 %v4409_v3, %s3996_s17 }
 0xe62   :  { %v890_v4 = vpop.permute.xlu1 %889 }
 0xe63   :  { %v894_v5 = vpop.permute.xlu0 %893 }
 0xe64   :  { %v896_v6 = vsel %vm162_vm4, %v890_v4, %v894_v5 }
 0xe65   :  { %v897_v7 = vpack.c.bf16 %v896_v6, %v896_v6 }
 0xe67   :  { %3325 = vmatmul.mubr.msk.bf16.vlgmr.msra.gmra.mrb[12].mxu1 %vm74_vm3, %v897_v7 }
 0xe68   :  { %1166 = vmatpush1.bf16.msra.mxu1 %v4270_v29  ;;  %1197 = vmatprep.mubr.bf16.mxu1 %v3993_v1 }
 0xe69   :  { %1167 = vmatprep.subr.bf16.mxu1 %v4275_v24 }
 0xe6c   :  { %1168 = vmatpush1.bf16.msra.mxu1 %v4283_v31 }
 0xe6d   :  { %1169 = vmatprep.subr.bf16.mxu1 %v4290_v32 }
 0xe70   :  { %1170 = vmatpush1.bf16.msra.mxu1 %v4297_v33 }
 0xe71   :  { %1171 = vmatprep.subr.bf16.mxu1 %v4309_v36 }
 0xe74   :  { %1172 = vmatpush1.bf16.msra.mxu1 %v4314_v39 }
 0xe75   :  { %1385 = vmatprep.subr.bf16.mxu1 %v4265_v28 }
 0xf3a   :  { %v935_v48 = vpop.f32.mrb[12].mxu1 }
 0xf3b   :  { %v942_v49 = vadd.f32 %v935_v48, %v4204_v37  ;;  %v937_v8 = vpop.f32.mrb[13].mxu1 }
 0xf3c   :  { %v943_v9 = vadd.f32 %v937_v8, %v4214_v42  ;;  %v939_v11 = vpop.f32.mrb[14].mxu1 }
 0xf3d   :  { %3742 = vtanh.f32 %v942_v49  ;;  %v940_v30 = vpop.f32.mrb[15].mxu1  ;;  %v3326_v13 = vmul.f32 -1.442695, %v942_v49 }
 0xf3e   :  { %3744 = vtanh.f32 %v943_v9  ;;  %v3327_v14 = vmul.f32 -1.442695, %v943_v9 }
 0xf3f   :  { %3746 = vpow2.f32 %v3326_v13 }
 0xf40   :  { %3748 = vpow2.f32 %v3327_v14 }
 0xf47   :  { %v3743_v12 = vpop.eup %3742 }
 0xf48   :  { %v3745_v41 = vpop.eup %3744  ;;  %954 = vrot.lane.b32.xlu1 %v3743_v12, %s3997_s28 }
 0xf49   :  { %987 = vrot.lane.b32.xlu0 %v3745_v41, %s3997_s28  ;;  %v3747_v15 = vpop.eup %3746 }
 0xf4a   :  { %v3749_v16 = vpop.eup %3748  ;;  %v948_v37 = vadd.f32 1.0, %v3747_v15 }
 0xf4b   :  { %v981_v18 = vadd.f32 1.0, %v3749_v16 }
 0xf4c   :  { %3750 = vrcp.f32 %v948_v37 }
 0xf4d   :  { %3752 = vrcp.f32 %v981_v18 }
 0xf56   :  { %v3751_v42 = vpop.eup %3750 }
 0xf57   :  { %v3753_v21 = vpop.eup %3752  ;;  %v952_v54 = vmul.f32 %v3751_v42, %v4438_v19 }
 0xf58   :  { %v985_v5 = vmul.f32 %v3753_v21, %v4445_v58 }
 0xfba   :  { %v955_v20 = vpop.permute.xlu1 %954 }
 0xfbb   :  { %v957_v25 = vmul.f32 %v3751_v42, %v955_v20  ;;  %v988_v34 = vpop.permute.xlu0 %987 }
 0xfbc   :  { %v990_v35 = vmul.f32 %v3753_v21, %v988_v34 }
 0xfbd   :  { %959 = vrot.lane.b32.xlu1 %v957_v25, %s3997_s28 }
 0xfbe   :  { %992 = vrot.lane.b32.xlu0 %v990_v35, %s3997_s28 }
 0xfc1   :  { %971 = vperm.xlu1 %3545, %v969_v47  }
 0xfc2   :  { %1004 = vperm.xlu0 %3544, %v1002_v2  }
0x102f   :  { %v960_v4 = vpop.permute.xlu1 %959 }
0x1030   :  { %v4448_v6 = vadd.f32 %v960_v4, %v952_v54  ;;  %v993_v7 = vpop.permute.xlu0 %992 }
0x1031   :  { %v4450_v48 = vadd.f32 %v993_v7, %v985_v5 }
0x1032   :  { %3754 = vtanh.f32 %v4448_v6 }
0x1033   :  { %3756 = vtanh.f32 %v4450_v48 }
0x103c   :  { %v3755_v23 = vpop.eup %3754 }
0x103d   :  { %v3757_v45 = vpop.eup %3756  ;;  %965 = vrot.lane.b32.xlu1 %v3755_v23, %s3997_s28  ;;  %v1111_v23 = vsel %vm1086_vm10, 1, %v3993_v1 }
0x103e   :  { %998 = vrot.lane.b32.xlu0 %v3757_v45, %s3997_s28  ;;  %v1144_v45 = vsel %vm1119_vm11, 1, %v3993_v1 }
0x1040   :  { %v4456_v26 = vpop.permute.xlu1 %971 }
0x1041   :  { %v4458_v17 = vpop.permute.xlu0 %1004  ;;  %vm973_vm8 = vcmp.eq.s32.totalorder %v4456_v26, 1 }
0x1042   :  { %vm1006_vm9 = vcmp.eq.s32.totalorder %v4458_v17, 1 }
0x1043   :  { %v4514_v10 = vsel %vm1006_vm9, %v4450_v48, %v4445_v58 }
0x10af   :  { %v966_v49 = vpop.permute.xlu1 %965 }
0x10b0   :  { %v4460_v8 = vmul.f32 %v3751_v42, %v966_v49  ;;  %v999_v9 = vpop.permute.xlu0 %998  ;;  %v4507_v49 = vsel %vm973_vm8, %v4448_v6, %v4438_v19 }
0x10b1   :  { %v4463_v11 = vmul.f32 %v3753_v21, %v999_v9 }
0x10b2   :  { %v4470_v30 = vsel %vm973_vm8, %v4460_v8, %v4401_v0 }
0x10b3   :  { %1031 = vrot.lane.b32.xlu1 %v4470_v30, %s3998_s29  ;;  %v4478_v12 = vsel %vm1006_vm9, %v4463_v11, %v4409_v3 }
0x10b4   :  { %1035 = vrot.lane.b32.xlu0 %v4478_v12, %s3996_s17 }
0x1125   :  { %v1032_v41 = vpop.permute.xlu1 %1031 }
0x1126   :  { %v1036_v13 = vpop.permute.xlu0 %1035 }
0x1127   :  { %v1038_v14 = vsel %vm162_vm4, %v1032_v41, %v1036_v13 }
0x1128   :  { %v1039_v15 = vpack.c.bf16 %v1038_v14, %v1038_v14 }
0x112a   :  { %3328 = vmatmul.mubr.msk.bf16.vlgmr.msra.gmra.mrb[16].mxu0 %vm74_vm3, %v1039_v15 }
0x112b   :  { %1276 = vmatpush1.bf16.msra.mxu0 %v4270_v29  ;;  %1307 = vmatprep.mubr.bf16.mxu0 %v3993_v1 }
0x112c   :  { %1277 = vmatprep.subr.bf16.mxu0 %v4275_v24 }
0x112f   :  { %1278 = vmatpush1.bf16.msra.mxu0 %v4283_v31 }
0x1130   :  { %1279 = vmatprep.subr.bf16.mxu0 %v4290_v32 }
0x1133   :  { %1280 = vmatpush1.bf16.msra.mxu0 %v4297_v33 }
0x1134   :  { %1281 = vmatprep.subr.bf16.mxu0 %v4309_v36 }
0x1137   :  { %1282 = vmatpush1.bf16.msra.mxu0 %v4314_v39 }
0x1138   :  { %1495 = vmatprep.subr.bf16.mxu0 %v4265_v28 }
0x11fd   :  { %v1077_v0 = vpop.f32.mrb[16].mxu0 }
0x11fe   :  { %v1084_v3 = vadd.f32 %v1077_v0, %v4207_v38  ;;  %v1079_v16 = vpop.f32.mrb[17].mxu0 }
0x11ff   :  { %v1085_v37 = vadd.f32 %v1079_v16, %v4217_v43  ;;  %v1081_v18 = vpop.f32.mrb[18].mxu0 }
0x1200   :  { %3758 = vtanh.f32 %v1084_v3  ;;  %v1082_v42 = vpop.f32.mrb[19].mxu0  ;;  %v3329_v25 = vmul.f32 -1.442695, %v1084_v3 }
0x1201   :  { %3760 = vtanh.f32 %v1085_v37  ;;  %v3330_v34 = vmul.f32 -1.442695, %v1085_v37 }
0x1202   :  { %3762 = vpow2.f32 %v3329_v25 }
0x1203   :  { %3764 = vpow2.f32 %v3330_v34 }
0x120a   :  { %v3759_v20 = vpop.eup %3758 }
0x120b   :  { %v3761_v21 = vpop.eup %3760  ;;  %1096 = vrot.lane.b32.xlu1 %v3759_v20, %s3997_s28 }
0x120c   :  { %1129 = vrot.lane.b32.xlu0 %v3761_v21, %s3997_s28  ;;  %v3763_v28 = vpop.eup %3762 }
0x120d   :  { %v3765_v35 = vpop.eup %3764  ;;  %v1090_v38 = vadd.f32 1.0, %v3763_v28 }
0x120e   :  { %v1123_v47 = vadd.f32 1.0, %v3765_v35 }
0x120f   :  { %3766 = vrcp.f32 %v1090_v38 }
0x1210   :  { %3768 = vrcp.f32 %v1123_v47 }
0x1219   :  { %v3767_v43 = vpop.eup %3766 }
0x121a   :  { %v3769_v54 = vpop.eup %3768  ;;  %v1094_v9 = vmul.f32 %v3767_v43, %v4507_v49 }
0x121b   :  { %v1127_v13 = vmul.f32 %v3769_v54, %v4514_v10 }
0x127d   :  { %v1097_v2 = vpop.permute.xlu1 %1096 }
0x127e   :  { %v1099_v4 = vmul.f32 %v3767_v43, %v1097_v2  ;;  %v1130_v5 = vpop.permute.xlu0 %1129 }
0x127f   :  { %v1132_v7 = vmul.f32 %v3769_v54, %v1130_v5 }
0x1280   :  { %1101 = vrot.lane.b32.xlu1 %v1099_v4, %s3997_s28 }
0x1281   :  { %1134 = vrot.lane.b32.xlu0 %v1132_v7, %s3997_s28 }
0x1284   :  { %1113 = vperm.xlu1 %3545, %v1111_v23  }
0x1285   :  { %1146 = vperm.xlu0 %3544, %v1144_v45  }
0x12f2   :  { %v1102_v41 = vpop.permute.xlu1 %1101 }
0x12f3   :  { %v4517_v14 = vadd.f32 %v1102_v41, %v1094_v9  ;;  %v1135_v15 = vpop.permute.xlu0 %1134 }
0x12f4   :  { %v4519_v0 = vadd.f32 %v1135_v15, %v1127_v13 }
0x12f5   :  { %3770 = vtanh.f32 %v4517_v14 }
0x12f6   :  { %3772 = vtanh.f32 %v4519_v0 }
0x12ff   :  { %v3771_v19 = vpop.eup %3770 }
0x1300   :  { %v3773_v6 = vpop.eup %3772  ;;  %1107 = vrot.lane.b32.xlu1 %v3771_v19, %s3997_s28 }
0x1301   :  { %1140 = vrot.lane.b32.xlu0 %v3773_v6, %s3997_s28 }
0x1303   :  { %v4525_v58 = vpop.permute.xlu1 %1113 }
0x1304   :  { %v4527_v48 = vpop.permute.xlu0 %1146  ;;  %vm1115_vm12 = vcmp.eq.s32.totalorder %v4525_v58, 1 }
0x1305   :  { %vm1148_vm15 = vcmp.eq.s32.totalorder %v4527_v48, 1  ;;  %v4571_v6 = vsel %vm1115_vm12, %v4517_v14, %v4507_v49 }
0x1372   :  { %v1108_v3 = vpop.permute.xlu1 %1107 }
0x1373   :  { %v4529_v16 = vmul.f32 %v3767_v43, %v1108_v3  ;;  %v1141_v37 = vpop.permute.xlu0 %1140 }
0x1374   :  { %v4532_v18 = vmul.f32 %v3769_v54, %v1141_v37  ;;  %v4578_v37 = vsel %vm1148_vm15, %v4519_v0, %v4514_v10 }
0x1375   :  { %v4539_v42 = vsel %vm1115_vm12, %v4529_v16, %v4470_v30 }
0x1376   :  { %1153 = vrot.lane.b32.xlu1 %v4539_v42, %s3998_s29  ;;  %v4547_v20 = vsel %vm1148_vm15, %v4532_v18, %v4478_v12 }
0x1377   :  { %1157 = vrot.lane.b32.xlu0 %v4547_v20, %s3996_s17 }
0x13e8   :  { %v1154_v21 = vpop.permute.xlu1 %1153 }
0x13e9   :  { %v1158_v25 = vpop.permute.xlu0 %1157 }
0x13ea   :  { %v1160_v34 = vsel %vm162_vm4, %v1154_v21, %v1158_v25 }
0x13eb   :  { %v1161_v28 = vpack.c.bf16 %v1160_v34, %v1160_v34 }
0x13ed   :  { %3331 = vmatmul.mubr.msk.bf16.vlgmr.msra.gmra.mrb[16].mxu1 %vm74_vm3, %v1161_v28 }
0x13ee   :  { %1386 = vmatpush1.bf16.msra.mxu1 %v4270_v29  ;;  %1417 = vmatprep.mubr.bf16.mxu1 %v3993_v1 }
0x13ef   :  { %1387 = vmatprep.subr.bf16.mxu1 %v4275_v24 }
0x13f2   :  { %1388 = vmatpush1.bf16.msra.mxu1 %v4283_v31 }
0x13f3   :  { %1389 = vmatprep.subr.bf16.mxu1 %v4290_v32 }
0x13f6   :  { %1390 = vmatpush1.bf16.msra.mxu1 %v4297_v33 }
0x13f7   :  { %1391 = vmatprep.subr.bf16.mxu1 %v4309_v36 }
0x13fa   :  { %1392 = vmatpush1.bf16.msra.mxu1 %v4314_v39 }
0x14c0   :  { %v1199_v30 = vpop.f32.mrb[16].mxu1 }
0x14c1   :  { %v1206_v12 = vadd.f32 %v1199_v30, %v4220_v46  ;;  %v1201_v35 = vpop.f32.mrb[17].mxu1 }
0x14c2   :  { %v1207_v38 = vadd.f32 %v1201_v35, %v4223_v52  ;;  %v1203_v47 = vpop.f32.mrb[18].mxu1 }
0x14c3   :  { %3774 = vtanh.f32 %v1206_v12  ;;  %v1204_v43 = vpop.f32.mrb[19].mxu1  ;;  %v3332_v4 = vmul.f32 -1.442695, %v1206_v12 }
0x14c4   :  { %3776 = vtanh.f32 %v1207_v38  ;;  %v3333_v5 = vmul.f32 -1.442695, %v1207_v38  ;;  %v4594_v38 = vsel %vm1115_vm12, %v4529_v16, 0.0 }
0x14c5   :  { %3778 = vpow2.f32 %v3332_v4 }
0x14c6   :  { %3780 = vpow2.f32 %v3333_v5 }
0x14cd   :  { %v3775_v2 = vpop.eup %3774 }
0x14ce   :  { %v3777_v54 = vpop.eup %3776  ;;  %1217 = vrot.lane.b32.xlu1 %v3775_v2, %s3997_s28 }
0x14cf   :  { %1244 = vrot.lane.b32.xlu0 %v3777_v54, %s3997_s28  ;;  %v3779_v7 = vpop.eup %3778 }
0x14d0   :  { %v3781_v23 = vpop.eup %3780  ;;  %v1211_v46 = vadd.f32 1.0, %v3779_v7 }
0x14d1   :  { %v1238_v45 = vadd.f32 1.0, %v3781_v23 }
0x14d2   :  { %3782 = vrcp.f32 %v1211_v46 }
0x14d3   :  { %3784 = vrcp.f32 %v1238_v45 }
0x14dc   :  { %v3783_v52 = vpop.eup %3782 }
0x14dd   :  { %v3785_v41 = vpop.eup %3784  ;;  %v1215_v3 = vmul.f32 %v3783_v52, %v4571_v6 }
0x14de   :  { %v1242_v25 = vmul.f32 %v3785_v41, %v4578_v37 }
0x1540   :  { %v1218_v9 = vpop.permute.xlu1 %1217 }
0x1541   :  { %v1220_v13 = vmul.f32 %v3783_v52, %v1218_v9  ;;  %v1245_v15 = vpop.permute.xlu0 %1244 }
0x1542   :  { %v1247_v19 = vmul.f32 %v3785_v41, %v1245_v15 }
0x1543   :  { %1222 = vrot.lane.b32.xlu1 %v1220_v13, %s3997_s28 }
0x1544   :  { %1249 = vrot.lane.b32.xlu0 %v1247_v19, %s3997_s28 }
0x15b5   :  { %v1223_v21 = vpop.permute.xlu1 %1222 }
0x15b6   :  { %v4581_v34 = vadd.f32 %v1223_v21, %v1215_v3  ;;  %v1250_v28 = vpop.permute.xlu0 %1249 }
0x15b7   :  { %v4583_v30 = vadd.f32 %v1250_v28, %v1242_v25 }
0x15b8   :  { %3786 = vtanh.f32 %v4581_v34  ;;  %v4637_v3 = vsel %vm1148_vm15, %v4581_v34, %v4571_v6 }
0x15b9   :  { %3788 = vtanh.f32 %v4583_v30  ;;  %v4644_v25 = vsel %vm1115_vm12, %v4583_v30, %v4578_v37  ;;  %v4652_v37 = vsel %vm831_vm1, %v4391_v55, 0.0 }
0x15c2   :  { %v3787_v49 = vpop.eup %3786 }
0x15c3   :  { %v3789_v14 = vpop.eup %3788  ;;  %1228 = vrot.lane.b32.xlu1 %v3787_v49, %s3997_s28 }
0x15c4   :  { %1255 = vrot.lane.b32.xlu0 %v3789_v14, %s3997_s28 }
0x1635   :  { %v1229_v10 = vpop.permute.xlu1 %1228 }
0x1636   :  { %v1231_v0 = vmul.f32 %v3783_v52, %v1229_v10  ;;  %v1256_v12 = vpop.permute.xlu0 %1255 }
0x1637   :  { %v4589_v35 = vmul.f32 %v3785_v41, %v1256_v12 }
0x1638   :  { %v4598_v47 = vsel %vm1148_vm15, %v1231_v0, 0.0  ;;  %v4603_v43 = vsel %vm1148_vm15, %v1231_v0, %v4539_v42 }
0x1639   :  { %1263 = vrot.lane.b32.xlu1 %v4603_v43, %s3998_s29  ;;  %v4611_v2 = vsel %vm1115_vm12, %v4589_v35, %v4547_v20  ;;  %v3566_v16 = vpack.i.bf16 %v4598_v47, %v4594_v38 }
0x163a   :  { %1267 = vrot.lane.b32.xlu0 %v4611_v2, %s3996_s17 }
0x16ab   :  { %v1264_v54 = vpop.permute.xlu1 %1263 }
0x16ac   :  { %v1268_v4 = vpop.permute.xlu0 %1267 }
0x16ad   :  { %v1270_v42 = vsel %vm162_vm4, %v1264_v54, %v1268_v4 }
0x16ae   :  { %v1271_v5 = vpack.c.bf16 %v1270_v42, %v1270_v42 }
0x16b0   :  { %3334 = vmatmul.mubr.msk.bf16.vlgmr.msra.gmra.mrb[20].mxu0 %vm74_vm3, %v1271_v5 }
0x16b1   :  { %1496 = vmatpush1.bf16.msra.mxu0 %v4270_v29  ;;  %1527 = vmatprep.mubr.bf16.mxu0 %v3993_v1 }
0x16b2   :  { %1497 = vmatprep.subr.bf16.mxu0 %v4275_v24 }
0x16b5   :  { %1498 = vmatpush1.bf16.msra.mxu0 %v4283_v31 }
0x16b6   :  { %1499 = vmatprep.subr.bf16.mxu0 %v4290_v32 }
0x16b9   :  { %1500 = vmatpush1.bf16.msra.mxu0 %v4297_v33 }
0x16ba   :  { %1501 = vmatprep.subr.bf16.mxu0 %v4309_v36 }
0x16bd   :  { %1502 = vmatpush1.bf16.msra.mxu0 %v4314_v39 }
0x1783   :  { %v1309_v20 = vpop.f32.mrb[20].mxu0 }
0x1784   :  { %v1316_v7 = vadd.f32 %v1309_v20, %v4226_v56  ;;  %v1311_v23 = vpop.f32.mrb[21].mxu0  ;;  %v4666_v20 = vsel %vm864_vm2, %v4394_v59, 0.0 }
0x1785   :  { %v1317_v29 = vadd.f32 %v1311_v23, %v4229_v57  ;;  %v1313_v46 = vpop.f32.mrb[22].mxu0 }
0x1786   :  { %3790 = vtanh.f32 %v1316_v7  ;;  %v1314_v45 = vpop.f32.mrb[23].mxu0  ;;  %v3335_v32 = vmul.f32 -1.442695, %v1316_v7 }
0x1787   :  { %3792 = vtanh.f32 %v1317_v29  ;;  %v3336_v33 = vmul.f32 -1.442695, %v1317_v29 }
0x1788   :  { %3794 = vpow2.f32 %v3335_v32 }
0x1789   :  { %3796 = vpow2.f32 %v3336_v33 }
0x1790   :  { %v3791_v24 = vpop.eup %3790 }
0x1791   :  { %v3793_v31 = vpop.eup %3792  ;;  %1327 = vrot.lane.b32.xlu1 %v3791_v24, %s3997_s28 }
0x1792   :  { %1354 = vrot.lane.b32.xlu0 %v3793_v31, %s3997_s28  ;;  %v3795_v36 = vpop.eup %3794 }
0x1793   :  { %v3797_v39 = vpop.eup %3796  ;;  %v1321_v56 = vadd.f32 1.0, %v3795_v36 }
0x1794   :  { %v1348_v52 = vadd.f32 1.0, %v3797_v39 }
0x1795   :  { %3798 = vrcp.f32 %v1321_v56 }
0x1796   :  { %3800 = vrcp.f32 %v1348_v52 }
0x179f   :  { %v3799_v57 = vpop.eup %3798 }
0x17a0   :  { %v3801_v41 = vpop.eup %3800  ;;  %v1325_v21 = vmul.f32 %v3799_v57, %v4637_v3 }
0x17a1   :  { %v1352_v49 = vmul.f32 %v3801_v41, %v4644_v25 }
0x1803   :  { %v1328_v9 = vpop.permute.xlu1 %1327 }
0x1804   :  { %v1330_v13 = vmul.f32 %v3799_v57, %v1328_v9  ;;  %v1355_v15 = vpop.permute.xlu0 %1354 }
0x1805   :  { %v1357_v19 = vmul.f32 %v3801_v41, %v1355_v15 }
0x1806   :  { %1332 = vrot.lane.b32.xlu1 %v1330_v13, %s3997_s28 }
0x1807   :  { %1359 = vrot.lane.b32.xlu0 %v1357_v19, %s3997_s28 }
0x1878   :  { %v1333_v28 = vpop.permute.xlu1 %1332 }
0x1879   :  { %v1335_v14 = vadd.f32 %v1333_v28, %v1325_v21  ;;  %v1360_v10 = vpop.permute.xlu0 %1359 }
0x187a   :  { %v1362_v0 = vadd.f32 %v1360_v10, %v1352_v49 }
0x187b   :  { %3802 = vtanh.f32 %v1335_v14  ;;  %v4697_v10 = vsel %vm1006_vm9, %v1335_v14, %v4637_v3 }
0x187c   :  { %3804 = vtanh.f32 %v1362_v0 }
0x1885   :  { %v3803_v12 = vpop.eup %3802 }
0x1886   :  { %v3805_v54 = vpop.eup %3804  ;;  %1338 = vrot.lane.b32.xlu1 %v3803_v12, %s3997_s28 }
0x1887   :  { %1365 = vrot.lane.b32.xlu0 %v3805_v54, %s3997_s28  ;;  %v4703_v54 = vsel %vm973_vm8, %v1362_v0, %v4644_v25  ;;  %v4711_v25 = vsel %vm973_vm8, %v4460_v8, 0.0 }
0x18f8   :  { %v1339_v6 = vpop.permute.xlu1 %1338 }
0x18f9   :  { %v1341_v34 = vmul.f32 %v3799_v57, %v1339_v6  ;;  %v1366_v4 = vpop.permute.xlu0 %1365 }
0x18fa   :  { %v1368_v42 = vmul.f32 %v3801_v41, %v1366_v4 }
0x18fb   :  { %v4656_v30 = vsel %vm1006_vm9, %v1341_v34, 0.0  ;;  %v4661_v5 = vsel %vm1006_vm9, %v1341_v34, %v4603_v43 }
0x18fc   :  { %v4670_v7 = vsel %vm973_vm8, %v1368_v42, 0.0  ;;  %1373 = vrot.lane.b32.xlu1 %v4661_v5, %s3998_s29  ;;  %v4677_v55 = vsel %vm973_vm8, %v1368_v42, %v4611_v2  ;;  %v3546_v43 = vpack.i.bf16 %v4656_v30, %v4652_v37  ;;  %v3651_v37 = vld [vmem:[%s5419_s1 + $0x74] ss:$8 sps:$4 sm:$0xff]   ;;  %v3652_v30 = vld [vmem:[%s5419_s1 + $0x80] ss:$8 sps:$4 sm:$0xff]  }
0x18fd   :  { %1377 = vrot.lane.b32.xlu0 %v4677_v55, %s3996_s17  ;;  %v3561_v59 = vpack.i.bf16 %v4666_v20, %v4670_v7  ;;  %v3654_v20 = vld [vmem:[%s5419_s1 + $0x84] ss:$8 sps:$4 sm:$0xff]  }
0x196e   :  { %v1374_v23 = vpop.permute.xlu1 %1373 }
0x196f   :  { %v1378_v29 = vpop.permute.xlu0 %1377 }
0x1970   :  { %v1380_v46 = vsel %vm162_vm4, %v1374_v23, %v1378_v29 }
0x1971   :  { %v1381_v45 = vpack.c.bf16 %v1380_v46, %v1380_v46 }
0x1973   :  { %3337 = vmatmul.mubr.msk.bf16.vlgmr.msra.gmra.mrb[20].mxu1 %vm74_vm3, %v1381_v45 }
0x1974   :  { %1779 = vmatprep.mubr.bf16.mxu1 %v3993_v1 }
0x1a46   :  { %v1419_v2 = vpop.f32.mrb[20].mxu1 }
0x1a47   :  { %v1426_v24 = vadd.f32 %v1419_v2, %v4232_v60  ;;  %v1421_v31 = vpop.f32.mrb[21].mxu1 }
0x1a48   :  { %v1427_v32 = vadd.f32 %v1421_v31, %v4235_v61  ;;  %v1423_v33 = vpop.f32.mrb[22].mxu1  ;;  %v1009_v31 = vsel %vm1006_vm9, %v4463_v11, 0.0 }
0x1a49   :  { %3806 = vtanh.f32 %v1426_v24  ;;  %v1424_v36 = vpop.f32.mrb[23].mxu1  ;;  %v3338_v52 = vmul.f32 -1.442695, %v1426_v24 }
0x1a4a   :  { %3808 = vtanh.f32 %v1427_v32  ;;  %v3339_v57 = vmul.f32 -1.442695, %v1427_v32 }
0x1a4b   :  { %3810 = vpow2.f32 %v3338_v52 }
0x1a4c   :  { %3812 = vpow2.f32 %v3339_v57 }
0x1a53   :  { %v3807_v39 = vpop.eup %3806 }
0x1a54   :  { %v3809_v56 = vpop.eup %3808  ;;  %1437 = vrot.lane.b32.xlu1 %v3807_v39, %s3997_s28 }
0x1a55   :  { %1464 = vrot.lane.b32.xlu0 %v3809_v56, %s3997_s28  ;;  %v3811_v9 = vpop.eup %3810 }
0x1a56   :  { %v3813_v41 = vpop.eup %3812  ;;  %v1431_v60 = vadd.f32 1.0, %v3811_v9 }
0x1a57   :  { %v1458_v13 = vadd.f32 1.0, %v3813_v41 }
0x1a58   :  { %3814 = vrcp.f32 %v1431_v60 }
0x1a59   :  { %3816 = vrcp.f32 %v1458_v13 }
0x1a62   :  { %v3815_v61 = vpop.eup %3814 }
0x1a63   :  { %v3817_v19 = vpop.eup %3816  ;;  %v1435_v12 = vmul.f32 %v3815_v61, %v4697_v10 }
0x1a64   :  { %v1462_v34 = vmul.f32 %v3817_v19, %v4703_v54 }
0x1ac6   :  { %v1438_v15 = vpop.permute.xlu1 %1437 }
0x1ac7   :  { %v1440_v21 = vmul.f32 %v3815_v61, %v1438_v15  ;;  %v1465_v28 = vpop.permute.xlu0 %1464 }
0x1ac8   :  { %v1467_v49 = vmul.f32 %v3817_v19, %v1465_v28 }
0x1ac9   :  { %1442 = vrot.lane.b32.xlu1 %v1440_v21, %s3997_s28 }
0x1aca   :  { %1469 = vrot.lane.b32.xlu0 %v1467_v49, %s3997_s28 }
0x1b3b   :  { %v1443_v6 = vpop.permute.xlu1 %1442 }
0x1b3c   :  { %v1445_v4 = vadd.f32 %v1443_v6, %v1435_v12  ;;  %v1470_v42 = vpop.permute.xlu0 %1469 }
0x1b3d   :  { %v1472_v23 = vadd.f32 %v1470_v42, %v1462_v34 }
0x1b3e   :  { %3818 = vtanh.f32 %v1445_v4 }
0x1b3f   :  { %3820 = vtanh.f32 %v1472_v23 }
0x1b48   :  { %v3819_v29 = vpop.eup %3818 }
0x1b49   :  { %v3821_v46 = vpop.eup %3820  ;;  %1448 = vrot.lane.b32.xlu1 %v3819_v29, %s3997_s28 }
0x1b4a   :  { %1475 = vrot.lane.b32.xlu0 %v3821_v46, %s3997_s28  ;;  %v1452_v46 = vsel %vm864_vm2, %v1445_v4, %v4697_v10  ;;  %v3646_v10 = vld [vmem:[%s5419_s1 + $0x60] ss:$8 sps:$4 sm:$0xff]   ;;  %v3648_v4 = vld [vmem:[%s5419_s1 + $0x64] ss:$8 sps:$4 sm:$0xff]  }
0x1b4b   :  { %1747 = vmatprep.subr.bf16.mxu1 %v3648_v4 }
0x1b4c   :  { %1748 = vmatpush1.bf16.msra.mxu1 %v3646_v10 }
0x1b4d   :  { %1749 = vmatprep.subr.bf16.mxu1 %v3651_v37 }
0x1bbb   :  { %v1449_v3 = vpop.permute.xlu1 %1448 }
0x1bbc   :  { %v1451_v14 = vmul.f32 %v3815_v61, %v1449_v3  ;;  %v1476_v45 = vpop.permute.xlu0 %1475 }
0x1bbd   :  { %v1478_v2 = vmul.f32 %v3817_v19, %v1476_v45 }
0x1bbe   :  { %v4715_v0 = vsel %vm864_vm2, %v1451_v14, 0.0  ;;  %v1453_v24 = vsel %vm864_vm2, %v1451_v14, %v4661_v5  ;;  %v1479_v14 = vsel %vm831_vm1, %v1472_v23, %v4703_v54  ;;  %v3649_v54 = vld [vmem:[%s5419_s1 + $0x70] ss:$8 sps:$4 sm:$0xff]  }
0x1bbf   :  { %v1481_v32 = vsel %vm831_vm1, %v1478_v2, 0.0  ;;  %1483 = vrot.lane.b32.xlu1 %v1453_v24, %s3998_s29  ;;  %v1480_v8 = vsel %vm831_vm1, %v1478_v2, %v4677_v55  ;;  %v3556_v33 = vpack.i.bf16 %v4715_v0, %v4711_v25  ;;  %1750 = vmatpush1.bf16.msra.mxu1 %v3649_v54 }
0x1bc0   :  { %1487 = vrot.lane.b32.xlu0 %v1480_v8, %s3996_s17  ;;  %v3551_v36 = vpack.i.bf16 %v1009_v31, %v1481_v32  ;;  %1751 = vmatprep.subr.bf16.mxu1 %v3654_v20  ;;  %v1261_v8 = vsel %vm1115_vm12, %v4589_v35, 0.0  ;;  %v3966_v20 = vld [vmem:[%s5421_s3] sm:$0xff] }
0x1bc3   :  { %1752 = vmatpush1.bf16.msra.mxu1 %v3652_v30 }
0x1c31   :  { %v1484_v5 = vpop.permute.xlu1 %1483 }
0x1c32   :  { %v1488_v39 = vpop.permute.xlu0 %1487 }
0x1c33   :  { %v1490_v56 = vsel %vm162_vm4, %v1484_v5, %v1488_v39  ;;  %v1151_v5 = vsel %vm1148_vm15, %v4532_v18, 0.0 }
0x1c34   :  { %v1491_v11 = vpack.c.bf16 %v1490_v56, %v1490_v56 }
0x1c36   :  { %3340 = vmatmul.mubr.msk.bf16.vlgmr.msra.gmra.mrb[24].mxu0 %vm74_vm3, %v1491_v11 }
0x1c37   :  { %1937 = vmatprep.mubr.bf16.mxu0 %v3993_v1 }
0x1d09   :  { %v1529_v52 = vpop.f32.mrb[24].mxu0 }
0x1d0a   :  { %v1536_v57 = vadd.f32 %v1529_v52, %v4238_v62  ;;  %v1531_v9 = vpop.f32.mrb[25].mxu0 }
0x1d0b   :  { %v1537_v55 = vadd.f32 %v1531_v9, %v4241_v63  ;;  %v1533_v41 = vpop.f32.mrb[26].mxu0 }
0x1d0c   :  { %3822 = vtanh.f32 %v1536_v57  ;;  %v1534_v60 = vpop.f32.mrb[27].mxu0  ;;  %v3341_v15 = vmul.f32 -1.442695, %v1536_v57 }
0x1d0d   :  { %3824 = vtanh.f32 %v1537_v55  ;;  %v3342_v19 = vmul.f32 -1.442695, %v1537_v55 }
0x1d0e   :  { %3826 = vpow2.f32 %v3341_v15 }
0x1d0f   :  { %3828 = vpow2.f32 %v3342_v19 }
0x1d16   :  { %v3823_v13 = vpop.eup %3822 }
0x1d17   :  { %v3825_v61 = vpop.eup %3824  ;;  %1547 = vrot.lane.b32.xlu1 %v3823_v13, %s3997_s28 }
0x1d18   :  { %1572 = vrot.lane.b32.xlu0 %v3825_v61, %s3997_s28  ;;  %v3827_v21 = vpop.eup %3826 }
0x1d19   :  { %v3829_v28 = vpop.eup %3828  ;;  %v1541_v62 = vadd.f32 1.0, %v3827_v21 }
0x1d1a   :  { %v1566_v49 = vadd.f32 1.0, %v3829_v28 }
0x1d1b   :  { %3830 = vrcp.f32 %v1541_v62 }
0x1d1c   :  { %3832 = vrcp.f32 %v1566_v49 }
0x1d25   :  { %v3831_v63 = vpop.eup %3830 }
0x1d26   :  { %v3833_v6 = vpop.eup %3832  ;;  %v1545_v3 = vmul.f32 %v3831_v63, %v1452_v46 }
0x1d27   :  { %v1570_v2 = vmul.f32 %v3833_v6, %v1479_v14 }
0x1d89   :  { %v1548_v12 = vpop.permute.xlu1 %1547 }
0x1d8a   :  { %v1550_v34 = vmul.f32 %v3831_v63, %v1548_v12  ;;  %v1573_v42 = vpop.permute.xlu0 %1572 }
0x1d8b   :  { %v1575_v29 = vmul.f32 %v3833_v6, %v1573_v42 }
0x1d8c   :  { %1552 = vrot.lane.b32.xlu1 %v1550_v34, %s3997_s28 }
0x1d8d   :  { %1577 = vrot.lane.b32.xlu0 %v1575_v29, %s3997_s28 }
0x1dfe   :  { %v1553_v45 = vpop.permute.xlu1 %1552 }
0x1dff   :  { %v1555_v25 = vadd.f32 %v1553_v45, %v1545_v3  ;;  %v1578_v0 = vpop.permute.xlu0 %1577 }
0x1e00   :  { %v1580_v24 = vadd.f32 %v1578_v0, %v1570_v2 }
0x1e01   :  { %3834 = vtanh.f32 %v1555_v25 }
0x1e02   :  { %3836 = vtanh.f32 %v1580_v24 }
0x1e0b   :  { %v3835_v31 = vpop.eup %3834 }
0x1e0c   :  { %v3837_v32 = vpop.eup %3836  ;;  %1558 = vrot.lane.b32.xlu1 %v3835_v31, %s3997_s28 }
0x1e0d   :  { %1583 = vrot.lane.b32.xlu0 %v3837_v32, %s3997_s28 }
0x1e10   :  { %3547 = vrot.lane.b32.xlu1 %v3546_v43, %s3998_s29  ;;  %v3655_v43 = vld [vmem:[%s5419_s1 + $0x90] ss:$8 sps:$4 sm:$0xff]  }
0x1e11   :  { %3552 = vrot.lane.b32.xlu0 %v3551_v36, %s3996_s17 }
0x1e14   :  { %3557 = vrot.lane.b32.xlu1 %v3556_v33, %s3998_s29 }
0x1e15   :  { %3562 = vrot.lane.b32.xlu0 %v3561_v59, %s3996_s17  ;;  %v3657_v59 = vld [vmem:[%s5419_s1 + $0x94] ss:$8 sps:$4 sm:$0xff]  }
0x1e16   :  { %1753 = vmatprep.subr.bf16.mxu1 %v3657_v59 }
0x1e17   :  { %1754 = vmatpush1.bf16.msra.mxu1 %v3655_v43 }
0x1e19   :  { %3567 = vrot.lane.b32.xlu0 %v3566_v16, %s3998_s29 }
0x1e7e   :  { %v1559_v38 = vpop.permute.xlu1 %1558 }
0x1e7f   :  { %v1561_v47 = vmul.f32 %v3831_v63, %v1559_v38  ;;  %v1584_v16 = vpop.permute.xlu0 %1583 }
0x1e80   :  { %v1586_v7 = vmul.f32 %v3833_v6, %v1584_v16 }
0x1e81   :  { %v1562_v23 = vsel %vm687_vm14, %v1561_v47, 0.0  ;;  %v3967_v47 = vld [vmem:[%s5421_s3 + $0x8] sm:$0xff] }
0x1e82   :  { %v1587_v33 = vsel %vm655_vm13, %v1586_v7, 0.0  ;;  %1648 = vrot.lane.b32.xlu0 %v1562_v23, %s3998_s29  ;;  %v3548_v56 = vpop.permute.xlu1 %3547 }
0x1e83   :  { %v3571_v36 = vpack.i.bf16 %v1261_v8, %v1587_v33  ;;  %v3553_v39 = vpop.permute.xlu0 %3552  ;;  %v3549_v52 = vunpack.i.l.bf16 %v3548_v56  ;;  %v3550_v60 = vunpack.i.h.bf16 %v3548_v56 }
0x1e84   :  { %v3554_v57 = vunpack.i.l.bf16 %v3553_v39  ;;  %v3555_v13 = vunpack.i.h.bf16 %v3553_v39 }
0x1e85   :  { %3572 = vrot.lane.b32.xlu1 %v3571_v36, %s3996_s17 }
0x1e86   :  { %v3558_v35 = vpop.permute.xlu1 %3557  ;;  %v1601_v19 = vsel %vm162_vm4, %v3549_v52, %v3554_v57  ;;  %v1637_v62 = vsel %vm162_vm4, %v3550_v60, %v3555_v13 }
0x1e87   :  { %v3563_v11 = vpop.permute.xlu0 %3562  ;;  %v3559_v9 = vunpack.i.l.bf16 %v3558_v35  ;;  %v3560_v61 = vunpack.i.h.bf16 %v3558_v35  ;;  %v1653_v6 = vrot.slane %v1601_v19, 6  ;;  %v1662_v45 = vrot.slane %v1637_v62, 6 }
0x1e88   :  { %v3564_v55 = vunpack.i.l.bf16 %v3563_v11  ;;  %v3565_v15 = vunpack.i.h.bf16 %v3563_v11 }
0x1e89   :  { %1625 = vrot.lane.b32.xlu1 %v1151_v5, %s3996_s17 }
0x1e8a   :  { %v1610_v21 = vsel %vm162_vm4, %v3559_v9, %v3564_v55  ;;  %v1646_v34 = vsel %vm162_vm4, %v3560_v61, %v3565_v15 }
0x1e8b   :  { %v3568_v41 = vpop.permute.xlu0 %3567  ;;  %v1656_v42 = vrot.slane %v1610_v21, 4  ;;  %v1665_v24 = vrot.slane %v1646_v34, 4  ;;  %v4845_v34 = vld [vmem:[%s5419_s1 + $0xa4] ss:$8 sps:$4 sm:$0xff]  }
0x1e8c   :  { %v3569_v49 = vunpack.i.l.bf16 %v3568_v41  ;;  %v3570_v29 = vunpack.i.h.bf16 %v3568_v41  ;;  %1905 = vmatprep.subr.bf16.mxu0 %v4845_v34  ;;  %2048 = vmatprep.subr.bf16.mxu1 %v4845_v34 }
0x1ef4   :  { %v1649_v18 = vpop.permute.xlu0 %1648 }
0x1ef5   :  { %v1651_v46 = vsel %vm162_vm4, %v1649_v18, %v4342_v51 }
0x1ef6   :  { %v1668_v10 = vrot.slane %v1651_v46, 2  ;;  %v4863_v46 = vld [vmem:[%s5419_s1 + $0xb0] ss:$8 sps:$4 sm:$0xff]  }
0x1ef7   :  { %v3573_v28 = vpop.permute.xlu1 %3572 }
0x1ef8   :  { %v3575_v63 = vunpack.i.h.bf16 %v3573_v28  ;;  %v3574_v12 = vunpack.i.l.bf16 %v3573_v28 }
0x1efa   :  { %v1592_v3 = vsel %vm162_vm4, %v4340_v50, %v3574_v12  ;;  %v1619_v14 = vsel %vm162_vm4, %v3569_v49, %v3575_v63  ;;  %v1698_v50 = vsub.s32 1, %v4084_v22 }
0x1efb   :  { %v1659_v2 = vrot.slane %v1619_v14, 2  ;;  %v1626_v25 = vpop.permute.xlu1 %1625  ;;  %v1671_v0 = vsel %vm1670_vm0, %v1592_v3, %v1653_v6  ;;  %v4870_v14 = vld [vmem:[%s5419_s1 + $0xc4] ss:$8 sps:$4 sm:$0xff]  }
0x1efc   :  { %v1628_v31 = vsel %vm162_vm4, %v3570_v29, %v1626_v25  ;;  %v1673_v32 = vsel %vm1672_vm6, %v1671_v0, %v1656_v42  ;;  %v1699_v38 = vrot.slane %v3966_v20, %v1698_v50  ;;  %v1703_v16 = vrot.slane %v3967_v47, %v1698_v50  ;;  %v4850_v42 = vld [vmem:[%s5419_s1 + $0xa0] ss:$8 sps:$4 sm:$0xff]   ;;  %v4855_v29 = vld [vmem:[%s5419_s1 + $0xb4] ss:$8 sps:$4 sm:$0xff]  }
0x1efd   :  { %v1676_v4 = vsel %vm1670_vm0, %v1628_v31, %v1662_v45  ;;  %v1675_v51 = vsel %vm1674_vm7, %v1673_v32, %v1659_v2  ;;  %1906 = vmatpush1.bf16.msra.mxu0 %v4850_v42  ;;  %v4879_v0 = vld [vmem:[%s5419_s1 + $0xc0] ss:$8 sps:$4 sm:$0xff]   ;;  %v4887_v31 = vld [vmem:[%s5419_s1 + $0xd4] ss:$8 sps:$4 sm:$0xff]  }
0x1efe   :  { %v1677_v54 = vsel %vm1672_vm6, %v1676_v4, %v1665_v24  ;;  %1907 = vmatprep.subr.bf16.mxu0 %v4855_v29  ;;  %v4899_v4 = vld [vmem:[%s5419_s1 + $0xd0] ss:$8 sps:$4 sm:$0xff]  }
0x1eff   :  { %v1678_v37 = vsel %vm1674_vm7, %v1677_v54, %v1668_v10 }
0x1f00   :  { %v1695_v30 = vpack.c.bf16 %v1678_v37, %v1675_v51 }
0x1f01   :  { %1908 = vmatpush1.bf16.msra.mxu0 %v4863_v46 }
0x1f02   :  { %3351 = vmatmul.mubr.msk.bf16.vlgmr.msra.gmra.mrb[24].mxu1 %vm74_vm3, %v1695_v30  ;;  %1909 = vmatprep.subr.bf16.mxu0 %v4870_v14 }
0x1f03   :  { %2080 = vmatprep.mubr.bf16.mxu1 %v3993_v1  ;;  %2049 = vmatpush1.bf16.msra.mxu1 %v4850_v42 }
0x1f04   :  { %2050 = vmatprep.subr.bf16.mxu1 %v4855_v29 }
0x1f05   :  { %1910 = vmatpush1.bf16.msra.mxu0 %v4879_v0 }
0x1f06   :  { %1911 = vmatprep.subr.bf16.mxu0 %v4887_v31 }
0x1f07   :  { %2051 = vmatpush1.bf16.msra.mxu1 %v4863_v46 }
0x1f08   :  { %2052 = vmatprep.subr.bf16.mxu1 %v4870_v14 }
0x1f09   :  { %1912 = vmatpush1.bf16.msra.mxu0 %v4899_v4 }
0x1f0a   :  { %2190 = vmatprep.subr.bf16.mxu0 %v4845_v34 }
0x1f0b   :  { %2053 = vmatpush1.bf16.msra.mxu1 %v4879_v0 }
0x1f0c   :  { %2054 = vmatprep.subr.bf16.mxu1 %v4887_v31 }
0x1f0f   :  { %2055 = vmatpush1.bf16.msra.mxu1 %v4899_v4 }
0x1f10   :  { %2321 = vmatprep.subr.bf16.mxu1 %v4845_v34 }
0x1fd5   :  { %v1781_v7 = vpop.f32.mrb[24].mxu1 }
0x1fd6   :  { %v4821_v43 = vadd.f32 %v1781_v7, %v1699_v38  ;;  %v1783_v59 = vpop.f32.mrb[25].mxu1 }
0x1fd7   :  { %v4823_v23 = vadd.f32 %v1783_v59, %v1703_v16  ;;  %v1785_v8 = vpop.f32.mrb[26].mxu1 }
0x1fd8   :  { %3838 = vtanh.f32 %v4821_v43  ;;  %v4826_v33 = vadd.f32 %v1785_v8, %v1699_v38  ;;  %v1787_v36 = vpop.f32.mrb[27].mxu1  ;;  %v3352_v11 = vmul.f32 -1.442695, %v4821_v43 }
0x1fd9   :  { %v4828_v5 = vadd.f32 %v1787_v36, %v1703_v16 }
0x1fdb   :  { %3840 = vtanh.f32 %v4828_v5  ;;  %v3353_v35 = vmul.f32 -1.442695, %v4828_v5 }
0x1fdc   :  { %3842 = vpow2.f32 %v3352_v11 }
0x1fdd   :  { %3844 = vpow2.f32 %v3353_v35 }
0x1fe2   :  { %v3839_v39 = vpop.eup %3838 }
0x1fe3   :  { %1799 = vrot.lane.b32.xlu0 %v3839_v39, %s3997_s28 }
0x1fe5   :  { %v3841_v56 = vpop.eup %3840 }
0x1fe6   :  { %1825 = vrot.lane.b32.xlu1 %v3841_v56, %s3997_s28  ;;  %v3843_v52 = vpop.eup %3842 }
0x1fe7   :  { %v3845_v57 = vpop.eup %3844  ;;  %v1793_v9 = vadd.f32 1.0, %v3843_v52 }
0x1fe8   :  { %v1819_v55 = vadd.f32 1.0, %v3845_v57 }
0x1fe9   :  { %3846 = vrcp.f32 %v1793_v9 }
0x1fea   :  { %3848 = vrcp.f32 %v1819_v55 }
0x1ff3   :  { %v3847_v41 = vpop.eup %3846 }
0x1ff4   :  { %v3849_v61 = vpop.eup %3848  ;;  %v1797_v21 = vmul.f32 0.0, %v3847_v41 }
0x1ff5   :  { %v1823_v62 = vmul.f32 0.0, %v3849_v61 }
0x2055   :  { %v1800_v60 = vpop.permute.xlu0 %1799 }
0x2056   :  { %v1802_v13 = vmul.f32 %v3847_v41, %v1800_v60 }
0x2058   :  { %v1826_v15 = vpop.permute.xlu1 %1825  ;;  %1804 = vrot.lane.b32.xlu0 %v1802_v13, %s3997_s28 }
0x2059   :  { %v1828_v19 = vmul.f32 %v3849_v61, %v1826_v15 }
0x205b   :  { %1830 = vrot.lane.b32.xlu1 %v1828_v19, %s3997_s28 }
0x20ca   :  { %v1805_v18 = vpop.permute.xlu0 %1804 }
0x20cb   :  { %v4837_v28 = vadd.f32 %v1805_v18, %v1797_v21 }
0x20cd   :  { %3850 = vtanh.f32 %v4837_v28  ;;  %v1831_v49 = vpop.permute.xlu1 %1830 }
0x20ce   :  { %v1833_v63 = vadd.f32 %v1831_v49, %v1823_v62 }
0x20d0   :  { %3852 = vtanh.f32 %v1833_v63  ;;  %v1841_v32 = vrot.slane %v1833_v63, 6  ;;  %v1814_v63 = vsel %vm655_vm13, %v4837_v28, 0.0 }
0x20d7   :  { %v3851_v12 = vpop.eup %3850 }
0x20d8   :  { %1810 = vrot.lane.b32.xlu0 %v3851_v12, %s3997_s28 }
0x20da   :  { %v3853_v6 = vpop.eup %3852 }
0x20db   :  { %1836 = vrot.lane.b32.xlu1 %v3853_v6, %s3997_s28  ;;  %v1962_v6 = vrot.slane %v1814_v63, 6 }
0x214a   :  { %v1811_v3 = vpop.permute.xlu0 %1810 }
0x214b   :  { %v1813_v45 = vmul.f32 %v3847_v41, %v1811_v3 }
0x214d   :  { %v1815_v2 = vsel %vm655_vm13, %v1813_v45, 0.0  ;;  %v1837_v25 = vpop.permute.xlu1 %1836 }
0x214e   :  { %v1839_v24 = vmul.f32 %v3849_v61, %v1837_v25  ;;  %1853 = vrot.lane.b32.xlu0 %v1815_v2, %s3998_s29 }
0x2150   :  { %v1847_v10 = vrot.slane %v1839_v24, 6 }
0x2152   :  { %1848 = vrot.lane.b32.xlu1 %v1847_v10, %s3998_s29  ;;  %1842 = vrot.lane.b32.xlu0 %v1841_v32, %s3996_s17 }
0x21c0   :  { %v4911_v37 = vpop.permute.xlu0 %1853 }
0x21c4   :  { %v1849_v54 = vpop.permute.xlu1 %1848  ;;  %v1843_v56 = vpop.permute.xlu0 %1842 }
0x21c5   :  { %v4907_v51 = vsel %vm687_vm14, %v1849_v54, 0.0  ;;  %v4929_v52 = vsel %vm687_vm14, %v1843_v56, 0.0 }
0x21c6   :  { %1857 = vrot.lane.b32.xlu1 %v4907_v51, %s3997_s28  ;;  %v2005_v57 = vrot.slane %v4929_v52, 4 }
0x2238   :  { %v1858_v30 = vpop.permute.xlu1 %1857 }
0x2239   :  { %v1860_v50 = vsel %vm162_vm4, %v4911_v37, %v1858_v30 }
0x223a   :  { %v1861_v20 = vpack.c.bf16 %v1860_v50, %v1860_v50 }
0x223c   :  { %3362 = vmatmul.mubr.msk.bf16.vlgmr.msra.gmra.mrb[28].mxu0 %vm74_vm3, %v1861_v20 }
0x223d   :  { %2191 = vmatpush1.bf16.msra.mxu0 %v4850_v42  ;;  %2222 = vmatprep.mubr.bf16.mxu0 %v3993_v1 }
0x223e   :  { %2192 = vmatprep.subr.bf16.mxu0 %v4855_v29 }
0x2241   :  { %2193 = vmatpush1.bf16.msra.mxu0 %v4863_v46 }
0x2242   :  { %2194 = vmatprep.subr.bf16.mxu0 %v4870_v14 }
0x2245   :  { %2195 = vmatpush1.bf16.msra.mxu0 %v4879_v0 }
0x2246   :  { %2196 = vmatprep.subr.bf16.mxu0 %v4887_v31 }
0x2249   :  { %2197 = vmatpush1.bf16.msra.mxu0 %v4899_v4 }
0x224a   :  { %2461 = vmatprep.subr.bf16.mxu0 %v4845_v34 }
0x230f   :  { %v1939_v38 = vpop.f32.mrb[28].mxu0 }
0x2310   :  { %v1947_v47 = vrot.slane %v1939_v38, 6  ;;  %v1941_v16 = vpop.f32.mrb[29].mxu0 }
0x2311   :  { %v1951_v7 = vrot.slane %v1941_v16, 4  ;;  %v1943_v59 = vpop.f32.mrb[30].mxu0 }
0x2312   :  { %v1949_v8 = vadd.f32 %v1947_v47, %v4821_v43  ;;  %v1944_v36 = vpop.f32.mrb[31].mxu0 }
0x2313   :  { %v1953_v39 = vadd.f32 %v1951_v7, %v4828_v5 }
0x2314   :  { %3854 = vtanh.f32 %v1949_v8  ;;  %v3363_v9 = vmul.f32 -1.442695, %v1949_v8 }
0x2315   :  { %3856 = vtanh.f32 %v1953_v39  ;;  %v3364_v55 = vmul.f32 -1.442695, %v1953_v39 }
0x2316   :  { %3858 = vpow2.f32 %v3363_v9 }
0x2317   :  { %3860 = vpow2.f32 %v3364_v55 }
0x231e   :  { %v3855_v11 = vpop.eup %3854 }
0x231f   :  { %v3857_v35 = vpop.eup %3856  ;;  %1966 = vrot.lane.b32.xlu0 %v3855_v11, %s3997_s28 }
0x2320   :  { %2011 = vrot.lane.b32.xlu1 %v3857_v35, %s3997_s28  ;;  %v3859_v41 = vpop.eup %3858 }
0x2321   :  { %v3861_v60 = vpop.eup %3860  ;;  %v1957_v13 = vadd.f32 1.0, %v3859_v41 }
0x2322   :  { %v2000_v61 = vadd.f32 1.0, %v3861_v60 }
0x2323   :  { %3862 = vrcp.f32 %v1957_v13 }
0x2324   :  { %2006 = vrot.lane.b32.xlu1 %v2005_v57, %s3997_s28  ;;  %3864 = vrcp.f32 %v2000_v61 }
0x232d   :  { %v3863_v15 = vpop.eup %3862 }
0x232e   :  { %v3865_v21 = vpop.eup %3864  ;;  %v1964_v3 = vmul.f32 %v3863_v15, %v1962_v6 }
0x2391   :  { %v1967_v19 = vpop.permute.xlu0 %1966 }
0x2392   :  { %v1969_v18 = vmul.f32 %v3863_v15, %v1967_v19  ;;  %v2012_v62 = vpop.permute.xlu1 %2011 }
0x2393   :  { %v2014_v49 = vmul.f32 %v3865_v21, %v2012_v62 }
0x2394   :  { %1971 = vrot.lane.b32.xlu1 %v1969_v18, %s3997_s28 }
0x2395   :  { %2016 = vrot.lane.b32.xlu0 %v2014_v49, %s3997_s28 }
0x2396   :  { %v2007_v12 = vpop.permute.xlu1 %2006 }
0x2397   :  { %v2009_v45 = vmul.f32 %v3865_v21, %v2007_v12 }
0x2406   :  { %v1972_v2 = vpop.permute.xlu1 %1971 }
0x2407   :  { %v1974_v25 = vadd.f32 %v1972_v2, %v1964_v3  ;;  %v2017_v24 = vpop.permute.xlu0 %2016 }
0x2408   :  { %v2019_v32 = vadd.f32 %v2017_v24, %v2009_v45 }
0x2409   :  { %3866 = vtanh.f32 %v1974_v25  ;;  %v1982_v7 = vrot.slane %v1974_v25, 2 }
0x240a   :  { %3868 = vtanh.f32 %v2019_v32  ;;  %v2027_v16 = vrot.slane %v2019_v32, 4 }
0x2413   :  { %v3867_v10 = vpop.eup %3866 }
0x2414   :  { %v3869_v54 = vpop.eup %3868  ;;  %1977 = vrot.lane.b32.xlu1 %v3867_v10, %s3997_s28 }
0x2415   :  { %2022 = vrot.lane.b32.xlu0 %v3869_v54, %s3997_s28 }
0x2486   :  { %v1978_v30 = vpop.permute.xlu1 %1977 }
0x2487   :  { %v1980_v50 = vmul.f32 %v3863_v15, %v1978_v30  ;;  %v2023_v20 = vpop.permute.xlu0 %2022 }
0x2488   :  { %v2025_v28 = vmul.f32 %v3865_v21, %v2023_v20 }
0x2489   :  { %v1991_v38 = vrot.slane %v1980_v50, 2 }
0x248a   :  { %v2033_v47 = vrot.slane %v2025_v28, 4 }
0x248b   :  { %1992 = vrot.lane.b32.xlu1 %v1991_v38, %s3998_s29 }
0x248c   :  { %2034 = vrot.lane.b32.xlu0 %v2033_v47, %s3998_s29 }
0x248f   :  { %2028 = vrot.lane.b32.xlu1 %v2027_v16, %s3996_s17 }
0x2493   :  { %1983 = vrot.lane.b32.xlu1 %v1982_v7, %s3996_s17 }
0x24fd   :  { %v4956_v36 = vpop.permute.xlu1 %1992 }
0x24fe   :  { %v4946_v59 = vpop.permute.xlu0 %2034  ;;  %v4962_v39 = vsel %vm831_vm1, %v4956_v36, %v4911_v37 }
0x24ff   :  { %v4952_v8 = vsel %vm864_vm2, %v4946_v59, %v4907_v51 }
0x2500   :  { %2040 = vrot.lane.b32.xlu0 %v4952_v8, %s3997_s28 }
0x2501   :  { %v2029_v18 = vpop.permute.xlu1 %2028 }
0x2502   :  { %v4983_v62 = vsel %vm864_vm2, %v2029_v18, %v4929_v52 }
0x2503   :  { %v2147_v49 = vrot.slane %v4983_v62, 6 }
0x2505   :  { %v1984_v24 = vpop.permute.xlu1 %1983 }
0x2572   :  { %v2041_v56 = vpop.permute.xlu0 %2040 }
0x2573   :  { %v2043_v11 = vsel %vm162_vm4, %v4962_v39, %v2041_v56 }
0x2574   :  { %v2044_v35 = vpack.c.bf16 %v2043_v11, %v2043_v11 }
0x2576   :  { %3365 = vmatmul.mubr.msk.bf16.vlgmr.msra.gmra.mrb[28].mxu1 %vm74_vm3, %v2044_v35 }
0x2577   :  { %2322 = vmatpush1.bf16.msra.mxu1 %v4850_v42  ;;  %2353 = vmatprep.mubr.bf16.mxu1 %v3993_v1 }
0x2578   :  { %2323 = vmatprep.subr.bf16.mxu1 %v4855_v29 }
0x257b   :  { %2324 = vmatpush1.bf16.msra.mxu1 %v4863_v46 }
0x257c   :  { %2325 = vmatprep.subr.bf16.mxu1 %v4870_v14 }
0x257f   :  { %2326 = vmatpush1.bf16.msra.mxu1 %v4879_v0 }
0x2580   :  { %2327 = vmatprep.subr.bf16.mxu1 %v4887_v31 }
0x2583   :  { %2328 = vmatpush1.bf16.msra.mxu1 %v4899_v4 }
0x2584   :  { %2604 = vmatprep.subr.bf16.mxu1 %v4845_v34 }
0x2649   :  { %v2082_v57 = vpop.f32.mrb[28].mxu1 }
0x264a   :  { %v2090_v9 = vrot.slane %v2082_v57, 4  ;;  %v2084_v55 = vpop.f32.mrb[29].mxu1 }
0x264b   :  { %v2094_v41 = vrot.slane %v2084_v55, 6  ;;  %v2086_v60 = vpop.f32.mrb[30].mxu1 }
0x264c   :  { %v2092_v13 = vadd.f32 %v2090_v9, %v4821_v43  ;;  %v2087_v61 = vpop.f32.mrb[31].mxu1 }
0x264d   :  { %v2096_v15 = vadd.f32 %v2094_v41, %v4828_v5 }
0x264e   :  { %3870 = vtanh.f32 %v2092_v13  ;;  %v3366_v6 = vmul.f32 -1.442695, %v2092_v13 }
0x264f   :  { %3872 = vtanh.f32 %v2096_v15  ;;  %v3367_v12 = vmul.f32 -1.442695, %v2096_v15 }
0x2651   :  { %3874 = vpow2.f32 %v3367_v12 }
0x2652   :  { %3876 = vpow2.f32 %v3366_v6 }
0x2658   :  { %v3871_v19 = vpop.eup %3870 }
0x2659   :  { %v3873_v21 = vpop.eup %3872  ;;  %2111 = vrot.lane.b32.xlu1 %v3871_v19, %s3997_s28 }
0x265a   :  { %2153 = vrot.lane.b32.xlu0 %v3873_v21, %s3997_s28 }
0x265b   :  { %v3875_v3 = vpop.eup %3874 }
0x265c   :  { %v2142_v45 = vadd.f32 1.0, %v3875_v3  ;;  %v3877_v2 = vpop.eup %3876 }
0x265d   :  { %v2100_v25 = vadd.f32 1.0, %v3877_v2 }
0x265e   :  { %1986 = vrot.lane.b32.xlu0 %v1814_v63, %s3996_s17  ;;  %3878 = vrcp.f32 %v2142_v45 }
0x265f   :  { %3880 = vrcp.f32 %v2100_v25 }
0x2662   :  { %2148 = vrot.lane.b32.xlu0 %v2147_v49, %s3997_s28 }
0x2668   :  { %v3879_v32 = vpop.eup %3878 }
0x2669   :  { %v3881_v63 = vpop.eup %3880 }
0x26cb   :  { %v2112_v54 = vpop.permute.xlu1 %2111 }
0x26cc   :  { %v2154_v52 = vpop.permute.xlu0 %2153  ;;  %v2114_v50 = vmul.f32 %v3881_v63, %v2112_v54 }
0x26cd   :  { %v2156_v10 = vmul.f32 %v3879_v32, %v2154_v52 }
0x26cf   :  { %2158 = vrot.lane.b32.xlu1 %v2156_v10, %s3997_s28 }
0x26d0   :  { %v1987_v30 = vpop.permute.xlu0 %1986 }
0x26d1   :  { %v1989_v20 = vsel %vm831_vm1, %v1984_v24, %v1987_v30 }
0x26d2   :  { %v2105_v28 = vrot.slane %v1989_v20, 4 }
0x26d3   :  { %2116 = vrot.lane.b32.xlu1 %v2114_v50, %s3997_s28 }
0x26d4   :  { %2106 = vrot.lane.b32.xlu0 %v2105_v28, %s3997_s28  ;;  %v2149_v38 = vpop.permute.xlu0 %2148 }
0x26d5   :  { %v2151_v47 = vmul.f32 %v3879_v32, %v2149_v38 }
0x2741   :  { %v2159_v16 = vpop.permute.xlu1 %2158 }
0x2742   :  { %v2161_v7 = vadd.f32 %v2159_v16, %v2151_v47 }
0x2744   :  { %3882 = vtanh.f32 %v2161_v7  ;;  %v2169_v18 = vrot.slane %v2161_v7, 2 }
0x2745   :  { %v2117_v35 = vpop.permute.xlu1 %2116 }
0x2746   :  { %v2107_v56 = vpop.permute.xlu0 %2106 }
0x2747   :  { %v2109_v11 = vmul.f32 %v3881_v63, %v2107_v56 }
0x2749   :  { %v2119_v57 = vadd.f32 %v2117_v35, %v2109_v11 }
0x274b   :  { %3884 = vtanh.f32 %v2119_v57  ;;  %v2127_v21 = vrot.slane %v2119_v57, 4 }
0x274e   :  { %v3883_v9 = vpop.eup %3882 }
0x274f   :  { %2164 = vrot.lane.b32.xlu0 %v3883_v9, %s3997_s28 }
0x2755   :  { %v3885_v55 = vpop.eup %3884 }
0x2756   :  { %2122 = vrot.lane.b32.xlu1 %v3885_v55, %s3997_s28 }
0x27c1   :  { %v2165_v41 = vpop.permute.xlu0 %2164 }
0x27c2   :  { %v2167_v60 = vmul.f32 %v3879_v32, %v2165_v41 }
0x27c4   :  { %v2175_v13 = vrot.slane %v2167_v60, 2 }
0x27c6   :  { %2176 = vrot.lane.b32.xlu0 %v2175_v13, %s3998_s29 }
0x27c8   :  { %v2123_v61 = vpop.permute.xlu1 %2122 }
0x27c9   :  { %v2125_v15 = vmul.f32 %v3881_v63, %v2123_v61 }
0x27cb   :  { %v2133_v19 = vrot.slane %v2125_v15, 4 }
0x27cd   :  { %2134 = vrot.lane.b32.xlu1 %v2133_v19, %s3998_s29 }
0x27d1   :  { %2128 = vrot.lane.b32.xlu1 %v2127_v21, %s3996_s17 }
0x27d5   :  { %2170 = vrot.lane.b32.xlu1 %v2169_v18, %s3996_s17 }
0x2838   :  { %v4999_v49 = vpop.permute.xlu0 %2176 }
0x2839   :  { %v5005_v12 = vsel %vm1006_vm9, %v4999_v49, %v4952_v8 }
0x283a   :  { %2182 = vrot.lane.b32.xlu0 %v5005_v12, %s3997_s28 }
0x283f   :  { %v5009_v6 = vpop.permute.xlu1 %2134 }
0x2840   :  { %v5025_v24 = vsel %vm973_vm8, %v5009_v6, %v4962_v39  ;;  %v2138_v44 = vsel %vm973_vm8, %v5009_v6, 0.0 }
0x2843   :  { %v2129_v3 = vpop.permute.xlu1 %2128 }
0x2844   :  { %v5013_v45 = vsel %vm973_vm8, %v2129_v3, %v1989_v20 }
0x2845   :  { %v2244_v2 = vrot.slane %v5013_v45, 2 }
0x2847   :  { %2245 = vrot.lane.b32.xlu1 %v2244_v2, %s3997_s28  ;;  %v2171_v25 = vpop.permute.xlu1 %2170 }
0x2848   :  { %v2173_v8 = vsel %vm1006_vm9, %v2171_v25, %v4983_v62 }
0x284b   :  { %2286 = vrot.lane.b32.xlu1 %v2173_v8, %s3997_s28 }
0x28ac   :  { %v2183_v32 = vpop.permute.xlu0 %2182 }
0x28ad   :  { %v2185_v52 = vsel %vm162_vm4, %v5025_v24, %v2183_v32 }
0x28ae   :  { %v2186_v10 = vpack.c.bf16 %v2185_v52, %v2185_v52 }
0x28b0   :  { %3368 = vmatmul.mubr.msk.bf16.vlgmr.msra.gmra.mrb[32].mxu0 %vm74_vm3, %v2186_v10 }
0x28b1   :  { %2462 = vmatpush1.bf16.msra.mxu0 %v4850_v42  ;;  %2493 = vmatprep.mubr.bf16.mxu0 %v3993_v1 }
0x28b2   :  { %2463 = vmatprep.subr.bf16.mxu0 %v4855_v29 }
0x28b5   :  { %2464 = vmatpush1.bf16.msra.mxu0 %v4863_v46 }
0x28b6   :  { %2465 = vmatprep.subr.bf16.mxu0 %v4870_v14 }
0x28b9   :  { %2466 = vmatpush1.bf16.msra.mxu0 %v4879_v0  ;;  %v2246_v41 = vpop.permute.xlu1 %2245 }
0x28ba   :  { %2467 = vmatprep.subr.bf16.mxu0 %v4887_v31 }
0x28bd   :  { %2468 = vmatpush1.bf16.msra.mxu0 %v4899_v4  ;;  %v5045_v15 = vpop.permute.xlu1 %2286 }
0x28be   :  { %2746 = vmatprep.subr.bf16.mxu0 %v4845_v34 }
0x2983   :  { %v2224_v39 = vpop.f32.mrb[32].mxu0 }
0x2984   :  { %v2232_v62 = vrot.slane %v2224_v39, 2  ;;  %v2226_v54 = vpop.f32.mrb[33].mxu0 }
0x2985   :  { %v2228_v63 = vpop.f32.mrb[34].mxu0  ;;  %v2235_v20 = vadd.f32 %v2226_v54, %v4828_v5 }
0x2986   :  { %v2234_v30 = vadd.f32 %v2232_v62, %v4821_v43  ;;  %v2229_v50 = vpop.f32.mrb[35].mxu0 }
0x2987   :  { %v3370_v34 = vmul.f32 -1.442695, %v2235_v20 }
0x2988   :  { %3886 = vtanh.f32 %v2234_v30  ;;  %v3369_v47 = vmul.f32 -1.442695, %v2234_v30 }
0x2989   :  { %3888 = vtanh.f32 %v2235_v20 }
0x298a   :  { %3890 = vpow2.f32 %v3369_v47 }
0x298b   :  { %3892 = vpow2.f32 %v3370_v34 }
0x2992   :  { %v3887_v28 = vpop.eup %3886 }
0x2993   :  { %2250 = vrot.lane.b32.xlu0 %v3887_v28, %s3997_s28  ;;  %v3889_v38 = vpop.eup %3888 }
0x2994   :  { %v3891_v16 = vpop.eup %3890 }
0x2995   :  { %v2239_v7 = vadd.f32 1.0, %v3891_v16  ;;  %v3893_v56 = vpop.eup %3892 }
0x2996   :  { %v2281_v43 = vadd.f32 1.0, %v3893_v56 }
0x2997   :  { %2291 = vrot.lane.b32.xlu0 %v3889_v38, %s3997_s28  ;;  %3894 = vrcp.f32 %v2239_v7 }
0x2998   :  { %3896 = vrcp.f32 %v2281_v43 }
0x29a1   :  { %v3895_v11 = vpop.eup %3894 }
0x29a2   :  { %v3897_v57 = vpop.eup %3896  ;;  %v2248_v60 = vmul.f32 %v3895_v11, %v2246_v41 }
0x29a3   :  { %v2289_v19 = vmul.f32 %v3897_v57, %v5045_v15 }
0x2a05   :  { %v2251_v35 = vpop.permute.xlu0 %2250 }
0x2a06   :  { %v2253_v5 = vmul.f32 %v3895_v11, %v2251_v35 }
0x2a08   :  { %2255 = vrot.lane.b32.xlu0 %v2253_v5, %s3997_s28 }
0x2a09   :  { %v2292_v9 = vpop.permute.xlu0 %2291 }
0x2a0a   :  { %v2294_v55 = vmul.f32 %v3897_v57, %v2292_v9 }
0x2a0c   :  { %2296 = vrot.lane.b32.xlu0 %v2294_v55, %s3997_s28 }
0x2a7a   :  { %v2256_v13 = vpop.permute.xlu0 %2255 }
0x2a7b   :  { %v2258_v61 = vadd.f32 %v2256_v13, %v2248_v60 }
0x2a7d   :  { %3898 = vtanh.f32 %v2258_v61 }
0x2a7e   :  { %v2297_v21 = vpop.permute.xlu0 %2296 }
0x2a7f   :  { %v5048_v18 = vadd.f32 %v2297_v21, %v2289_v19 }
0x2a81   :  { %3900 = vtanh.f32 %v5048_v18 }
0x2a87   :  { %v3899_v3 = vpop.eup %3898 }
0x2a88   :  { %2261 = vrot.lane.b32.xlu1 %v3899_v3, %s3997_s28 }
0x2a8b   :  { %v3901_v2 = vpop.eup %3900 }
0x2a8c   :  { %2307 = vrot.lane.b32.xlu1 %v5005_v12, %s3998_s29  ;;  %2302 = vrot.lane.b32.xlu0 %v3901_v2, %s3997_s28  ;;  %v2266_v12 = vrot.slane %v2258_v61, 6  ;;  %v2306_v2 = vsel %vm1148_vm15, %v5048_v18, %v5045_v15 }
0x2afa   :  { %v2262_v25 = vpop.permute.xlu1 %2261 }
0x2afb   :  { %v2264_v8 = vmul.f32 %v3895_v11, %v2262_v25  ;;  %v2410_v25 = vrot.slane %v2306_v2, 2 }
0x2afd   :  { %v2272_v32 = vrot.slane %v2264_v8, 6 }
0x2afe   :  { %v2303_v52 = vpop.permute.xlu0 %2302  ;;  %v2308_v39 = vpop.permute.xlu1 %2307 }
0x2aff   :  { %v5055_v10 = vmul.f32 %v3897_v57, %v2303_v52  ;;  %2273 = vrot.lane.b32.xlu0 %v2272_v32, %s3998_s29 }
0x2b01   :  { %v5061_v62 = vsel %vm1148_vm15, %v5055_v10, %v2308_v39 }
0x2b02   :  { %2313 = vrot.lane.b32.xlu1 %v5061_v62, %s3996_s17 }
0x2b06   :  { %2267 = vrot.lane.b32.xlu1 %v2266_v12, %s3996_s17 }
0x2b71   :  { %v5066_v54 = vpop.permute.xlu0 %2273 }
0x2b72   :  { %v5072_v63 = vsel %vm1115_vm12, %v5066_v54, %v5025_v24 }
0x2b74   :  { %v2314_v30 = vpop.permute.xlu1 %2313 }
0x2b75   :  { %v2316_v50 = vsel %vm162_vm4, %v5072_v63, %v2314_v30 }
0x2b76   :  { %v2317_v20 = vpack.c.bf16 %v2316_v50, %v2316_v50 }
0x2b78   :  { %3371 = vmatmul.mubr.msk.bf16.vlgmr.msra.gmra.mrb[32].mxu1 %vm74_vm3, %v2317_v20  ;;  %v2268_v11 = vpop.permute.xlu1 %2267 }
0x2b79   :  { %2605 = vmatpush1.bf16.msra.mxu1 %v4850_v42  ;;  %2636 = vmatprep.mubr.bf16.mxu1 %v3993_v1  ;;  %v2270_v35 = vsel %vm1115_vm12, %v2268_v11, %v5013_v45 }
0x2b7a   :  { %2606 = vmatprep.subr.bf16.mxu1 %v4855_v29 }
0x2b7d   :  { %2607 = vmatpush1.bf16.msra.mxu1 %v4863_v46 }
0x2b7e   :  { %2608 = vmatprep.subr.bf16.mxu1 %v4870_v14 }
0x2b81   :  { %2609 = vmatpush1.bf16.msra.mxu1 %v4879_v0 }
0x2b82   :  { %2610 = vmatprep.subr.bf16.mxu1 %v4887_v31 }
0x2b85   :  { %2611 = vmatpush1.bf16.msra.mxu1 %v4899_v4 }
0x2c4b   :  { %v2355_v24 = vpop.f32.mrb[32].mxu1 }
0x2c4c   :  { %v2357_v28 = vpop.f32.mrb[33].mxu1  ;;  %v2362_v7 = vadd.f32 %v2355_v24, %v4826_v33 }
0x2c4d   :  { %v2364_v38 = vrot.slane %v2357_v28, 2  ;;  %v2359_v47 = vpop.f32.mrb[34].mxu1 }
0x2c4e   :  { %v2360_v34 = vpop.f32.mrb[35].mxu1  ;;  %v3372_v57 = vmul.f32 -1.442695, %v2362_v7 }
0x2c4f   :  { %v2366_v16 = vadd.f32 %v2364_v38, %v4823_v23 }
0x2c51   :  { %3902 = vtanh.f32 %v2366_v16  ;;  %v3373_v5 = vmul.f32 -1.442695, %v2366_v16 }
0x2c52   :  { %3904 = vtanh.f32 %v2362_v7 }
0x2c53   :  { %3906 = vpow2.f32 %v3373_v5 }
0x2c54   :  { %3908 = vpow2.f32 %v3372_v57 }
0x2c5b   :  { %v3903_v56 = vpop.eup %3902 }
0x2c5c   :  { %2414 = vrot.lane.b32.xlu0 %v3903_v56, %s3997_s28  ;;  %v3905_v43 = vpop.eup %3904 }
0x2c5d   :  { %v3907_v9 = vpop.eup %3906 }
0x2c5e   :  { %v2405_v55 = vadd.f32 1.0, %v3907_v9  ;;  %v3909_v41 = vpop.eup %3908 }
0x2c5f   :  { %v2370_v60 = vadd.f32 1.0, %v3909_v41 }
0x2c60   :  { %2380 = vrot.lane.b32.xlu0 %v3905_v43, %s3997_s28  ;;  %3910 = vrcp.f32 %v2405_v55 }
0x2c61   :  { %3912 = vrcp.f32 %v2370_v60 }
0x2c64   :  { %2375 = vrot.lane.b32.xlu0 %v2270_v35, %s3997_s28 }
0x2c6a   :  { %v3911_v13 = vpop.eup %3910 }
0x2c6b   :  { %v3913_v21 = vpop.eup %3912  ;;  %v2412_v8 = vmul.f32 %v3911_v13, %v2410_v25 }
0x2cce   :  { %v2415_v61 = vpop.permute.xlu0 %2414 }
0x2ccf   :  { %v2417_v19 = vmul.f32 %v3911_v13, %v2415_v61 }
0x2cd1   :  { %2419 = vrot.lane.b32.xlu1 %v2417_v19, %s3997_s28 }
0x2cd2   :  { %v2381_v3 = vpop.permute.xlu0 %2380 }
0x2cd3   :  { %v2383_v45 = vmul.f32 %v3913_v21, %v2381_v3 }
0x2cd5   :  { %2385 = vrot.lane.b32.xlu1 %v2383_v45, %s3997_s28 }
0x2cd6   :  { %v5099_v32 = vpop.permute.xlu0 %2375 }
0x2cd7   :  { %v2378_v12 = vmul.f32 %v3913_v21, %v5099_v32 }
0x2d43   :  { %v2420_v52 = vpop.permute.xlu1 %2419 }
0x2d44   :  { %v2422_v39 = vadd.f32 %v2420_v52, %v2412_v8 }
0x2d46   :  { %3914 = vtanh.f32 %v2422_v39  ;;  %v2430_v11 = vrot.slane %v2422_v39, 6 }
0x2d47   :  { %v2386_v30 = vpop.permute.xlu1 %2385 }
0x2d48   :  { %v5102_v50 = vadd.f32 %v2386_v30, %v2378_v12 }
0x2d4a   :  { %3916 = vtanh.f32 %v5102_v50 }
0x2d50   :  { %v3915_v20 = vpop.eup %3914 }
0x2d51   :  { %2425 = vrot.lane.b32.xlu0 %v3915_v20, %s3997_s28 }
0x2d54   :  { %v3917_v24 = vpop.eup %3916 }
0x2d55   :  { %2391 = vrot.lane.b32.xlu1 %v3917_v24, %s3997_s28 }
0x2d59   :  { %2443 = vrot.lane.b32.xlu1 %v5061_v62, %s3998_s29 }
0x2dc3   :  { %v2426_v15 = vpop.permute.xlu0 %2425 }
0x2dc4   :  { %v2428_v18 = vmul.f32 %v3911_v13, %v2426_v15  ;;  %v2395_v15 = vsel %vm1148_vm15, %v5102_v50, %v5099_v32 }
0x2dc6   :  { %v2439_v28 = vrot.slane %v2428_v18, 6 }
0x2dc7   :  { %v2392_v47 = vpop.permute.xlu1 %2391 }
0x2dc8   :  { %v3576_v38 = vpack.i.bf16 %v2439_v28, %v5072_v63  ;;  %v5113_v16 = vmul.f32 %v3913_v21, %v2392_v47  ;;  %v2518_v28 = vrot.slane %v2395_v15, 6 }
0x2dca   :  { %3577 = vrot.lane.b32.xlu0 %v3576_v38, %s3998_s29 }
0x2dcb   :  { %v2444_v43 = vpop.permute.xlu1 %2443 }
0x2e3c   :  { %v5111_v34 = vpop.permute.xlu0 %3577 }
0x2e3d   :  { %v3580_v7 = vunpack.i.h.bf16 %v5111_v34  ;;  %v3579_v56 = vunpack.i.l.bf16 %v5111_v34  ;;  %v3687_v34 = vld [vmem:[%s5422_s4 + $0x80] sm:$0xff]  }
0x2e3f   :  { %v5121_v62 = vsel %vm1115_vm12, %v3580_v7, %v2444_v43  ;;  %v2400_v63 = vsel %vm1148_vm15, %v5113_v16, %v3579_v56 }
0x2e40   :  { %2453 = vrot.lane.b32.xlu1 %v5121_v62, %s3997_s28  ;;  %2449 = vrot.lane.b32.xlu0 %v2400_v63, %s3998_s29 }
0x2e44   :  { %2434 = vrot.lane.b32.xlu1 %v2306_v2, %s3996_s17  ;;  %2431 = vrot.lane.b32.xlu0 %v2430_v11, %s3996_s17 }
0x2eb2   :  { %v2454_v35 = vpop.permute.xlu1 %2453  ;;  %v5131_v5 = vpop.permute.xlu0 %2449 }
0x2eb3   :  { %v2456_v57 = vsel %vm162_vm4, %v5131_v5, %v2454_v35 }
0x2eb4   :  { %v2457_v9 = vpack.c.bf16 %v2456_v57, %v2456_v57 }
0x2eb6   :  { %3374 = vmatmul.mubr.msk.bf16.vlgmr.msra.gmra.mrb[36].mxu0 %vm74_vm3, %v2457_v9 }
0x2eb7   :  { %2747 = vmatpush1.bf16.msra.mxu0 %v4850_v42  ;;  %2778 = vmatprep.mubr.bf16.mxu0 %v3993_v1 }
0x2eb8   :  { %2748 = vmatprep.subr.bf16.mxu0 %v4855_v29 }
0x2ebb   :  { %2749 = vmatpush1.bf16.msra.mxu0 %v4863_v46  ;;  %v2435_v46 = vpop.permute.xlu1 %2434 }
0x2ebc   :  { %2750 = vmatprep.subr.bf16.mxu0 %v4870_v14  ;;  %v2432_v14 = vpop.permute.xlu0 %2431 }
0x2ebf   :  { %2751 = vmatpush1.bf16.msra.mxu0 %v4879_v0 }
0x2ec0   :  { %2752 = vmatprep.subr.bf16.mxu0 %v4887_v31  ;;  %v5148_v31 = vsel %vm1115_vm12, %v2432_v14, %v2435_v46 }
0x2ec3   :  { %2753 = vmatpush1.bf16.msra.mxu0 %v4899_v4  ;;  %v2561_v4 = vrot.slane %v5148_v31, 4 }
0x2f89   :  { %v2495_v55 = vpop.f32.mrb[36].mxu0 }
0x2f8a   :  { %v2503_v41 = vrot.slane %v2495_v55, 6  ;;  %v2497_v60 = vpop.f32.mrb[37].mxu0 }
0x2f8b   :  { %v2507_v13 = vrot.slane %v2497_v60, 4  ;;  %v2499_v61 = vpop.f32.mrb[38].mxu0 }
0x2f8c   :  { %v2505_v42 = vadd.f32 %v2503_v41, %v4826_v33  ;;  %v2500_v1 = vpop.f32.mrb[39].mxu0 }
0x2f8d   :  { %v2509_v29 = vadd.f32 %v2507_v13, %v4823_v23 }
0x2f8e   :  { %3918 = vtanh.f32 %v2505_v42  ;;  %v3375_v21 = vmul.f32 -1.442695, %v2505_v42 }
0x2f8f   :  { %3920 = vtanh.f32 %v2509_v29  ;;  %v3376_v3 = vmul.f32 -1.442695, %v2509_v29 }
0x2f90   :  { %3922 = vpow2.f32 %v3375_v21 }
0x2f91   :  { %3924 = vpow2.f32 %v3376_v3 }
0x2f98   :  { %v3919_v19 = vpop.eup %3918 }
0x2f99   :  { %v3921_v0 = vpop.eup %3920  ;;  %2522 = vrot.lane.b32.xlu1 %v3919_v19, %s3997_s28 }
0x2f9a   :  { %2567 = vrot.lane.b32.xlu0 %v3921_v0, %s3997_s28  ;;  %v3923_v45 = vpop.eup %3922 }
0x2f9b   :  { %v3925_v2 = vpop.eup %3924  ;;  %v2513_v25 = vadd.f32 1.0, %v3923_v45 }
0x2f9c   :  { %v2556_v8 = vadd.f32 1.0, %v3925_v2 }
0x2f9d   :  { %3926 = vrcp.f32 %v2513_v25 }
0x2f9e   :  { %2562 = vrot.lane.b32.xlu0 %v2561_v4, %s3997_s28  ;;  %3928 = vrcp.f32 %v2556_v8 }
0x2fa7   :  { %v3927_v52 = vpop.eup %3926 }
0x2fa8   :  { %v3929_v12 = vpop.eup %3928  ;;  %v2520_v38 = vmul.f32 %v3927_v52, %v2518_v28 }
0x300b   :  { %v2523_v39 = vpop.permute.xlu1 %2522 }
0x300c   :  { %v2525_v30 = vmul.f32 %v3927_v52, %v2523_v39  ;;  %v2568_v20 = vpop.permute.xlu0 %2567 }
0x300d   :  { %v2570_v24 = vmul.f32 %v3929_v12, %v2568_v20 }
0x300e   :  { %2527 = vrot.lane.b32.xlu0 %v2525_v30, %s3997_s28 }
0x300f   :  { %2572 = vrot.lane.b32.xlu1 %v2570_v24, %s3997_s28 }
0x3010   :  { %v2563_v18 = vpop.permute.xlu0 %2562 }
0x3011   :  { %v2565_v47 = vmul.f32 %v3929_v12, %v2563_v18 }
0x3080   :  { %v2528_v56 = vpop.permute.xlu0 %2527 }
0x3081   :  { %v2530_v43 = vadd.f32 %v2528_v56, %v2520_v38  ;;  %v2573_v63 = vpop.permute.xlu1 %2572 }
0x3082   :  { %v2575_v11 = vadd.f32 %v2573_v63, %v2565_v47 }
0x3083   :  { %3930 = vtanh.f32 %v2530_v43  ;;  %v2538_v61 = vrot.slane %v2530_v43, 2 }
0x3084   :  { %3932 = vtanh.f32 %v2575_v11  ;;  %v2583_v13 = vrot.slane %v2575_v11, 4 }
0x308d   :  { %v3931_v35 = vpop.eup %3930 }
0x308e   :  { %v3933_v57 = vpop.eup %3932  ;;  %2533 = vrot.lane.b32.xlu0 %v3931_v35, %s3997_s28 }
0x308f   :  { %2578 = vrot.lane.b32.xlu1 %v3933_v57, %s3997_s28 }
0x3100   :  { %v2534_v9 = vpop.permute.xlu0 %2533 }
0x3101   :  { %v2536_v55 = vmul.f32 %v3927_v52, %v2534_v9  ;;  %v2579_v41 = vpop.permute.xlu1 %2578 }
0x3102   :  { %v2581_v32 = vmul.f32 %v3929_v12, %v2579_v41 }
0x3103   :  { %v2547_v50 = vrot.slane %v2536_v55, 2 }
0x3104   :  { %v2589_v60 = vrot.slane %v2581_v32, 4 }
0x3105   :  { %2548 = vrot.lane.b32.xlu0 %v2547_v50, %s3998_s29 }
0x3106   :  { %2590 = vrot.lane.b32.xlu1 %v2589_v60, %s3998_s29 }
0x3109   :  { %2584 = vrot.lane.b32.xlu0 %v2583_v13, %s3996_s17 }
0x310d   :  { %2539 = vrot.lane.b32.xlu0 %v2538_v61, %s3996_s17 }
0x3177   :  { %v5176_v29 = vpop.permute.xlu0 %2548 }
0x3178   :  { %v5166_v42 = vpop.permute.xlu1 %2590  ;;  %v5182_v46 = vsel %vm1006_vm9, %v5176_v29, %v5131_v5 }
0x3179   :  { %v5172_v1 = vsel %vm973_vm8, %v5166_v42, %v5121_v62 }
0x317a   :  { %2596 = vrot.lane.b32.xlu1 %v5172_v1, %s3997_s28 }
0x317b   :  { %v2585_v39 = vpop.permute.xlu0 %2584 }
0x317c   :  { %v5194_v12 = vsel %vm973_vm8, %v2585_v39, %v5148_v31 }
0x317d   :  { %v2703_v30 = vrot.slane %v5194_v12, 6 }
0x317f   :  { %v2540_v56 = vpop.permute.xlu0 %2539 }
0x31ec   :  { %v2597_v14 = vpop.permute.xlu1 %2596 }
0x31ed   :  { %v2599_v19 = vsel %vm162_vm4, %v5182_v46, %v2597_v14 }
0x31ee   :  { %v2600_v0 = vpack.c.bf16 %v2599_v19, %v2599_v19 }
0x31f0   :  { %3377 = vmatmul.mubr.msk.bf16.vlgmr.msra.gmra.mrb[36].mxu1 %vm74_vm3, %v2600_v0 }
0x32c3   :  { %v2638_v62 = vpop.f32.mrb[36].mxu1 }
0x32c4   :  { %v2646_v4 = vrot.slane %v2638_v62, 4  ;;  %v2640_v21 = vpop.f32.mrb[37].mxu1 }
0x32c5   :  { %v2650_v3 = vrot.slane %v2640_v21, 6  ;;  %v2642_v45 = vpop.f32.mrb[38].mxu1 }
0x32c6   :  { %v2648_v2 = vadd.f32 %v2646_v4, %v4826_v33  ;;  %v2643_v25 = vpop.f32.mrb[39].mxu1 }
0x32c7   :  { %v2652_v8 = vadd.f32 %v2650_v3, %v4823_v23 }
0x32c8   :  { %3934 = vtanh.f32 %v2648_v2  ;;  %v3378_v24 = vmul.f32 -1.442695, %v2648_v2 }
0x32c9   :  { %3936 = vtanh.f32 %v2652_v8  ;;  %v3379_v20 = vmul.f32 -1.442695, %v2652_v8 }
0x32cb   :  { %3938 = vpow2.f32 %v3379_v20 }
0x32cc   :  { %3940 = vpow2.f32 %v3378_v24 }
0x32d2   :  { %v3935_v5 = vpop.eup %3934 }
0x32d3   :  { %v3937_v52 = vpop.eup %3936  ;;  %2667 = vrot.lane.b32.xlu0 %v3935_v5, %s3997_s28 }
0x32d4   :  { %2709 = vrot.lane.b32.xlu1 %v3937_v52, %s3997_s28 }
0x32d5   :  { %v3939_v18 = vpop.eup %3938 }
0x32d6   :  { %v2698_v28 = vadd.f32 1.0, %v3939_v18  ;;  %v3941_v38 = vpop.eup %3940 }
0x32d7   :  { %v2656_v47 = vadd.f32 1.0, %v3941_v38 }
0x32d8   :  { %2542 = vrot.lane.b32.xlu1 %v2395_v15, %s3996_s17  ;;  %3942 = vrcp.f32 %v2698_v28 }
0x32d9   :  { %3944 = vrcp.f32 %v2656_v47 }
0x32dc   :  { %2704 = vrot.lane.b32.xlu1 %v2703_v30, %s3997_s28 }
0x32e2   :  { %v3943_v43 = vpop.eup %3942 }
0x32e3   :  { %v3945_v15 = vpop.eup %3944 }
0x3345   :  { %v2668_v11 = vpop.permute.xlu0 %2667 }
0x3346   :  { %v2710_v31 = vpop.permute.xlu1 %2709  ;;  %v2670_v57 = vmul.f32 %v3945_v15, %v2668_v11 }
0x3347   :  { %v2712_v63 = vmul.f32 %v3943_v43, %v2710_v31 }
0x3349   :  { %2714 = vrot.lane.b32.xlu0 %v2712_v63, %s3997_s28 }
0x334a   :  { %v2543_v35 = vpop.permute.xlu1 %2542 }
0x334b   :  { %v2545_v9 = vsel %vm1006_vm9, %v2540_v56, %v2543_v35 }
0x334c   :  { %v2661_v55 = vrot.slane %v2545_v9, 4 }
0x334d   :  { %2672 = vrot.lane.b32.xlu0 %v2670_v57, %s3997_s28 }
0x334e   :  { %2662 = vrot.lane.b32.xlu1 %v2661_v55, %s3997_s28  ;;  %v2705_v41 = vpop.permute.xlu1 %2704 }
0x334f   :  { %v2707_v32 = vmul.f32 %v3943_v43, %v2705_v41 }
0x33bb   :  { %v2715_v50 = vpop.permute.xlu0 %2714 }
0x33bc   :  { %v2717_v60 = vadd.f32 %v2715_v50, %v2707_v32 }
0x33be   :  { %3946 = vtanh.f32 %v2717_v60  ;;  %v2725_v5 = vrot.slane %v2717_v60, 2 }
0x33bf   :  { %v2673_v14 = vpop.permute.xlu0 %2672 }
0x33c0   :  { %v2663_v13 = vpop.permute.xlu1 %2662 }
0x33c1   :  { %v2665_v61 = vmul.f32 %v3945_v15, %v2663_v13 }
0x33c3   :  { %v2675_v19 = vadd.f32 %v2673_v14, %v2665_v61 }
0x33c5   :  { %3948 = vtanh.f32 %v2675_v19  ;;  %v2683_v8 = vrot.slane %v2675_v19, 4 }
0x33c8   :  { %v3947_v0 = vpop.eup %3946 }
0x33c9   :  { %2720 = vrot.lane.b32.xlu1 %v3947_v0, %s3997_s28 }
0x33cf   :  { %v3949_v62 = vpop.eup %3948 }
0x33d0   :  { %2678 = vrot.lane.b32.xlu0 %v3949_v62, %s3997_s28 }
0x343b   :  { %v2721_v4 = vpop.permute.xlu1 %2720 }
0x343c   :  { %v2723_v21 = vmul.f32 %v3943_v43, %v2721_v4 }
0x343e   :  { %v2731_v3 = vrot.slane %v2723_v21, 2 }
0x3440   :  { %2732 = vrot.lane.b32.xlu1 %v2731_v3, %s3998_s29 }
0x3442   :  { %v2679_v45 = vpop.permute.xlu0 %2678 }
0x3443   :  { %v2681_v2 = vmul.f32 %v3945_v15, %v2679_v45 }
0x3445   :  { %v2689_v25 = vrot.slane %v2681_v2, 4 }
0x3447   :  { %2690 = vrot.lane.b32.xlu0 %v2689_v25, %s3998_s29 }
0x344b   :  { %2684 = vrot.lane.b32.xlu0 %v2683_v8, %s3996_s17 }
0x344f   :  { %2726 = vrot.lane.b32.xlu0 %v2725_v5, %s3996_s17 }
0x34b2   :  { %v5210_v52 = vpop.permute.xlu1 %2732 }
0x34b3   :  { %v2735_v39 = vsel %vm831_vm1, %v5210_v52, %v5172_v1  ;;  %v2736_v58 = vsel %vm831_vm1, %v5210_v52, 0.0 }
0x34b4   :  { %2738 = vrot.lane.b32.xlu1 %v2735_v39, %s3997_s28 }
0x34b9   :  { %v5217_v30 = vpop.permute.xlu0 %2690 }
0x34ba   :  { %v2693_v20 = vsel %vm864_vm2, %v5217_v30, %v5182_v46 }
0x34bd   :  { %v2685_v11 = vpop.permute.xlu0 %2684 }
0x34be   :  { %v2687_v35 = vsel %vm864_vm2, %v2685_v11, %v2545_v9  ;;  %v3679_v11 = vld [vmem:[%s5422_s4 + $0x20] sm:$0xff]  }
0x34bf   :  { %v2800_v55 = vrot.slane %v2687_v35, 2  ;;  %v3682_v35 = vld [vmem:[%s5422_s4 + $0x70] sm:$0xff]  }
0x34c1   :  { %v2727_v57 = vpop.permute.xlu0 %2726 }
0x3526   :  { %v2739_v24 = vpop.permute.xlu1 %2738 }
0x3527   :  { %v2741_v18 = vsel %vm162_vm4, %v2693_v20, %v2739_v24  ;;  %v2594_v20 = vsel %vm973_vm8, %v5166_v42, 0.0  ;;  %v3670_v24 = vld [vmem:[%s5422_s4 + $0x40] sm:$0xff]   ;;  %v2277_v42 = vsel %vm1115_vm12, %v5066_v54, 0.0  ;;  %v3675_v54 = vld [vmem:[%s5422_s4 + $0x10] sm:$0xff]  }
0x3528   :  { %v2742_v28 = vpack.c.bf16 %v2741_v18, %v2741_v18  ;;  %v3671_v18 = vld [vmem:[%s5422_s4] sm:$0xff]   ;;  %3437 = vmatprep.subr.bf16.mxu1 %v3670_v24  ;;  %v2401_v24 = vsel %vm1148_vm15, %v5113_v16, 0.0 }
0x3529   :  { %3438 = vmatpush3.bf16.msra.mxu1 %v3671_v18 }
0x352a   :  { %3380 = vmatmul.mubr.msk.bf16.vlgmr.msra.gmra.mrb[40].mxu0 %vm74_vm3, %v2742_v28  ;;  %v3672_v28 = vld [vmem:[%s5422_s4 + $0x48] sm:$0xff]  }
0x352b   :  { %3439 = vmatprep.subr.bf16.mxu1 %v3672_v28 }
0x35fd   :  { %v2780_v38 = vpop.f32.mrb[40].mxu0 }
0x35fe   :  { %v2788_v47 = vrot.slane %v2780_v38, 2  ;;  %v2782_v56 = vpop.f32.mrb[41].mxu0  ;;  %v2038_v38 = vsel %vm864_vm2, %v4946_v59, 0.0  ;;  %v1996_v59 = vsel %vm831_vm1, %v4956_v36, 0.0  ;;  %v3678_v36 = vld [vmem:[%s5422_s4 + $0x60] sm:$0xff]  }
0x35ff   :  { %v2791_v1 = vadd.f32 %v2782_v56, %v4823_v23  ;;  %v2784_v43 = vpop.f32.mrb[42].mxu0  ;;  %v2729_v23 = vsel %vm831_vm1, %v2727_v57, %v5194_v12  ;;  %v3673_v56 = vld [vmem:[%s5422_s4 + $0x8] sm:$0xff]  }
0x3600   :  { %v2790_v31 = vadd.f32 %v2788_v47, %v4826_v33  ;;  %v2785_v63 = vpop.f32.mrb[43].mxu0  ;;  %v3581_v47 = vpack.i.bf16 %v2038_v38, %v2594_v20  ;;  %v3591_v43 = vpack.i.bf16 %v1996_v59, %v2277_v42  ;;  %3440 = vmatpush3.bf16.msra.mxu1 %v3673_v56  ;;  %v3700_v20 = vld [vmem:[%s5422_s4 + $0xf8] sm:$0xff]  }
0x3601   :  { %3950 = vtanh.f32 %v2791_v1  ;;  %v3382_v41 = vmul.f32 -1.442695, %v2791_v1  ;;  %v3674_v1 = vld [vmem:[%s5422_s4 + $0x50] sm:$0xff]   ;;  %v3677_v63 = vld [vmem:[%s5422_s4 + $0x18] sm:$0xff]  }
0x3602   :  { %3952 = vtanh.f32 %v2790_v31  ;;  %v3381_v33 = vmul.f32 -1.442695, %v2790_v31  ;;  %3441 = vmatprep.subr.bf16.mxu1 %v3674_v1  ;;  %v3676_v31 = vld [vmem:[%s5422_s4 + $0x58] sm:$0xff]  }
0x3603   :  { %v3701_v56 = vld [vmem:[%s5422_s4 + $0xb8] sm:$0xff]  }
0x3604   :  { %3954 = vpow2.f32 %v3381_v33  ;;  %3442 = vmatpush3.bf16.msra.mxu1 %v3675_v54 }
0x3605   :  { %3956 = vpow2.f32 %v3382_v41  ;;  %3443 = vmatprep.subr.bf16.mxu1 %v3676_v31 }
0x3608   :  { %3444 = vmatpush3.bf16.msra.mxu1 %v3677_v63 }
0x3609   :  { %3445 = vmatprep.subr.bf16.mxu1 %v3678_v36 }
0x360b   :  { %v3951_v15 = vpop.eup %3950 }
0x360c   :  { %v3953_v46 = vpop.eup %3952  ;;  %2840 = vrot.lane.b32.xlu0 %v3951_v15, %s3997_s28  ;;  %v3680_v15 = vld [vmem:[%s5422_s4 + $0x68] sm:$0xff]   ;;  %3446 = vmatpush3.bf16.msra.mxu1 %v3679_v11 }
0x360d   :  { %2806 = vrot.lane.b32.xlu1 %v3953_v46, %s3997_s28  ;;  %3447 = vmatprep.subr.bf16.mxu1 %v3680_v15  ;;  %v3681_v46 = vld [vmem:[%s5422_s4 + $0x28] sm:$0xff]  }
0x360e   :  { %v3955_v32 = vpop.eup %3954 }
0x360f   :  { %v2795_v9 = vadd.f32 1.0, %v3955_v32  ;;  %v3957_v50 = vpop.eup %3956  ;;  %v3683_v32 = vld [vmem:[%s5422_s4 + $0x30] sm:$0xff]  }
0x3610   :  { %2835 = vrot.lane.b32.xlu0 %v2729_v23, %s3997_s28  ;;  %v2830_v60 = vadd.f32 1.0, %v3957_v50  ;;  %3448 = vmatpush3.bf16.msra.mxu1 %v3681_v46  ;;  %v2447_v50 = vsel %vm1115_vm12, %v3580_v7, 0.0 }
0x3611   :  { %2801 = vrot.lane.b32.xlu1 %v2800_v55, %s3997_s28  ;;  %3958 = vrcp.f32 %v2795_v9  ;;  %3449 = vmatprep.subr.bf16.mxu1 %v3682_v35  ;;  %v3684_v9 = vld [vmem:[%s5422_s4 + $0x78] sm:$0xff]  }
0x3612   :  { %3960 = vrcp.f32 %v2830_v60 }
0x3614   :  { %3450 = vmatpush3.bf16.msra.mxu1 %v3683_v32 }
0x3615   :  { %3451 = vmatprep.subr.bf16.mxu1 %v3684_v9 }
0x361b   :  { %v3959_v13 = vpop.eup %3958 }
0x361c   :  { %v3961_v12 = vpop.eup %3960 }
0x367e   :  { %v2841_v19 = vpop.permute.xlu0 %2840 }
0x367f   :  { %v2807_v61 = vpop.permute.xlu1 %2806  ;;  %v2843_v0 = vmul.f32 %v3961_v12, %v2841_v19  ;;  %v3686_v19 = vld [vmem:[%s5422_s4 + $0xc0] sm:$0xff]  }
0x3680   :  { %v2809_v14 = vmul.f32 %v3959_v13, %v2807_v61  ;;  %3459 = vmatprep.subr.bf16.mxu0 %v3686_v19 }
0x3681   :  { %3460 = vmatpush3.bf16.msra.mxu0 %v3687_v34 }
0x3682   :  { %2811 = vrot.lane.b32.xlu1 %v2809_v14, %s3997_s28  ;;  %v2836_v21 = vpop.permute.xlu0 %2835  ;;  %3461 = vmatprep.subr.bf16.mxu0 %v3688_v40 }
0x3683   :  { %v2802_v62 = vpop.permute.xlu1 %2801  ;;  %v2838_v2 = vmul.f32 %v3961_v12, %v2836_v21  ;;  %v3693_v21 = vld [vmem:[%s5422_s4 + $0x98] sm:$0xff]  }
0x3684   :  { %v2804_v4 = vmul.f32 %v3959_v13, %v2802_v62 }
0x3685   :  { %3462 = vmatpush3.bf16.msra.mxu0 %v3689_v27 }
0x3686   :  { %2845 = vrot.lane.b32.xlu1 %v2843_v0, %s3997_s28  ;;  %v2311_v0 = vsel %vm1148_vm15, %v5055_v10, 0.0  ;;  %v3691_v10 = vld [vmem:[%s5422_s4 + $0x90] sm:$0xff]   ;;  %3463 = vmatprep.subr.bf16.mxu0 %v3690_v53 }
0x3687   :  { %v3596_v52 = vpack.i.bf16 %v2311_v0, %v2736_v58 }
0x3689   :  { %3464 = vmatpush3.bf16.msra.mxu0 %v3691_v10 }
0x36f4   :  { %v2812_v3 = vpop.permute.xlu1 %2811 }
0x36f5   :  { %v2814_v45 = vadd.f32 %v2812_v3, %v2804_v4  ;;  %v2552_v4 = vsel %vm1006_vm9, %v5176_v29, 0.0  ;;  %v3694_v3 = vld [vmem:[%s5422_s4 + $0xe0] sm:$0xff]   ;;  %v3696_v29 = vld [vmem:[%s5422_s4 + $0xe8] sm:$0xff]  }
0x36f7   :  { %3962 = vtanh.f32 %v2814_v45  ;;  %v3695_v45 = vld [vmem:[%s5422_s4 + $0xa0] sm:$0xff]  }
0x36f8   :  { %v2846_v25 = vpop.permute.xlu1 %2845 }
0x36f9   :  { %v2848_v8 = vadd.f32 %v2846_v25, %v2838_v2  ;;  %v3697_v2 = vld [vmem:[%s5422_s4 + $0xa8] sm:$0xff]  }
0x36fb   :  { %3964 = vtanh.f32 %v2848_v8 }
0x3701   :  { %v3963_v5 = vpop.eup %3962 }
0x3702   :  { %2817 = vrot.lane.b32.xlu0 %v3963_v5, %s3997_s28  ;;  %v3698_v5 = vld [vmem:[%s5422_s4 + $0xf0] sm:$0xff]  }
0x3705   :  { %v3965_v39 = vpop.eup %3964 }
0x3706   :  { %2851 = vrot.lane.b32.xlu1 %v3965_v39, %s3997_s28  ;;  %v3699_v39 = vld [vmem:[%s5422_s4 + $0xb0] sm:$0xff]  }
0x370a   :  { %3582 = vrot.lane.b32.xlu1 %v3581_v47, %s3997_s28  ;;  %v2180_v47 = vsel %vm1006_vm9, %v4999_v49, 0.0 }
0x370b   :  { %v3606_v16 = vpack.i.bf16 %v2180_v47, %v4907_v51 }
0x370e   :  { %3592 = vrot.lane.b32.xlu1 %v3591_v43, %s3998_s29 }
0x3774   :  { %v2818_v57 = vpop.permute.xlu0 %2817 }
0x3775   :  { %v2820_v55 = vmul.f32 %v3959_v13, %v2818_v57  ;;  %v3685_v13 = vld [vmem:[%s5422_s4 + $0x38] sm:$0xff]  }
0x3776   :  { %3452 = vmatpush3.bf16.msra.mxu1 %v3685_v13 }
0x3777   :  { %v2822_v23 = vrot.slane %v2820_v55, 6 }
0x3778   :  { %v2852_v33 = vpop.permute.xlu1 %2851 }
0x3779   :  { %v2854_v41 = vmul.f32 %v3961_v12, %v2852_v33  ;;  %2823 = vrot.lane.b32.xlu0 %v2822_v23, %s3998_s29  ;;  %v2694_v12 = vsel %vm864_vm2, %v5217_v30, 0.0  ;;  %v3692_v30 = vld [vmem:[%s5422_s4 + $0xd8] sm:$0xff]  }
0x377a   :  { %3465 = vmatprep.subr.bf16.mxu0 %v3692_v30 }
0x377b   :  { %v2855_v60 = vsel %vm655_vm13, %v2854_v41, 0.0  ;;  %3466 = vmatpush3.bf16.msra.mxu0 %v3693_v21 }
0x377c   :  { %v3586_v61 = vpack.i.bf16 %v2447_v50, %v2855_v60  ;;  %v3583_v14 = vpop.permute.xlu1 %3582  ;;  %3467 = vmatprep.subr.bf16.mxu0 %v3694_v3 }
0x377d   :  { %v3585_v7 = vunpack.i.h.bf16 %v3583_v14  ;;  %v3584_v28 = vunpack.i.l.bf16 %v3583_v14 }
0x377e   :  { %3587 = vrot.lane.b32.xlu0 %v3586_v61, %s3996_s17 }
0x377f   :  { %v5329_v62 = vsel %vm162_vm4, %v2694_v12, %v3585_v7  ;;  %3468 = vmatpush3.bf16.msra.mxu0 %v3695_v45  ;;  %v2910_v1 = vsel %vm162_vm4, %v2138_v44, %v3584_v28 }
0x3780   :  { %3469 = vmatprep.subr.bf16.mxu0 %v3696_v29  ;;  %v3593_v25 = vpop.permute.xlu1 %3592 }
0x3781   :  { %v3594_v42 = vunpack.i.l.bf16 %v3593_v25  ;;  %v3595_v31 = vunpack.i.h.bf16 %v3593_v25 }
0x3782   :  { %3597 = vrot.lane.b32.xlu0 %v3596_v52, %s3996_s17  ;;  %v2993_v52 = vsub.s32 6, %v4084_v22 }
0x3783   :  { %3470 = vmatpush3.bf16.msra.mxu0 %v3697_v2  ;;  %v2911_v59 = vsel %vm74_vm3, %v2910_v1, %v3594_v42 }
0x3784   :  { %3471 = vmatprep.subr.bf16.mxu0 %v3698_v5 }
0x3786   :  { %2889 = vrot.lane.b32.xlu0 %v2552_v4, %s3998_s29 }
0x3787   :  { %3472 = vmatpush3.bf16.msra.mxu0 %v3699_v39 }
0x3788   :  { %3473 = vmatprep.subr.bf16.mxu0 %v3700_v20 }
0x378b   :  { %3474 = vmatpush3.bf16.msra.mxu0 %v3701_v56 }
0x37eb   :  { %v2824_v8 = vpop.permute.xlu0 %2823 }
0x37ec   :  { %v2826_v18 = vsel %vm687_vm14, %v2824_v8, 0.0 }
0x37ed   :  { %v3601_v38 = vpack.i.bf16 %v2826_v18, %v2401_v24 }
0x37ef   :  { %3602 = vrot.lane.b32.xlu1 %v3601_v38, %s3998_s29  ;;  %s4001_s29 = smov [#allocation2]  }
0x37f0   :  { %v3588_v48 = vpop.permute.xlu0 %3587  ;;  %s3275_s15 = sshll.u32 %s4001_s29, 4  ;;  %s3276_s15 = int_to_ptr.vmem [resolvable:$true] %s3275_s15 }
0x37f1   :  { %v3590_v17 = vunpack.i.h.bf16 %v3588_v48  ;;  %v3589_v49 = vunpack.i.l.bf16 %v3588_v48  ;;  %s3969_s28 = scalar_lea.vmem %s3276_s15, 32  ;;  %p3974_p1 = scmp.lt.s32.totalorder %s3276_s15, %s3276_s15 }
0x37f2   :  { %p3970_p0 = scmp.ne.s32.totalorder %s3276_s15, %s3969_s28  ;;  %p3975_p2 = scmp.lt.s32.totalorder %s3969_s28, %s3969_s28 }
0x37f3   :  { %v2907_v43 = vsel %vm162_vm4, %v4911_v37, %v3589_v49  ;;  %3607 = vrot.lane.b32.xlu1 %v3606_v16, %s3996_s17  ;;  %v2912_v54 = vsel %vm233_vm5, %v2911_v59, %v3590_v17 }
0x37f4   :  { %v3598_v26 = vpop.permute.xlu0 %3597  ;;  %v2920_v6 = vmax.f32 %v2912_v54, 0.0  ;;  %v2908_v51 = vsel %vm74_vm3, %v2907_v43, %v3595_v31  ;;  %p3976_p3 = por %p3975_p2, %p3974_p1 }
0x37f5   :  { %v3599_v63 = vunpack.i.l.bf16 %v3598_v26  ;;  %v3600_v57 = vunpack.i.h.bf16 %v3598_v26 }
0x37f6   :  { %v2924_v36 = vpack.c.bf16 %v2920_v6, %v2920_v6  ;;  %p3977_p4 = pnand %p3976_p3, %p3970_p0 }
0x37f7   :  { %v2909_v11 = vsel %vm233_vm5, %v2908_v51, %v3599_v63 }
0x37f8   :  { %v2919_v15 = vmax.f32 %v2909_v11, 0.0  ;;  %3219 = vmatprep.mubr.bf16.mxu1 %v2924_v36  ;;  %v2890_v41 = vpop.permute.xlu0 %2889 }
0x37fa   :  { %v2923_v46 = vpack.c.bf16 %v2919_v15, %v2919_v15 }
0x37fc   :  { %3220 = vmatmul.mubr.bf16.vlgmr.msra.gmra.mrb[40].mxu1 %v2923_v46 }
0x3861   :  { %v3603_v35 = vpop.permute.xlu1 %3602 }
0x3862   :  { %v3604_v37 = vunpack.i.l.bf16 %v3603_v35  ;;  %v3605_v55 = vunpack.i.h.bf16 %v3603_v35 }
0x3864   :  { %v2913_v23 = vsel %vm162_vm4, %v3604_v37, %v3600_v57  ;;  %v2917_v50 = vsel %vm74_vm3, %v5329_v62, %v3605_v55  ;;  %v3968_v62 = vld [vmem:[%s5421_s3] sm:$0xff] }
0x3865   :  { %v3608_v33 = vpop.permute.xlu1 %3607  ;;  %v2914_v60 = vsel %vm74_vm3, %v2913_v23, %v2890_v41  ;;  %v2994_v53 = vrot.slane %v3968_v62, %v2993_v52  ;;  %vm3267_vm3 = vcmask 17408  }
0x3866   :  { %v3610_v32 = vunpack.i.h.bf16 %v3608_v33  ;;  %v3609_v9 = vunpack.i.l.bf16 %v3608_v33 }
0x3868   :  { %v2915_v13 = vsel %vm233_vm5, %v2914_v60, %v3610_v32  ;;  %v2918_v61 = vsel %vm233_vm5, %v2917_v50, %v3609_v9 }
0x3869   :  { %v2921_v14 = vmax.f32 %v2915_v13, 0.0  ;;  %v2922_v19 = vmax.f32 %v2918_v61, 0.0 }
0x386b   :  { %v2925_v34 = vpack.c.bf16 %v2921_v14, %v2921_v14  ;;  %v2926_v40 = vpack.c.bf16 %v2922_v19, %v2922_v19 }
0x386d   :  { %3259 = vmatprep.mubr.bf16.mxu0 %v2926_v40 }
0x386e   :  { %3260 = vmatmul.mubr.bf16.vlgmr.msra.gmra.mrb[44].mxu0 %v2925_v34 }
0x38cf   :  { %v3453_v58 = vpop.f32.mrb[40].mxu1 }
0x38d0   :  { %v3454_v7 = vpop.f32.mrb[41].mxu1 }
0x38d1   :  { %v3455_v12 = vadd.f32 %v3454_v7, %v3453_v58  ;;  %v3456_v0 = vpop.f32.mrb[42].mxu1 }
0x38d2   :  { %v3457_v27 = vpop.f32.mrb[43].mxu1 }
0x38d3   :  { %v3222_v4 = vadd.f32 %v3455_v12, %v2994_v53 }
0x3941   :  { %v3475_v10 = vpop.f32.mrb[44].mxu0 }
0x3942   :  { %v3476_v30 = vpop.f32.mrb[45].mxu0 }
0x3943   :  { %v3477_v21 = vadd.f32 %v3476_v30, %v3475_v10  ;;  %v3478_v3 = vpop.f32.mrb[46].mxu0 }
0x3944   :  { %v3479_v45 = vpop.f32.mrb[47].mxu0 }
0x3945   :  { %v3262_v29 = vadd.f32 %v3477_v21, %v3222_v4 }
0x3947   :  { %3268 = vst.msk [vmem:[#allocation2] sm:$0x3] %vm3267_vm3, %v3262_v29 }
0x3948   :  { %3980 = shalt.err (!%p3977_p4)
}
0x3949   :  { %s3981_s18 = scalar_lea.hbm %s5423_s5, 32 }
0x394a   :  { %p3982_p5 = scmp.ne.s32.totalorder %s5423_s5, %s3981_s18  ;;  %p3985_p6 = scmp.lt.u32.totalorder %s3981_s18, %s5423_s5 }
0x394c   :  { %p3987_p7 = pnand %p3985_p6, %p3982_p5 }
0x394e   :  { %3990 = shalt.err (!%p3987_p7)
}
0x394f   :  { %3278 = dma.vmem_to_hbm [thread:$0]  %s3276_s15, 32, %s5423_s5, [#allocation3]  }
0x3950   :  { %3991 = dma.done.wait [#allocation3], 32  }
0x3951   :  { %3992 = vsyncadd [#allocation3], 4294967264 }
0x3952   :  { %3282 = vsyncpa [#allocation3], 1 }

</bundles_post_ra>
